<compile_context>
chip_gen: v7x
topology: tpu7x:2x2x1
jax: 0.10.0
libtpu: 0.0.40
codegen_flags: <defaults>
</compile_context>

<pallas_src>
import functools

import jax
import jax.numpy as jnp
from jax import lax
from jax.experimental import pallas as pl
from jax.experimental.pallas import tpu as pltpu


_SMALL_M = 128                    # below this, Pallas launch overhead dominates
_VMEM_LIMIT = 32 * 1024 * 1024    # explicit scoped-VMEM limit (v5e default is 16 MiB)


def _round_up(x, m):
    return (x + m - 1) // m * m


def _cdiv(a, b):
    return -(-a // b)


def _pick_tn(n):
    """Output-channel tile: full N when small, else an exact 128-multiple divisor
    (keeps the lane writeback unmasked and avoids N boundary blocks)."""
    if n <= 512:
        return n
    for t in (512, 384, 256, 128):
        if n % t == 0:
            return t
    return n   # e.g. 576: no 128-multiple divisor; a full-N block still fits VMEM


def _pick_tiles(m, n):
    tn = _pick_tn(n)
    tm = min(512, _round_up(m, 8))
    # v7x megacore: make sure there are at least 2 "parallel" blocks to shard.
    if _cdiv(m, tm) * _cdiv(n, tn) < 2 and m >= 16:
        tm = _round_up(_cdiv(m, 2), 8)
    return tm, tn


# ----------------------------------------------------------------------------
# Pallas kernel 1: single-full-K bf16 matmul with fused BatchNorm batch
# statistics (per-column sum and sum-of-squares), packed into one output.
# ----------------------------------------------------------------------------
def _matmul_bn_kernel(a_ref, b_ref, y_ref, stats_ref, *, m_total, tm, need_mask):
    # One full-K step: dot straight into a value (no accumulator round trip).
    acc = jnp.dot(a_ref[...], b_ref[...], preferred_element_type=jnp.float32)
    y_ref[...] = acc.astype(y_ref.dtype)
    if need_mask:
        # program_id only at kernel top level (never inside a pl.when body).
        row = (pl.program_id(0) * tm
               + lax.broadcasted_iota(jnp.int32, acc.shape, 0))
        acc = jnp.where(row < m_total, acc, 0.0)
    ssum = jnp.sum(acc, axis=0, keepdims=True)         # (1, tn)
    ssq = jnp.sum(acc * acc, axis=0, keepdims=True)    # (1, tn)
    stats_ref[...] = jnp.concatenate([ssum, ssq], axis=0)[None]


def fused_matmul_stats(a, b):
    """a: (M, K) bf16, b: (K, N) bf16 ->
       y (M, N) bf16, stats (gi, 2, N) f32 (stats[:,0]=col sums, stats[:,1]=col
       sums of squares; rows past the true M are masked out)."""
    M, K = a.shape
    K2, N = b.shape
    assert K == K2
    tm, tn = _pick_tiles(M, N)
    gi, gj = _cdiv(M, tm), _cdiv(N, tn)
    need_mask = (M % tm) != 0
    kernel = functools.partial(_matmul_bn_kernel, m_total=M, tm=tm,
                               need_mask=need_mask)
    y, stats = pl.pallas_call(
        kernel,
        out_shape=(jax.ShapeDtypeStruct((M, N), jnp.bfloat16),
                   jax.ShapeDtypeStruct((gi, 2, N), jnp.float32)),
        grid=(gi, gj),
        in_specs=[pl.BlockSpec((tm, K), lambda i, j: (i, 0)),
                  pl.BlockSpec((K, tn), lambda i, j: (0, j))],
        out_specs=(pl.BlockSpec((tm, tn), lambda i, j: (i, j)),
                   pl.BlockSpec((1, 2, tn), lambda i, j: (i, 0, j))),
        compiler_params=pltpu.CompilerParams(
            dimension_semantics=("parallel", "parallel"),
            vmem_limit_bytes=_VMEM_LIMIT),
    )(a, b)
    return y, stats


# ----------------------------------------------------------------------------
# Pallas kernel 2: fused per-channel affine (BatchNorm) + ReLU epilogue.
# ----------------------------------------------------------------------------
def _scale_bias_relu_kernel(x_ref, s_ref, b_ref, o_ref):
    y = x_ref[...].astype(jnp.float32) * s_ref[...] + b_ref[...]
    o_ref[...] = jnp.maximum(y, 0.0).astype(o_ref.dtype)


def scale_bias_relu(y, scale, bias):
    """y: (M, N) bf16, scale/bias: (N,) f32 -> relu(y * scale + bias) bf16."""
    M, N = y.shape
    tr = min(1024 if N <= 512 else 512, _round_up(M, 8))
    if _cdiv(M, tr) < 2 and M >= 16:      # keep both v7x TensorCores busy
        tr = _round_up(_cdiv(M, 2), 8)
    return pl.pallas_call(
        _scale_bias_relu_kernel,
        out_shape=jax.ShapeDtypeStruct((M, N), jnp.bfloat16),
        grid=(_cdiv(M, tr),),
        in_specs=[pl.BlockSpec((tr, N), lambda i: (i, 0)),
                  pl.BlockSpec((1, N), lambda i: (0, 0)),
                  pl.BlockSpec((1, N), lambda i: (0, 0))],
        out_specs=pl.BlockSpec((tr, N), lambda i: (i, 0)),
        compiler_params=pltpu.CompilerParams(
            dimension_semantics=("parallel",),
            vmem_limit_bytes=_VMEM_LIMIT),
    )(y, scale.reshape(1, N).astype(jnp.float32),
      bias.reshape(1, N).astype(jnp.float32))


# ----------------------------------------------------------------------------
# BasicConv2d = Conv2d(bias=False) + BatchNorm2d(eps=1e-3, training) + ReLU
# ----------------------------------------------------------------------------
def _im2col(x, kh, kw, stride, padding):
    """x NHWC (bf16) -> (N*OH*OW, kh*kw*C) with (kh, kw, c) ordering."""
    sh, sw = stride
    ph, pw = padding
    if ph or pw:
        x = jnp.pad(x, ((0, 0), (ph, ph), (pw, pw), (0, 0)))
    n, h, w, c = x.shape
    oh = (h - kh) // sh + 1
    ow = (w - kw) // sw + 1
    cols = []
    for i in range(kh):
        for j in range(kw):
            cols.append(x[:, i:i + sh * (oh - 1) + 1:sh,
                           j:j + sw * (ow - 1) + 1:sw, :])
    patches = jnp.concatenate(cols, axis=-1)
    return patches.reshape(n * oh * ow, kh * kw * c), oh, ow


def _bn_affine(mean, ex2, gamma, beta):
    # NOTE: var = E[x^2] - E[x]^2 in f32 (cancellation-prone for very large
    # activation means; fine for the synthetic init used here). eps = 1e-3.
    var = jnp.maximum(ex2 - mean * mean, 0.0)
    scale = gamma * lax.rsqrt(var + 1e-3)
    bias = beta - mean * scale
    return scale, bias


def _conv_bn_relu_small(a, wm, gamma, beta):
    """Tiny-M path (aux head): plain XLA GEMM, no Pallas launch overhead."""
    y = jnp.dot(a.astype(jnp.float32), wm.astype(jnp.float32))
    m = y.shape[0]
    mean = jnp.sum(y, axis=0) / m
    ex2 = jnp.sum(y * y, axis=0) / m
    scale, bias = _bn_affine(mean, ex2, gamma, beta)
    return jnp.maximum(y * scale + bias, 0.0).astype(jnp.bfloat16)


@functools.partial(jax.jit, static_argnames=("stride", "padding"))
def conv_bn_relu(x, params, stride=(1, 1), padding=(0, 0)):
    w, gamma, beta = params["w"], params["gamma"], params["beta"]
    kh, kw, cin, cout = w.shape
    n = x.shape[0]
    if kh == 1 and kw == 1 and stride == (1, 1) and padding == (0, 0):
        _, oh, ow, _ = x.shape
        a = x.reshape(n * oh * ow, cin)              # free reshape, no im2col
        wm = w.reshape(cin, cout)
    else:
        # TODO(synk): im2col still materialized (bf16); shifted-window DMA in
        # the matmul's A index_map would remove the kh*kw HBM blow-up.
        a, oh, ow = _im2col(x, kh, kw, stride, padding)
        wm = w.reshape(kh * kw * cin, cout)
    m = a.shape[0]
    if m < _SMALL_M:                                 # aux-head tiny GEMMs
        y = _conv_bn_relu_small(a, wm, gamma, beta)
        return y.reshape(n, oh, ow, cout)
    y, stats = fused_matmul_stats(a, wm)
    # BatchNorm2d in training mode: per-channel batch stats (biased var).
    # (Stats come from the f32 accumulator; the affine is applied to the
    #  bf16-rounded y — tiny mismatch vs. a reference that renormalizes the
    #  stored tensor.)
    mean = jnp.sum(stats[:, 0, :], axis=0) / m
    ex2 = jnp.sum(stats[:, 1, :], axis=0) / m
    scale, bias = _bn_affine(mean, ex2, gamma, beta)
    y = scale_bias_relu(y, scale, bias)
    return y.reshape(n, oh, ow, cout)


def fused_1x1_convs(x, plist):
    """Horizontally fuse sibling 1x1 convs sharing input x: one matmul +
    one BN/ReLU pass over concatenated output channels, then split."""
    p = {"w": jnp.concatenate([q["w"] for q in plist], axis=-1),
         "gamma": jnp.concatenate([q["gamma"] for q in plist]),
         "beta": jnp.concatenate([q["beta"] for q in plist])}
    y = conv_bn_relu(x, p)
    outs, o = [], 0
    for q in plist:
        c = q["w"].shape[-1]
        outs.append(y[..., o:o + c])
        o += c
    return outs


# ----------------------------------------------------------------------------
# Pooling glue (minor FLOPs; kept in plain JAX, bf16)
# ----------------------------------------------------------------------------
@functools.partial(jax.jit, static_argnames=("ksize", "stride"))
def max_pool(x, ksize=3, stride=2):
    return lax.reduce_window(x, jnp.array(-jnp.inf, x.dtype), lax.max,
                             (1, ksize, ksize, 1), (1, stride, stride, 1),
                             "VALID")


@functools.partial(jax.jit, static_argnames=("ksize", "stride", "pad"))
def avg_pool(x, ksize, stride, pad=0):
    # PyTorch F.avg_pool2d default count_include_pad=True -> divide by k*k
    s = lax.reduce_window(x, jnp.array(0, x.dtype), lax.add,
                          (1, ksize, ksize, 1), (1, stride, stride, 1),
                          ((0, 0), (pad, pad), (pad, pad), (0, 0)))
    return (s / float(ksize * ksize)).astype(x.dtype)


# ----------------------------------------------------------------------------
# Deterministic parameter init (synthetic; matches module __init__ shapes)
# ----------------------------------------------------------------------------
class _Keys:
    def __init__(self, seed=0):
        self._key = jax.random.PRNGKey(seed)

    def __call__(self):
        self._key, sub = jax.random.split(self._key)
        return sub


def init_conv(kg, cin, cout, ksize):
    kh, kw = ksize if isinstance(ksize, tuple) else (ksize, ksize)
    w = 0.05 * jax.random.normal(kg(), (kh, kw, cin, cout), jnp.float32)
    return {"w": w.astype(jnp.bfloat16),
            "gamma": jnp.ones((cout,), jnp.float32),
            "beta": jnp.zeros((cout,), jnp.float32)}


def init_inception_a(kg, cin, pool_features):
    return {"b1": init_conv(kg, cin, 64, 1),
            "b5_1": init_conv(kg, cin, 48, 1),
            "b5_2": init_conv(kg, 48, 64, 5),
            "b3d_1": init_conv(kg, cin, 64, 1),
            "b3d_2": init_conv(kg, 64, 96, 3),
            "b3d_3": init_conv(kg, 96, 96, 3),
            "bp": init_conv(kg, cin, pool_features, 1)}


def init_inception_b(kg, cin):
    return {"b3": init_conv(kg, cin, 384, 3),
            "b3d_1": init_conv(kg, cin, 64, 1),
            "b3d_2": init_conv(kg, 64, 96, 3),
            "b3d_3": init_conv(kg, 96, 96, 3)}


def init_inception_c(kg, cin, c7):
    return {"b1": init_conv(kg, cin, 192, 1),
            "b7_1": init_conv(kg, cin, c7, 1),
            "b7_2": init_conv(kg, c7, c7, (1, 7)),
            "b7_3": init_conv(kg, c7, 192, (7, 1)),
            "b7d_1": init_conv(kg, cin, c7, 1),
            "b7d_2": init_conv(kg, c7, c7, (7, 1)),
            "b7d_3": init_conv(kg, c7, c7, (1, 7)),
            "b7d_4": init_conv(kg, c7, c7, (7, 1)),
            "b7d_5": init_conv(kg, c7, 192, (1, 7)),
            "bp": init_conv(kg, cin, 192, 1)}


def init_inception_d(kg, cin):
    return {"b3_1": init_conv(kg, cin, 192, 1),
            "b3_2": init_conv(kg, 192, 320, 3),
            "b7_1": init_conv(kg, cin, 192, 1),
            "b7_2": init_conv(kg, 192, 192, (1, 7)),
            "b7_3": init_conv(kg, 192, 192, (7, 1)),
            "b7_4": init_conv(kg, 192, 192, 3)}


def init_inception_e(kg, cin):
    return {"b1": init_conv(kg, cin, 320, 1),
            "b3_1": init_conv(kg, cin, 384, 1),
            "b3_2a": init_conv(kg, 384, 384, (1, 3)),
            "b3_2b": init_conv(kg, 384, 384, (3, 1)),
            "b3d_1": init_conv(kg, cin, 448, 1),
            "b3d_2": init_conv(kg, 448, 384, 3),
            "b3d_3a": init_conv(kg, 384, 384, (1, 3)),
            "b3d_3b": init_conv(kg, 384, 384, (3, 1)),
            "bp": init_conv(kg, cin, 192, 1)}


def init_aux(kg, cin, num_classes):
    return {"conv0": init_conv(kg, cin, 128, 1),
            "conv1": init_conv(kg, 128, 768, 5),
            "fc_w": 0.01 * jax.random.normal(kg(), (768, num_classes), jnp.float32),
            "fc_b": jnp.zeros((num_classes,), jnp.float32)}


def init_googlenet(num_classes=16, seed=0):
    kg = _Keys(seed)
    return {"c1a": init_conv(kg, 3, 32, 3),
            "c2a": init_conv(kg, 32, 32, 3),
            "c2b": init_conv(kg, 32, 64, 3),
            "c3b": init_conv(kg, 64, 80, 1),
            "c4a": init_conv(kg, 80, 192, 3),
            "m5b": init_inception_a(kg, 192, 32),
            "m5c": init_inception_a(kg, 256, 64),
            "m5d": init_inception_a(kg, 288, 64),
            "m6a": init_inception_b(kg, 288),
            "m6b": init_inception_c(kg, 768, 128),
            "m6c": init_inception_c(kg, 768, 160),
            "m6d": init_inception_c(kg, 768, 160),
            "m6e": init_inception_c(kg, 768, 192),
            "aux": init_aux(kg, 768, num_classes),
            "m7a": init_inception_d(kg, 768),
            "m7b": init_inception_e(kg, 1280),
            "m7c": init_inception_e(kg, 2048),
            "fc_w": 0.01 * jax.random.normal(kg(), (2048, num_classes), jnp.float32),
            "fc_b": jnp.zeros((num_classes,), jnp.float32)}


# ----------------------------------------------------------------------------
# Inception block forwards (branch heads horizontally fused)
# ----------------------------------------------------------------------------
def inception_a(x, p):
    b1, b5, b3 = fused_1x1_convs(x, [p["b1"], p["b5_1"], p["b3d_1"]])
    b5 = conv_bn_relu(b5, p["b5_2"], padding=(2, 2))
    b3 = conv_bn_relu(b3, p["b3d_2"], padding=(1, 1))
    b3 = conv_bn_relu(b3, p["b3d_3"], padding=(1, 1))
    bp = avg_pool(x, 3, 1, 1)
    bp = conv_bn_relu(bp, p["bp"])
    return jnp.concatenate([b1, b5, b3, bp], axis=-1)


def inception_b(x, p):
    b3 = conv_bn_relu(x, p["b3"], stride=(2, 2))
    b3d = conv_bn_relu(x, p["b3d_1"])
    b3d = conv_bn_relu(b3d, p["b3d_2"], padding=(1, 1))
    b3d = conv_bn_relu(b3d, p["b3d_3"], stride=(2, 2))
    bp = max_pool(x, 3, 2)
    return jnp.concatenate([b3, b3d, bp], axis=-1)


def inception_c(x, p):
    b1, b7, b7d = fused_1x1_convs(x, [p["b1"], p["b7_1"], p["b7d_1"]])
    b7 = conv_bn_relu(b7, p["b7_2"], padding=(0, 3))
    b7 = conv_bn_relu(b7, p["b7_3"], padding=(3, 0))
    b7d = conv_bn_relu(b7d, p["b7d_2"], padding=(3, 0))
    b7d = conv_bn_relu(b7d, p["b7d_3"], padding=(0, 3))
    b7d = conv_bn_relu(b7d, p["b7d_4"], padding=(3, 0))
    b7d = conv_bn_relu(b7d, p["b7d_5"], padding=(0, 3))
    bp = avg_pool(x, 3, 1, 1)
    bp = conv_bn_relu(bp, p["bp"])
    return jnp.concatenate([b1, b7, b7d, bp], axis=-1)


def inception_d(x, p):
    b3, b7 = fused_1x1_convs(x, [p["b3_1"], p["b7_1"]])
    b3 = conv_bn_relu(b3, p["b3_2"], stride=(2, 2))
    b7 = conv_bn_relu(b7, p["b7_2"], padding=(0, 3))
    b7 = conv_bn_relu(b7, p["b7_3"], padding=(3, 0))
    b7 = conv_bn_relu(b7, p["b7_4"], stride=(2, 2))
    bp = max_pool(x, 3, 2)
    return jnp.concatenate([b3, b7, bp], axis=-1)


def inception_e(x, p):
    b1, b3, b3d = fused_1x1_convs(x, [p["b1"], p["b3_1"], p["b3d_1"]])
    b3 = jnp.concatenate([conv_bn_relu(b3, p["b3_2a"], padding=(0, 1)),
                          conv_bn_relu(b3, p["b3_2b"], padding=(1, 0))], axis=-1)
    b3d = conv_bn_relu(b3d, p["b3d_2"], padding=(1, 1))
    b3d = jnp.concatenate([conv_bn_relu(b3d, p["b3d_3a"], padding=(0, 1)),
                           conv_bn_relu(b3d, p["b3d_3b"], padding=(1, 0))], axis=-1)
    bp = avg_pool(x, 3, 1, 1)
    bp = conv_bn_relu(bp, p["bp"])
    return jnp.concatenate([b1, b3, b3d, bp], axis=-1)


def inception_aux(x, p):
    x = avg_pool(x, 5, 3, 0)
    x = conv_bn_relu(x, p["conv0"])   # M=50  -> tiny-M jnp.dot path
    x = conv_bn_relu(x, p["conv1"])   # M=2   -> tiny-M jnp.dot path
    x = jnp.mean(x.astype(jnp.float32), axis=(1, 2))   # adaptive_avg_pool + flatten
    return jnp.dot(x, p["fc_w"]) + p["fc_b"]            # tiny GEMM: plain jnp.dot


# ----------------------------------------------------------------------------
# GoogLeNet (InceptionV3) forward — module is in training mode by default,
# so the aux head is computed, BN uses batch stats and dropout is active.
# ----------------------------------------------------------------------------
def googlenet_forward(x_nchw, params, dropout_key):
    x = jnp.transpose(x_nchw, (0, 2, 3, 1)).astype(jnp.bfloat16)   # NCHW -> NHWC
    x = conv_bn_relu(x, params["c1a"], stride=(2, 2))
    x = conv_bn_relu(x, params["c2a"])
    x = conv_bn_relu(x, params["c2b"], padding=(1, 1))
    x = max_pool(x, 3, 2)
    x = conv_bn_relu(x, params["c3b"])
    x = conv_bn_relu(x, params["c4a"])
    x = max_pool(x, 3, 2)
    x = inception_a(x, params["m5b"])
    x = inception_a(x, params["m5c"])
    x = inception_a(x, params["m5d"])
    x = inception_b(x, params["m6a"])
    x = inception_c(x, params["m6b"])
    x = inception_c(x, params["m6c"])
    x = inception_c(x, params["m6d"])
    x = inception_c(x, params["m6e"])
    aux = inception_aux(x, params["aux"])
    x = inception_d(x, params["m7a"])
    x = inception_e(x, params["m7b"])
    x = inception_e(x, params["m7c"])
    x = jnp.mean(x.astype(jnp.float32), axis=(1, 2))   # adaptive_avg_pool + flatten
    # F.dropout(p=0.5, training=True)
    # TODO(synk): dropout mask cannot bit-match torch's RNG stream; fixed JAX key.
    keep = jax.random.bernoulli(dropout_key, 0.5, x.shape)
    x = jnp.where(keep, x / 0.5, 0.0)
    logits = jnp.dot(x, params["fc_w"]) + params["fc_b"]   # tiny GEMM: jnp.dot
    return logits, aux


if __name__ == "__main__":
    key = jax.random.PRNGKey(0)
    k_in, k_drop = jax.random.split(key)
    # 299x299 is the smallest spatial size for which the aux head (5x5 valid
    # conv after a 5/3 avg-pool of the 17x17 Mixed_6e map) is well-defined.
    x = jax.random.normal(k_in, (2, 3, 299, 299), jnp.float32)   # NCHW like PyTorch
    params = init_googlenet(num_classes=16, seed=0)
    logits, aux = googlenet_forward(x, params, k_drop)
    jax.block_until_ready((logits, aux))
    assert logits.shape == (2, 16) and aux.shape == (2, 16)
    assert bool(jnp.isfinite(logits).all()) and bool(jnp.isfinite(aux).all())
    print("KERNEL_OK")
</pallas_src>

<mosaic_0001>
module attributes {stable_mosaic.version = 11 : i64} {
  func.func @_matmul_bn_kernel(%arg0: i32, %arg1: i32, %arg2: memref<512x27xbf16, #tpu.memory_space<vmem>>, %arg3: memref<27x32xbf16, #tpu.memory_space<vmem>>, %arg4: memref<512x32xbf16, #tpu.memory_space<vmem>>, %arg5: memref<1x2x32xf32, #tpu.memory_space<vmem>>) attributes {dimension_semantics = [#tpu.dimension_semantics<parallel>, #tpu.dimension_semantics<parallel>], iteration_bounds = array<i64: 87, 1>, scalar_prefetch = 0 : i64, scratch_operands = 0 : i64, tpu.core_type = #tpu.core_type<tc>, window_params = [{transform_indices = @transform_0, window_bounds = array<i64: 512, 27>}, {transform_indices = @transform_1, window_bounds = array<i64: 27, 32>}, {transform_indices = @transform_2, window_bounds = array<i64: 512, 32>}, {transform_indices = @transform_3, window_bounds = array<i64: 1, 2, 32>}]} {
    %c0 = arith.constant 0 : index
    %c0_0 = arith.constant 0 : index
    %0 = vector.load %arg2[%c0, %c0_0] : memref<512x27xbf16, #tpu.memory_space<vmem>>, vector<512x27xbf16>
    %c0_1 = arith.constant 0 : index
    %c0_2 = arith.constant 0 : index
    %1 = vector.load %arg3[%c0_1, %c0_2] : memref<27x32xbf16, #tpu.memory_space<vmem>>, vector<27x32xbf16>
    %cst = arith.constant dense<0.000000e+00> : vector<512x32xf32>
    %2 = tpu.matmul %0, %1, %cst {dimension_numbers = #tpu.dot_dimension_numbers<[1], [0], [0], [1], [0, 0, 1, 1], [], []>} : vector<512x27xbf16>, vector<27x32xbf16>, vector<512x32xf32> -> vector<512x32xf32>
    %3 = arith.truncf %2 : vector<512x32xf32> to vector<512x32xbf16>
    %c0_3 = arith.constant 0 : index
    %c0_4 = arith.constant 0 : index
    %4 = vector.load %arg4[%c0_3, %c0_4] : memref<512x32xbf16, #tpu.memory_space<vmem>>, vector<512x32xbf16>
    tpu.vector_store %arg4[%c0_3, %c0_4], %3 {strides = array<i32>} : memref<512x32xbf16, #tpu.memory_space<vmem>>, vector<512x32xbf16>,
    %c512_i32 = arith.constant 512 : i32
    %5 = arith.muli %arg0, %c512_i32 : i32
    %6 = tpu.iota {dimensions = array<i32: 0>} : vector<512x32xi32>
    %7 = vector.broadcast %5 : i32 to vector<512x32xi32>
    %8 = arith.addi %7, %6 : vector<512x32xi32>
    %c44402_i32 = arith.constant 44402 : i32
    %9 = vector.broadcast %c44402_i32 : i32 to vector<512x32xi32>
    %10 = arith.cmpi slt, %8, %9 : vector<512x32xi32>
    %cst_5 = arith.constant 0.000000e+00 : f32
    %11 = vector.broadcast %cst_5 : f32 to vector<512x32xf32>
    %12 = arith.select %10, %2, %11 : vector<512x32xi1>, vector<512x32xf32>
    %cst_6 = arith.constant dense<0.000000e+00> : vector<32xf32>
    %13 = vector.multi_reduction <add>, %12, %cst_6 [0] : vector<512x32xf32> to vector<32xf32>
    %14 = vector.shape_cast %13 : vector<32xf32> to vector<1x32xf32>
    %15 = arith.mulf %12, %12 : vector<512x32xf32>
    %cst_7 = arith.constant dense<0.000000e+00> : vector<32xf32>
    %16 = vector.multi_reduction <add>, %15, %cst_7 [0] : vector<512x32xf32> to vector<32xf32>
    %17 = vector.shape_cast %16 : vector<32xf32> to vector<1x32xf32>
    %18 = tpu.concatenate %14, %17 in 0 : vector<1x32xf32>, vector<1x32xf32> -> vector<2x32xf32>
    %19 = vector.shape_cast %18 : vector<2x32xf32> to vector<1x2x32xf32>
    %c0_8 = arith.constant 0 : index
    %c0_9 = arith.constant 0 : index
    %c0_10 = arith.constant 0 : index
    %20 = vector.load %arg5[%c0_8, %c0_9, %c0_10] : memref<1x2x32xf32, #tpu.memory_space<vmem>>, vector<1x2x32xf32>
    tpu.vector_store %arg5[%c0_8, %c0_9, %c0_10], %19 {strides = array<i32>} : memref<1x2x32xf32, #tpu.memory_space<vmem>>, vector<1x2x32xf32>,
    return
  }
  func.func @transform_0(%arg0: i32, %arg1: i32) -> (i32, i32) {
    %c0_i32 = arith.constant 0 : i32
    %c0_i32_0 = arith.constant 0 : i32
    return %arg0, %c0_i32 : i32, i32
  }
  func.func @transform_1(%arg0: i32, %arg1: i32) -> (i32, i32) {
    %c0_i32 = arith.constant 0 : i32
    %c0_i32_0 = arith.constant 0 : i32
    return %c0_i32, %arg1 : i32, i32
  }
  func.func @transform_2(%arg0: i32, %arg1: i32) -> (i32, i32) {
    %c0_i32 = arith.constant 0 : i32
    return %arg0, %arg1 : i32, i32
  }
  func.func @transform_3(%arg0: i32, %arg1: i32) -> (i32, i32, i32) {
    %c0_i32 = arith.constant 0 : i32
    %c0_i32_0 = arith.constant 0 : i32
    return %arg0, %c0_i32, %arg1 : i32, i32, i32
  }
}

module attributes {stable_mosaic.version = 11 : i64} {
  func.func @_scale_bias_relu_kernel(%arg0: i32, %arg1: memref<1024x32xbf16, #tpu.memory_space<vmem>>, %arg2: memref<1x32xf32, #tpu.memory_space<vmem>>, %arg3: memref<1x32xf32, #tpu.memory_space<vmem>>, %arg4: memref<1024x32xbf16, #tpu.memory_space<vmem>>) attributes {dimension_semantics = [#tpu.dimension_semantics<parallel>], iteration_bounds = array<i64: 44>, scalar_prefetch = 0 : i64, scratch_operands = 0 : i64, tpu.core_type = #tpu.core_type<tc>, window_params = [{transform_indices = @transform_0, window_bounds = array<i64: 1024, 32>}, {pipeline_mode = #tpu.pipeline_mode<synchronous>, transform_indices = @transform_1, window_bounds = array<i64: 1, 32>}, {pipeline_mode = #tpu.pipeline_mode<synchronous>, transform_indices = @transform_2, window_bounds = array<i64: 1, 32>}, {transform_indices = @transform_3, window_bounds = array<i64: 1024, 32>}]} {
    %c0 = arith.constant 0 : index
    %c0_0 = arith.constant 0 : index
    %0 = vector.load %arg1[%c0, %c0_0] : memref<1024x32xbf16, #tpu.memory_space<vmem>>, vector<1024x32xbf16>
    %1 = arith.extf %0 : vector<1024x32xbf16> to vector<1024x32xf32>
    %c0_1 = arith.constant 0 : index
    %c0_2 = arith.constant 0 : index
    %2 = vector.load %arg2[%c0_1, %c0_2] : memref<1x32xf32, #tpu.memory_space<vmem>>, vector<1x32xf32>
    %3 = vector.broadcast %2 : vector<1x32xf32> to vector<1024x32xf32>
    %4 = arith.mulf %1, %3 : vector<1024x32xf32>
    %c0_3 = arith.constant 0 : index
    %c0_4 = arith.constant 0 : index
    %5 = vector.load %arg3[%c0_3, %c0_4] : memref<1x32xf32, #tpu.memory_space<vmem>>, vector<1x32xf32>
    %6 = vector.broadcast %5 : vector<1x32xf32> to vector<1024x32xf32>
    %7 = arith.addf %4, %6 : vector<1024x32xf32>
    %cst = arith.constant 0.000000e+00 : f32
    %8 = vector.broadcast %cst : f32 to vector<1024x32xf32>
    %9 = arith.maximumf %7, %8 : vector<1024x32xf32>
    %10 = arith.truncf %9 : vector<1024x32xf32> to vector<1024x32xbf16>
    %c0_5 = arith.constant 0 : index
    %c0_6 = arith.constant 0 : index
    %11 = vector.load %arg4[%c0_5, %c0_6] : memref<1024x32xbf16, #tpu.memory_space<vmem>>, vector<1024x32xbf16>
    tpu.vector_store %arg4[%c0_5, %c0_6], %10 {strides = array<i32>} : memref<1024x32xbf16, #tpu.memory_space<vmem>>, vector<1024x32xbf16>,
    return
  }
  func.func @transform_0(%arg0: i32) -> (i32, i32) {
    %c0_i32 = arith.constant 0 : i32
    %c0_i32_0 = arith.constant 0 : i32
    return %arg0, %c0_i32 : i32, i32
  }
  func.func @transform_1(%arg0: i32) -> (i32, i32) {
    %c0_i32 = arith.constant 0 : i32
    %c0_i32_0 = arith.constant 0 : i32
    %c0_i32_1 = arith.constant 0 : i32
    return %c0_i32, %c0_i32_0 : i32, i32
  }
  func.func @transform_2(%arg0: i32) -> (i32, i32) {
    %c0_i32 = arith.constant 0 : i32
    %c0_i32_0 = arith.constant 0 : i32
    %c0_i32_1 = arith.constant 0 : i32
    return %c0_i32, %c0_i32_0 : i32, i32
  }
  func.func @transform_3(%arg0: i32) -> (i32, i32) {
    %c0_i32 = arith.constant 0 : i32
    %c0_i32_0 = arith.constant 0 : i32
    return %arg0, %c0_i32 : i32, i32
  }
}

</mosaic_0001>

<bundles_post_ra>
// kernel: conv_bn_relu.2
= control target key start
LH: loop header
LB: loop body
LE: loop exit
PB: predicated region body
PF: predicated region fallthrough
CT: control target
= control target key end

     0   :  { %s2918_s12 = smov 0   ;;  %s2920_s13 = smov 0   ;;  %s4118_s0 = inlined_call_operand.vmem [shape: bf16[44402,27], index: 0, kind: input, shape index: {}]   ;;  %s4119_s1 = inlined_call_operand.vmem [shape: bf16[27,32], index: 1, kind: input, shape index: {}]   ;;  %s4120_s2 = inlined_call_operand.vmem [shape: bf16[44402,32], index: 2, kind: output, shape index: {0}]   ;;  %s4121_s3 = inlined_call_operand.vmem [shape: f32[87,2,32], index: 3, kind: output, shape index: {1}]  }
   0x1   :  { %s2922_s14 = smov 0   ;;  %s2924_s15 = smov 0  }
   0x2   :  { %s2926_s16 = smov 0  }
   0x3 LB: > { %s2323_s17 = sadd.s32 4294967295, %s2863_s16   ;;  %s26_s18 = sadd.s32 1, %s2859_s15  ;;  %s2863_s16 = sphi %s2926_s16, %s14_s16   ;;  %s2859_s15 = sphi %s2924_s15, %s4144_s15   ;;  %s2855_s14 = sphi %s2922_s14, %s4143_s14   ;;  %s2851_s13 = sphi %s2920_s13, %s4142_s13   ;;  %s2847_s12 = sphi %s2918_s12, %s4141_s12  }
   0x4   : > { %p28_p0 = scmp.ge.s32.totalorder %s26_s18, 87  ;;  %s87_s19 = sadd.s32 1, %s2851_s13 }
   0x5   : > { %p97_p1 = scmp.ne.s32.totalorder %s2851_s13, %s2847_s12  ;;  %p98_p2 = scmp.eq.s32.totalorder %s2323_s17, 86 }
   0x6   : > { %s4146_s18 = smov (%p28_p0, %s26_s18), 0  ;;  %p2328_p4 = scmp.ge.s32.totalorder %s2863_s16, 1 }
   0x7   : > { %p2950_p3 = por %p98_p2, %p97_p1  ;;  %s82_s21 = ssub.s32 %s2859_s15, %s4146_s18 }
   0x8   : > { %p174_p5 = scmp.lt.s32.totalorder %s2863_s16, 88  ;;  %p85_p6 = scmp.eq.s32.totalorder %s82_s21, 0 }
   0xa   : > { %p175_p7 = pnand %p2328_p4, %p174_p5 }
   0xb   : > { %s2959_s22 = scalar_select %p85_p6, %s2851_s13, %s87_s19  }
   0xc   : > { %178 = sbr.rel (%p175_p7) target bundleno = 489 (0x1e9), region = 28 }
  0x13   : > { %v2759_v0 = vld [vmem:[%s4119_s1] sm:$0xff]   ;;  %vm579_vm0 = vcmask 1044480   ;;  %v2760_v1 = vld [vmem:[%s4119_s1 + $0x8] sm:$0x3f]   ;;  %vm580_vm1 = vcmask 1045504   ;;  %s2968_s27 = sshll.u32 %s2855_s14, 6  ;;  %v1197_v38 = vlaneseq }
  0x14   : > { %2582 = vmatprep.subr.bf16.mxu0 %v2759_v0  ;;  %2650 = vmatprep.subr.bf16.mxu1 %v2759_v0  ;;  %v2897_v2 = vmov 65535   ;;  %p217_p8 = scmp.lt.s32.totalorder %s2968_s27, 5550  ;;  %vm482_vm2 = vcmask 220160   ;;  %s2463_s6 = sshll.u32 %s2855_s14, 9  ;;  %vm1131_vm5 = vcmask 257024   ;;  %vm1455_vm8 = vcmask 261120  }
  0x15   : > { %2583 = vmatpush3.bf16.msra.mxu0 %v2759_v0  ;;  %v581_v3 = vsel %vm579_vm0, 4294967295, %v2897_v2  ;;  %2652 = vmatpush3.bf16.msra.mxu1 %v2759_v0  ;;  %v3041_v39 = vshrl.u32 %v1197_v38, 7  ;;  %v3045_v41 = vstv %s2463_s6  ;;  %s200_s7 = sand.u32 1, %s2847_s12   ;;  %p235_p9 = scmp.lt.s32.totalorder %s2855_s14, 86 }
  0x16   : > { %v582_v4 = vsel %vm580_vm1, %v581_v3, 0  ;;  %s218_s28 = scalar_select %p217_p8, %s2968_s27, 5550 }
  0x17   : > { %v584_v5 = vand.u32 %v2760_v1, %v582_v4  ;;  %v1200_v40 = vadd.s32 16, %v3041_v39  ;;  %v1201_v42 = vadd.s32 24, %v3041_v39  ;;  %v1199_v43 = vadd.s32 8, %v3041_v39  ;;  %s2329_s8 = sshll.u32 %s200_s7, 8  ;;  %s1805_s21 = ssub.s32 (%p2950_p3), 5551, %s2968_s27 }
  0x18   : > { %s2331_s29 = sshll.u32 %s218_s28, 2  ;;  %v1204_v44 = vadd.s32 48, %v3041_v39  ;;  %v1202_v46 = vadd.s32 32, %v3041_v39  ;;  %v1205_v47 = vadd.s32 56, %v3041_v39  ;;  %v1203_v48 = vadd.s32 40, %v3041_v39  ;;  %s3195_s9 = scalar_lea.vmem [#allocation2], %s2329_s8  }
  0x19   : > { %2584 = vmatprep.subr.bf16.mxu0 %v584_v5  ;;  %2651 = vmatprep.subr.bf16.mxu1 %v584_v5  ;;  %s2975_s5 = scalar_lea.vmem %s4118_s0, %s2331_s29  ;;  %v3051_v45 = vadd.s32 %v3045_v41, %v1200_v40  ;;  %v1208_v49 = vadd.s32 80, %v3041_v39  ;;  %v1206_v50 = vadd.s32 64, %v3041_v39  ;;  %v1209_v51 = vadd.s32 88, %v3041_v39  ;;  %s2545_s23 = sshll.u32 (%p2950_p3), %s2855_s14, 8 }
  0x1a   : > { %2585 = vmatpush3.bf16.msra.mxu0 %v584_v5  ;;  %2653 = vmatpush3.bf16.msra.mxu1 %v584_v5  ;;  %v2761_v6 = vld [vmem:[%s2975_s5] sm:$0xff]   ;;  %v2762_v7 = vld [vmem:[%s2975_s5 + $0x8] sm:$0xff]   ;;  %v2763_v8 = vld [vmem:[%s2975_s5 + $0x10] sm:$0xff]   ;;  %v3061_v52 = vadd.s32 %v3045_v41, %v3041_v39  ;;  %v3064_v53 = vadd.s32 %v3045_v41, %v1201_v42  ;;  %v3067_v54 = vadd.s32 %v3045_v41, %v1199_v43  ;;  %v1207_v55 = vadd.s32 72, %v3041_v39  ;;  %s236_s10 = scalar_select %p235_p9, %s2855_s14, 86 }
  0x1b   : > { %2586 = vmatprep.mubr.msk.bf16.mxu0 %vm482_vm2, %v2761_v6  ;;  %v2764_v9 = vld [vmem:[%s2975_s5 + $0x18] sm:$0xff]   ;;  %v2765_v10 = vld [vmem:[%s2975_s5 + $0x20] sm:$0xff]   ;;  %v2766_v11 = vld [vmem:[%s2975_s5 + $0x28] sm:$0xff]   ;;  %v3071_v56 = vadd.s32 %v3045_v41, %v1204_v44  ;;  %v1212_v57 = vadd.s32 112, %v3041_v39  ;;  %v1210_v58 = vadd.s32 96, %v3041_v39  ;;  %v1213_v59 = vadd.s32 120, %v3041_v39  ;;  %s3921_s26 = scalar_lea.vmem (%p2950_p3), %s4120_s2, %s2545_s23  }
  0x1c   : > { %v2767_v12 = vld [vmem:[%s2975_s5 + $0x30] sm:$0xff]   ;;  %v2777_v13 = vld [vmem:[%s2975_s5 + $0x80] sm:$0xff]   ;;  %v2778_v14 = vld [vmem:[%s2975_s5 + $0x88] sm:$0xff]   ;;  %v3077_v60 = vadd.s32 %v3045_v41, %v1202_v46  ;;  %v3080_v61 = vadd.s32 %v3045_v41, %v1205_v47  ;;  %v1211_v62 = vadd.s32 104, %v3041_v39  ;;  %v1216_v63 = vadd.s32 144, %v3041_v39  ;;  %s2332_s11 = sshll.u32 %s236_s10, 1 }
  0x1d   : > { %2587 = vmatmul.mubr.msk.bf16.vlgmr.msra.gmra.mrb[0].mxu0 %vm482_vm2, %v2762_v7  ;;  %2618 = vmatprep.mubr.msk.bf16.mxu1 %vm482_vm2, %v2777_v13  ;;  %v2779_v15 = vld [vmem:[%s2975_s5 + $0x90] sm:$0xff]   ;;  %v2768_v16 = vld [vmem:[%s2975_s5 + $0x38] sm:$0xff]   ;;  %v2769_v17 = vld [vmem:[%s2975_s5 + $0x40] sm:$0xff]   ;;  %v3085_v0 = vadd.s32 %v3045_v41, %v1203_v48  ;;  %v3088_v1 = vadd.s32 %v3045_v41, %v1208_v49  ;;  %v3091_v2 = vadd.s32 %v3045_v41, %v1206_v50  ;;  %vm1329_vm3 = vcmp.lt.s32.totalorder %v3051_v45, 44402  ;;  %s241_s19 = scalar_lea.vmem %s4121_s3, %s2332_s11  ;;  %p1806_p10 = scmp.lt.s32.totalorder (%p2950_p3), %s1805_s21, 64 }
  0x1e   : > { %2590 = vmatprep.mubr.msk.bf16.mxu0 %vm482_vm2, %v2763_v8  ;;  %2619 = vmatmul.mubr.msk.bf16.vlgmr.msra.gmra.mrb[0].mxu1 %vm482_vm2, %v2778_v14  ;;  %v2780_v18 = vld [vmem:[%s2975_s5 + $0x98] sm:$0xff]   ;;  %v2781_v19 = vld [vmem:[%s2975_s5 + $0xa0] sm:$0xff]   ;;  %v2770_v20 = vld [vmem:[%s2975_s5 + $0x48] sm:$0xff]   ;;  %v3094_v3 = vadd.s32 %v3045_v41, %v1209_v51  ;;  %vm1327_vm4 = vcmp.lt.s32.totalorder %v3061_v52, 44402  ;;  %v3099_v4 = vadd.s32 %v3045_v41, %v1207_v55  ;;  %v1214_v5 = vadd.s32 128, %v3041_v39 }
  0x1f   : > { %2622 = vmatprep.mubr.msk.bf16.mxu1 %vm482_vm2, %v2779_v15  ;;  %v2782_v21 = vld [vmem:[%s2975_s5 + $0xa8] sm:$0xff]   ;;  %v2771_v22 = vld [vmem:[%s2975_s5 + $0x50] sm:$0xff]   ;;  %v2772_v24 = vld [vmem:[%s2975_s5 + $0x58] sm:$0xff]   ;;  %v1217_v6 = vadd.s32 152, %v3041_v39  ;;  %v1215_v7 = vadd.s32 136, %v3041_v39  ;;  %v3105_v8 = vadd.s32 %v3045_v41, %v1212_v57  ;;  %v3118_v13 = vadd.s32 %v3045_v41, %v1216_v63 }
  0x20   : > { %v2783_v23 = vld [vmem:[%s2975_s5 + $0xb0] sm:$0xff]   ;;  %v2784_v25 = vld [vmem:[%s2975_s5 + $0xb8] sm:$0xff]   ;;  %v2773_v26 = vld [vmem:[%s2975_s5 + $0x60] sm:$0xff]   ;;  %v1218_v14 = vadd.s32 160, %v3041_v39  ;;  %v1221_v15 = vadd.s32 184, %v3041_v39  ;;  %vm1330_vm6 = vcmp.lt.s32.totalorder %v3064_v53, 44402 }
  0x21   : > { %v2785_v27 = vld [vmem:[%s2975_s5 + $0xc0] sm:$0xff]   ;;  %v2774_v28 = vld [vmem:[%s2975_s5 + $0x68] sm:$0xff]   ;;  %v2775_v30 = vld [vmem:[%s2975_s5 + $0x70] sm:$0xff]   ;;  %vm1328_vm7 = vcmp.lt.s32.totalorder %v3067_v54, 44402  ;;  %vm1333_vm9 = vcmp.lt.s32.totalorder %v3071_v56, 44402  ;;  %vm1331_vm10 = vcmp.lt.s32.totalorder %v3077_v60, 44402 }
  0x22   : > { %v2786_v29 = vld [vmem:[%s2975_s5 + $0xc8] sm:$0xff]   ;;  %v2787_v31 = vld [vmem:[%s2975_s5 + $0xd0] sm:$0xff]   ;;  %v2776_v32 = vld [vmem:[%s2975_s5 + $0x78] sm:$0xff]   ;;  %v1233_v38 = vadd.s32 280, %v3041_v39  ;;  %v1231_v40 = vadd.s32 264, %v3041_v39  ;;  %v1236_v47 = vadd.s32 304, %v3041_v39 }
  0x23   : > { %v2788_v33 = vld [vmem:[%s2975_s5 + $0xd8] sm:$0xff]   ;;  %v2789_v34 = vld [vmem:[%s2975_s5 + $0xe0] sm:$0xff]   ;;  %v2790_v35 = vld [vmem:[%s2975_s5 + $0xe8] sm:$0xff]   ;;  %v1234_v55 = vadd.s32 288, %v3041_v39  ;;  %v1237_v63 = vadd.s32 312, %v3041_v39  ;;  %vm1334_vm11 = vcmp.lt.s32.totalorder %v3080_v61, 44402 }
  0x24   : > { %v2791_v36 = vld [vmem:[%s2975_s5 + $0xf0] sm:$0xff]   ;;  %v2792_v37 = vld [vmem:[%s2975_s5 + $0xf8] sm:$0xff]   ;;  %vm1332_vm12 = vcmp.lt.s32.totalorder %v3085_v0, 44402  ;;  %v3205_v52 = vadd.s32 %v3045_v41, %v1233_v38  ;;  %vm1337_vm13 = vcmp.lt.s32.totalorder %v3088_v1, 44402  ;;  %v1240_v53 = vadd.s32 336, %v3041_v39 }
  0x25   : > { %2591 = vmatmul.mubr.msk.bf16.gmra.mrb[4].mxu0 %vm482_vm2, %v2764_v9  ;;  %v3108_v9 = vadd.s32 %v3045_v41, %v1210_v58  ;;  %v1238_v54 = vadd.s32 320, %v3041_v39  ;;  %vm1335_vm14 = vcmp.lt.s32.totalorder %v3091_v2, 44402  ;;  %vm1338_vm15 = vcmp.lt.s32.totalorder %v3094_v3, 44402 }
  0x26   : > { %2594 = vmatprep.mubr.msk.bf16.mxu0 %vm482_vm2, %v2765_v10  ;;  %2623 = vmatmul.mubr.msk.bf16.gmra.mrb[4].mxu1 %vm482_vm2, %v2780_v18  ;;  %v3111_v10 = vadd.s32 %v3045_v41, %v1213_v59  ;;  %v1222_v18 = vadd.s32 192, %v3041_v39  ;;  %vm1336_vm0 = vcmp.lt.s32.totalorder %v3099_v4, 44402  ;;  %vm1341_vm1 = vcmp.lt.s32.totalorder %v3105_v8, 44402 }
  0x27   : > { %2626 = vmatprep.mubr.msk.bf16.mxu1 %vm482_vm2, %v2781_v19  ;;  %v1225_v19 = vadd.s32 216, %v3041_v39 }
  0x2d   : > { %2595 = vmatmul.mubr.msk.bf16.gmra.mrb[8].mxu0 %vm482_vm2, %v2766_v11  ;;  %v1220_v11 = vadd.s32 176, %v3041_v39 }
  0x2e   : > { %2598 = vmatprep.mubr.msk.bf16.mxu0 %vm482_vm2, %v2767_v12  ;;  %2627 = vmatmul.mubr.msk.bf16.gmra.mrb[8].mxu1 %vm482_vm2, %v2782_v21  ;;  %v3115_v12 = vadd.s32 %v3045_v41, %v1211_v62  ;;  %v3133_v21 = vadd.s32 %v3045_v41, %v1217_v6 }
  0x2f   : > { %2630 = vmatprep.mubr.msk.bf16.mxu1 %vm482_vm2, %v2783_v23  ;;  %v1223_v23 = vadd.s32 200, %v3041_v39 }
  0x35   : > { %2599 = vmatmul.mubr.msk.bf16.gmra.mrb[12].mxu0 %vm482_vm2, %v2768_v16  ;;  %v1219_v16 = vadd.s32 168, %v3041_v39 }
  0x36   : > { %2602 = vmatprep.mubr.msk.bf16.mxu0 %vm482_vm2, %v2769_v17  ;;  %2631 = vmatmul.mubr.msk.bf16.gmra.mrb[12].mxu1 %vm482_vm2, %v2784_v25  ;;  %v1224_v17 = vadd.s32 208, %v3041_v39  ;;  %v1228_v25 = vadd.s32 240, %v3041_v39 }
  0x37   : > { %2634 = vmatprep.mubr.msk.bf16.mxu1 %vm482_vm2, %v2785_v27  ;;  %v1229_v27 = vadd.s32 248, %v3041_v39 }
  0x38   : > { %v3174_v43 = vadd.s32 %v3045_v41, %v1228_v25 }
  0x39   : > { %v3180_v46 = vadd.s32 %v3045_v41, %v1229_v27 }
  0x3d   : > { %2603 = vmatmul.mubr.msk.bf16.gmra.mrb[16].mxu0 %vm482_vm2, %v2770_v20  ;;  %v3130_v20 = vadd.s32 %v3045_v41, %v1214_v5 }
  0x3e   : > { %2606 = vmatprep.mubr.msk.bf16.mxu0 %vm482_vm2, %v2771_v22  ;;  %2635 = vmatmul.mubr.msk.bf16.gmra.mrb[16].mxu1 %vm482_vm2, %v2786_v29  ;;  %v3136_v22 = vadd.s32 %v3045_v41, %v1215_v7  ;;  %v3149_v29 = vadd.s32 %v3045_v41, %v1221_v15  ;;  %v3208_v7 = vadd.s32 %v3045_v41, %v1231_v40 }
  0x3f   : > { %2638 = vmatprep.mubr.msk.bf16.mxu1 %vm482_vm2, %v2787_v31  ;;  %v1232_v31 = vadd.s32 272, %v3041_v39  ;;  %v3213_v15 = vadd.s32 %v3045_v41, %v1236_v47 }
  0x41   : > { %v3187_v51 = vadd.s32 %v3045_v41, %v1232_v31 }
  0x45   : > { %2607 = vmatmul.mubr.msk.bf16.gmra.mrb[20].mxu0 %vm482_vm2, %v2772_v24  ;;  %v3140_v24 = vadd.s32 %v3045_v41, %v1220_v11 }
  0x46   : > { %2610 = vmatprep.mubr.msk.bf16.mxu0 %vm482_vm2, %v2773_v26  ;;  %2639 = vmatmul.mubr.msk.bf16.gmra.mrb[20].mxu1 %vm482_vm2, %v2788_v33  ;;  %v1226_v26 = vadd.s32 224, %v3041_v39  ;;  %v3157_v33 = vadd.s32 %v3045_v41, %v1224_v17 }
  0x47   : > { %2642 = vmatprep.mubr.msk.bf16.mxu1 %vm482_vm2, %v2789_v34  ;;  %v3160_v34 = vadd.s32 %v3045_v41, %v1222_v18 }
  0x48   : > { %v3177_v44 = vadd.s32 %v3045_v41, %v1226_v26 }
  0x4d   : > { %2611 = vmatmul.mubr.msk.bf16.gmra.mrb[24].mxu0 %vm482_vm2, %v2774_v28  ;;  %v3146_v28 = vadd.s32 %v3045_v41, %v1218_v14 }
  0x4e   : > { %2614 = vmatprep.mubr.msk.bf16.mxu0 %vm482_vm2, %v2775_v30  ;;  %2643 = vmatmul.mubr.msk.bf16.gmra.mrb[24].mxu1 %vm482_vm2, %v2790_v35  ;;  %v1227_v30 = vadd.s32 232, %v3041_v39  ;;  %v3163_v35 = vadd.s32 %v3045_v41, %v1225_v19 }
  0x4f   : > { %2646 = vmatprep.mubr.msk.bf16.mxu1 %vm482_vm2, %v2791_v36  ;;  %v3168_v36 = vadd.s32 %v3045_v41, %v1223_v23  ;;  %v3223_v23 = vadd.s32 %v3045_v41, %v1234_v55 }
  0x50   : > { %v3184_v50 = vadd.s32 %v3045_v41, %v1227_v30  ;;  %v3230_v30 = vadd.s32 %v3045_v41, %v1237_v63 }
  0x55   : > { %2615 = vmatmul.mubr.msk.bf16.gmra.mrb[28].mxu0 %vm482_vm2, %v2776_v32  ;;  %v3154_v32 = vadd.s32 %v3045_v41, %v1219_v16  ;;  %v1235_v16 = vadd.s32 296, %v3041_v39 }
  0x56   : > { %2647 = vmatmul.mubr.msk.bf16.gmra.mrb[28].mxu1 %vm482_vm2, %v2792_v37  ;;  %v1230_v37 = vadd.s32 256, %v3041_v39  ;;  %vm1339_vm2 = vcmp.lt.s32.totalorder %v3108_v9, 44402 }
  0x58   : > { %v3202_v45 = vadd.s32 %v3045_v41, %v1230_v37  ;;  %v1241_v37 = vadd.s32 344, %v3041_v39 }
  0xf0   : > { %v2588_v42 = vpop.f32.mrb[0].mxu0 }
  0xf1   : > { %v2483_v48 = vpack.c.bf16 %v2588_v42, %v2588_v42  ;;  %v620_v49 = vpop.f32.mrb[1].mxu0  ;;  %v1393_v57 = vsel %vm1329_vm3, %v2588_v42, 0.0  ;;  %v3277_v0 = vpop.f32.mrb[0].mxu1  ;;  %vm1342_vm3 = vcmp.lt.s32.totalorder %v3111_v10, 44402 }
  0xf2   : > { %v2481_v58 = vpack.c.bf16 %v620_v49, %v620_v49  ;;  %v1391_v59 = vsel %vm1327_vm4, %v620_v49, 0.0  ;;  %v2589_v62 = vpop.f32.mrb[2].mxu0  ;;  %v1591_v17 = vmul.f32 %v1393_v57, %v1393_v57  ;;  %v1459_v38 = vsel %vm1455_vm8, %v1393_v57, 0.0 }
  0xf3   : > { %1134 = vst.msk [vmem:[%s3195_s9 + $0x8] sm:$0xf] %vm1131_vm5, %v2483_v48  ;;  %v2484_v5 = vpack.c.bf16 %v2589_v62, %v2589_v62  ;;  %v623_v6 = vpop.f32.mrb[3].mxu0  ;;  %v1589_v11 = vmul.f32 %v1391_v59, %v1391_v59  ;;  %v1394_v18 = vsel %vm1330_vm6, %v2589_v62, 0.0  ;;  %v1456_v25 = vsel %vm1455_vm8, %v1391_v59, 0.0 }
  0xf4   : > { %1132 = vst.msk [vmem:[%s3195_s9] sm:$0xf] %vm1131_vm5, %v2481_v58  ;;  %v2482_v14 = vpack.c.bf16 %v623_v6, %v623_v6  ;;  %v1392_v19 = vsel %vm1328_vm7, %v623_v6, 0.0  ;;  %v1592_v42 = vmul.f32 %v1394_v18, %v1394_v18  ;;  %v1656_v49 = vsel %vm1455_vm8, %v1591_v17, 0.0 }
  0xf5   : > { %1135 = vst.msk [vmem:[%s3195_s9 + $0xc] sm:$0xf] %vm1131_vm5, %v2484_v5  ;;  %v1457_v26 = vsel %vm1455_vm8, %v1392_v19, 0.0  ;;  %v1590_v27 = vmul.f32 %v1392_v19, %v1392_v19  ;;  %v1653_v40 = vsel %vm1455_vm8, %v1589_v11, 0.0  ;;  %v1461_v63 = vsel %vm1455_vm8, %v1394_v18, 0.0 }
  0xf6   : > { %1133 = vst.msk [vmem:[%s3195_s9 + $0x4] sm:$0xf] %vm1131_vm5, %v2482_v14  ;;  %v1458_v31 = vadd.f32 %v1457_v26, %v1456_v25  ;;  %v1658_v56 = vsel %vm1455_vm8, %v1592_v42, 0.0  ;;  %vm1340_vm4 = vcmp.lt.s32.totalorder %v3115_v12, 44402  ;;  %vm1345_vm6 = vcmp.lt.s32.totalorder %v3118_v13, 44402 }
  0xf7   : > { %v1654_v47 = vsel %vm1455_vm8, %v1590_v27, 0.0  ;;  %v1239_v27 = vadd.s32 328, %v3041_v39  ;;  %vm1343_vm7 = vcmp.lt.s32.totalorder %v3130_v20, 44402 }
  0xf8   : > { %v2592_v48 = vpop.f32.mrb[4].mxu0  ;;  %v1460_v55 = vadd.f32 %v1459_v38, %v1458_v31  ;;  %v1655_v58 = vadd.f32 %v1654_v47, %v1653_v40  ;;  %v3257_v47 = vadd.s32 %v3045_v41, %v1235_v16  ;;  %v3273_v16 = vadd.s32 %v3045_v41, %v1238_v54 }
  0xf9   : > { %v2487_v59 = vpack.c.bf16 %v2592_v48, %v2592_v48  ;;  %v636_v62 = vpop.f32.mrb[5].mxu0  ;;  %v1397_v57 = vsel %vm1333_vm9, %v2592_v48, 0.0  ;;  %vm1346_vm9 = vcmp.lt.s32.totalorder %v3133_v21, 44402 }
  0xfa   : > { %v2485_v5 = vpack.c.bf16 %v636_v62, %v636_v62  ;;  %v1395_v6 = vsel %vm1331_vm10, %v636_v62, 0.0  ;;  %v2593_v11 = vpop.f32.mrb[6].mxu0  ;;  %v1657_v14 = vadd.f32 %v1656_v49, %v1655_v58  ;;  %v1462_v19 = vadd.f32 %v1461_v63, %v1460_v55 }
  0xfb   : > { %1138 = vst.msk [vmem:[%s3195_s9 + $0x18] sm:$0xf] %vm1131_vm5, %v2487_v59  ;;  %v1463_v17 = vsel %vm1455_vm8, %v1395_v6, 0.0  ;;  %v1593_v25 = vmul.f32 %v1395_v6, %v1395_v6  ;;  %v639_v26 = vpop.f32.mrb[7].mxu0  ;;  %v2488_v60 = vpack.c.bf16 %v2593_v11, %v2593_v11  ;;  %v1595_v48 = vmul.f32 %v1397_v57, %v1397_v57 }
  0xfc   : > { %1136 = vst.msk [vmem:[%s3195_s9 + $0x10] sm:$0xf] %vm1131_vm5, %v2485_v5  ;;  %v2486_v18 = vpack.c.bf16 %v639_v26, %v639_v26  ;;  %v1464_v31 = vadd.f32 %v1463_v17, %v1462_v19  ;;  %v1659_v38 = vadd.f32 %v1658_v56, %v1657_v14  ;;  %v1398_v49 = vsel %vm1334_vm11, %v2593_v11, 0.0  ;;  %v3288_v17 = vpop.f32.mrb[1].mxu1 }
  0xfd   : > { %v1660_v40 = vsel %vm1455_vm8, %v1593_v25, 0.0  ;;  %1139 = vst.msk [vmem:[%s3195_s9 + $0x1c] sm:$0xf] %vm1131_vm5, %v2488_v60  ;;  %v1396_v42 = vsel %vm1332_vm12, %v639_v26, 0.0  ;;  %v3268_v55 = vadd.s32 %v3045_v41, %v1240_v53  ;;  %v1467_v61 = vsel %vm1455_vm8, %v1397_v57, 0.0 }
  0xfe   : > { %1137 = vst.msk [vmem:[%s3195_s9 + $0x14] sm:$0xf] %vm1131_vm5, %v2486_v18  ;;  %v1661_v58 = vadd.f32 %v1660_v40, %v1659_v38  ;;  %v1465_v59 = vsel %vm1455_vm8, %v1396_v42, 0.0  ;;  %v1594_v62 = vmul.f32 %v1396_v42, %v1396_v42  ;;  %v3280_v53 = vadd.s32 %v3045_v41, %v1241_v37  ;;  %v3293_v18 = vpop.f32.mrb[2].mxu1 }
  0xff   : > { %v1466_v63 = vadd.f32 %v1465_v59, %v1464_v31  ;;  %v3283_v6 = vadd.s32 %v3045_v41, %v1239_v27  ;;  %v1596_v11 = vmul.f32 %v1398_v49, %v1398_v49  ;;  %v2515_v57 = vpack.c.bf16 %v3277_v0, %v3277_v0  ;;  %v3304_v1 = vpop.f32.mrb[3].mxu1 }
 0x100   : > { %v2596_v5 = vpop.f32.mrb[8].mxu0  ;;  %v1662_v14 = vsel %vm1455_vm8, %v1594_v62, 0.0  ;;  %v1664_v25 = vsel %vm1455_vm8, %v1595_v48, 0.0  ;;  %v1469_v27 = vsel %vm1455_vm8, %v1398_v49, 0.0  ;;  %v3308_v59 = vadd.s32 368, %v3041_v39  ;;  %v3327_v4 = vpop.f32.mrb[4].mxu1 }
 0x101   : > { %v2491_v54 = vpack.c.bf16 %v2596_v5, %v2596_v5  ;;  %v652_v19 = vpop.f32.mrb[9].mxu0  ;;  %v1468_v26 = vadd.f32 %v1467_v61, %v1466_v63  ;;  %v1663_v56 = vadd.f32 %v1662_v14, %v1661_v58  ;;  %v1401_v37 = vsel %vm1337_vm13, %v2596_v5, 0.0  ;;  %1166 = vst.msk [vmem:[%s3195_s9 + $0x88] sm:$0xf] %vm1131_vm5, %v2515_v57 }
 0x102   : > { %v2597_v60 = vpop.f32.mrb[10].mxu0  ;;  %v2489_v31 = vpack.c.bf16 %v652_v19, %v652_v19  ;;  %v1399_v38 = vsel %vm1335_vm14, %v652_v19, 0.0  ;;  %v1666_v2 = vsel %vm1455_vm8, %v1596_v11, 0.0  ;;  %v1599_v62 = vmul.f32 %v1401_v37, %v1401_v37 }
 0x103   : > { %1142 = vst.msk [vmem:[%s3195_s9 + $0x28] sm:$0xf] %vm1131_vm5, %v2491_v54  ;;  %v2492_v40 = vpack.c.bf16 %v2597_v60, %v2597_v60  ;;  %v655_v48 = vpop.f32.mrb[11].mxu0  ;;  %v1665_v49 = vadd.f32 %v1664_v25, %v1663_v56  ;;  %v1470_v42 = vadd.f32 %v1469_v27, %v1468_v26  ;;  %v1471_v58 = vsel %vm1455_vm8, %v1399_v38, 0.0 }
 0x104   : > { %1140 = vst.msk [vmem:[%s3195_s9 + $0x20] sm:$0xf] %vm1131_vm5, %v2489_v31  ;;  %v1597_v61 = vmul.f32 %v1399_v38, %v1399_v38  ;;  %v2490_v63 = vpack.c.bf16 %v655_v48, %v655_v48  ;;  %v1402_v54 = vsel %vm1338_vm15, %v2597_v60, 0.0  ;;  %v1400_v19 = vsel %vm1336_vm0, %v655_v48, 0.0 }
 0x105   : > { %1143 = vst.msk [vmem:[%s3195_s9 + $0x2c] sm:$0xf] %vm1131_vm5, %v2492_v40  ;;  %v1472_v5 = vadd.f32 %v1471_v58, %v1470_v42  ;;  %v1667_v14 = vadd.f32 %v1666_v2, %v1665_v49  ;;  %v1473_v11 = vsel %vm1455_vm8, %v1400_v19, 0.0  ;;  %v1598_v25 = vmul.f32 %v1400_v19, %v1400_v19 }
 0x106   : > { %v1668_v57 = vsel %vm1455_vm8, %v1597_v61, 0.0  ;;  %1141 = vst.msk [vmem:[%s3195_s9 + $0x24] sm:$0xf] %vm1131_vm5, %v2490_v63  ;;  %v1242_v26 = vadd.s32 352, %v3041_v39  ;;  %v1475_v56 = vsel %vm1455_vm8, %v1401_v37, 0.0  ;;  %v3330_v60 = vadd.s32 376, %v3041_v39 }
 0x107   : > { %v1669_v27 = vadd.f32 %v1668_v57, %v1667_v14  ;;  %v1474_v31 = vadd.f32 %v1473_v11, %v1472_v5  ;;  %v1600_v38 = vmul.f32 %v1402_v54, %v1402_v54  ;;  %v1670_v40 = vsel %vm1455_vm8, %v1598_v25, 0.0  ;;  %v3335_v37 = vpop.f32.mrb[5].mxu1 }
 0x108   : > { %v2600_v3 = vpop.f32.mrb[12].mxu0  ;;  %v2513_v42 = vpack.c.bf16 %v3288_v17, %v3288_v17  ;;  %v1672_v58 = vsel %vm1455_vm8, %v1599_v62, 0.0  ;;  %v3340_v14 = vpop.f32.mrb[6].mxu1  ;;  %v1477_v19 = vsel %vm1455_vm8, %v1402_v54, 0.0  ;;  %vm1344_vm10 = vcmp.lt.s32.totalorder %v3136_v22, 44402 }
 0x109   : > { %v2495_v48 = vpack.c.bf16 %v2600_v3, %v2600_v3  ;;  %v668_v49 = vpop.f32.mrb[13].mxu0  ;;  %v1476_v2 = vadd.f32 %v1475_v56, %v1474_v31  ;;  %v1671_v61 = vadd.f32 %v1670_v40, %v1669_v27  ;;  %v1405_v63 = vsel %vm1341_vm1, %v2600_v3, 0.0  ;;  %v3351_v8 = vpop.f32.mrb[7].mxu1 }
 0x10a   : > { %v2601_v5 = vpop.f32.mrb[14].mxu0  ;;  %v2493_v57 = vpack.c.bf16 %v668_v49, %v668_v49  ;;  %v1403_v11 = vsel %vm1339_vm2, %v668_v49, 0.0  ;;  %1164 = vst.msk [vmem:[%s3195_s9 + $0x80] sm:$0xf] %vm1131_vm5, %v2513_v42  ;;  %v3355_v31 = vadd.s32 360, %v3041_v39  ;;  %v1674_v9 = vsel %vm1455_vm8, %v1600_v38, 0.0 }
 0x10b   : > { %1146 = vst.msk [vmem:[%s3195_s9 + $0x38] sm:$0xf] %vm1131_vm5, %v2495_v48  ;;  %v2496_v25 = vpack.c.bf16 %v2601_v5, %v2601_v5  ;;  %v671_v62 = vpop.f32.mrb[15].mxu0  ;;  %v1673_v54 = vadd.f32 %v1672_v58, %v1671_v61  ;;  %v1478_v56 = vadd.f32 %v1477_v19, %v1476_v2  ;;  %v1479_v27 = vsel %vm1455_vm8, %v1403_v11, 0.0 }
 0x10c   : > { %v1603_v3 = vmul.f32 %v1405_v63, %v1405_v63  ;;  %1144 = vst.msk [vmem:[%s3195_s9 + $0x30] sm:$0xf] %vm1131_vm5, %v2493_v57  ;;  %v1601_v40 = vmul.f32 %v1403_v11, %v1403_v11  ;;  %v2494_v48 = vpack.c.bf16 %v671_v62, %v671_v62  ;;  %v1406_v58 = vsel %vm1342_vm3, %v2601_v5, 0.0  ;;  %v3378_v5 = vpop.f32.mrb[8].mxu1 }
 0x10d   : > { %1147 = vst.msk [vmem:[%s3195_s9 + $0x3c] sm:$0xf] %vm1131_vm5, %v2496_v25  ;;  %v1480_v49 = vadd.f32 %v1479_v27, %v1478_v56  ;;  %v1675_v42 = vadd.f32 %v1674_v9, %v1673_v54  ;;  %v1404_v2 = vsel %vm1340_vm4, %v671_v62, 0.0  ;;  %vm1349_vm11 = vcmp.lt.s32.totalorder %v3140_v24, 44402 }
 0x10e   : > { %v1676_v61 = vsel %vm1455_vm8, %v1601_v40, 0.0  ;;  %1145 = vst.msk [vmem:[%s3195_s9 + $0x34] sm:$0xf] %vm1131_vm5, %v2494_v48  ;;  %v1481_v38 = vsel %vm1455_vm8, %v1404_v2, 0.0  ;;  %v1602_v19 = vmul.f32 %v1404_v2, %v1404_v2  ;;  %v3373_v57 = vadd.s32 %v3045_v41, %v3308_v59  ;;  %v3385_v40 = vpop.f32.mrb[9].mxu1 }
 0x10f   : > { %v1677_v11 = vadd.f32 %v1676_v61, %v1675_v42  ;;  %v1482_v25 = vadd.f32 %v1481_v38, %v1480_v49  ;;  %vm1347_vm12 = vcmp.lt.s32.totalorder %v3146_v28, 44402  ;;  %v2516_v12 = vpack.c.bf16 %v3293_v18, %v3293_v18 }
 0x110   : > { %4128 = vst [vmem:[#allocation3_spill] sm:$0xff] %v3373_v57  ;;  %v2604_v10 = vpop.f32.mrb[16].mxu0  ;;  %v3381_v62 = vadd.s32 %v3045_v41, %v1242_v26  ;;  %v1483_v54 = vsel %vm1455_vm8, %v1405_v63, 0.0  ;;  %v1604_v56 = vmul.f32 %v1406_v58, %v1406_v58  ;;  %v1678_v59 = vsel %vm1455_vm8, %v1602_v19, 0.0  ;;  %v3392_v26 = vpop.f32.mrb[10].mxu1 }
 0x111   : > { %v2499_v27 = vpack.c.bf16 %v2604_v10, %v2604_v10  ;;  %v684_v9 = vpop.f32.mrb[17].mxu0  ;;  %v1680_v48 = vsel %vm1455_vm8, %v1603_v3, 0.0  ;;  %v1484_v49 = vadd.f32 %v1483_v54, %v1482_v25  ;;  %v1679_v42 = vadd.f32 %v1678_v59, %v1677_v11  ;;  %1167 = vst.msk [vmem:[%s3195_s9 + $0x8c] sm:$0xf] %vm1131_vm5, %v2516_v12  ;;  %v3401_v13 = vpop.f32.mrb[11].mxu1 }
 0x112   : > { %v1409_v2 = vsel %vm1345_vm6, %v2604_v10, 0.0  ;;  %v2605_v61 = vpop.f32.mrb[18].mxu0  ;;  %v1485_v63 = vsel %vm1455_vm8, %v1406_v58, 0.0  ;;  %v2497_v38 = vpack.c.bf16 %v684_v9, %v684_v9  ;;  %v1407_v3 = vsel %vm1343_vm7, %v684_v9, 0.0  ;;  %v3427_v22 = vpop.f32.mrb[12].mxu1 }
 0x113   : > { %1150 = vst.msk [vmem:[%s3195_s9 + $0x48] sm:$0xf] %vm1131_vm5, %v2499_v27  ;;  %v2500_v19 = vpack.c.bf16 %v2605_v61, %v2605_v61  ;;  %v687_v11 = vpop.f32.mrb[19].mxu0  ;;  %vm1350_vm13 = vcmp.lt.s32.totalorder %v3149_v29, 44402  ;;  %vm1348_vm14 = vcmp.lt.s32.totalorder %v3154_v32, 44402  ;;  %v1681_v25 = vadd.f32 %v1680_v48, %v1679_v42 }
 0x114   : > { %v1486_v10 = vadd.f32 %v1485_v63, %v1484_v49  ;;  %v1487_v58 = vsel %vm1455_vm8, %v1407_v3, 0.0  ;;  %v3406_v12 = vadd.s32 %v3045_v41, %v3330_v60  ;;  %v1682_v20 = vsel %vm1455_vm8, %v1604_v56, 0.0  ;;  %1148 = vst.msk [vmem:[%s3195_s9 + $0x40] sm:$0xf] %vm1131_vm5, %v2497_v38 }
 0x115   : > { %v1607_v54 = vmul.f32 %v1409_v2, %v1409_v2  ;;  %v1605_v59 = vmul.f32 %v1407_v3, %v1407_v3  ;;  %1151 = vst.msk [vmem:[%s3195_s9 + $0x4c] sm:$0xf] %vm1131_vm5, %v2500_v19  ;;  %v2498_v27 = vpack.c.bf16 %v687_v11, %v687_v11  ;;  %v1683_v57 = vadd.f32 %v1682_v20, %v1681_v25 }
 0x116   : > { %4129 = vst [vmem:[#allocation4_spill] sm:$0xff] %v3406_v12  ;;  %v1488_v9 = vadd.f32 %v1487_v58, %v1486_v10  ;;  %v1410_v48 = vsel %vm1346_vm9, %v2605_v61, 0.0  ;;  %v1408_v49 = vsel %vm1344_vm10, %v687_v11, 0.0  ;;  %vm1353_vm15 = vcmp.lt.s32.totalorder %v3157_v33, 44402 }
 0x117   : > { %v1684_v60 = vsel %vm1455_vm8, %v1605_v59, 0.0  ;;  %1149 = vst.msk [vmem:[%s3195_s9 + $0x44] sm:$0xf] %vm1131_vm5, %v2498_v27  ;;  %v1489_v56 = vsel %vm1455_vm8, %v1408_v49, 0.0  ;;  %v1606_v42 = vmul.f32 %v1408_v49, %v1408_v49  ;;  %v3424_v63 = vadd.s32 %v3045_v41, %v3355_v31 }
 0x118   : > { %v1685_v38 = vadd.f32 %v1684_v60, %v1683_v57  ;;  %v1490_v3 = vadd.f32 %v1489_v56, %v1488_v9  ;;  %v2608_v21 = vpop.f32.mrb[20].mxu0  ;;  %vm1351_vm0 = vcmp.lt.s32.totalorder %v3160_v34, 44402  ;;  %v1248_v61 = vadd.s32 400, %v3041_v39  ;;  %v3435_v57 = vpop.f32.mrb[13].mxu1 }
 0x119   : > { %4130 = vst [vmem:[#allocation5_spill] sm:$0xff] %v3424_v63  ;;  %v3431_v19 = vadd.s32 384, %v3041_v39  ;;  %v1491_v11 = vsel %vm1455_vm8, %v1409_v2, 0.0  ;;  %v1608_v25 = vmul.f32 %v1410_v48, %v1410_v48  ;;  %v1686_v10 = vsel %vm1455_vm8, %v1606_v42, 0.0  ;;  %v700_v58 = vpop.f32.mrb[21].mxu0  ;;  %v3440_v60 = vpop.f32.mrb[14].mxu1 }
 0x11a   : > { %v2503_v31 = vpack.c.bf16 %v2608_v21, %v2608_v21  ;;  %v1688_v20 = vsel %vm1455_vm8, %v1607_v54, 0.0  ;;  %v1492_v59 = vadd.f32 %v1491_v11, %v1490_v3  ;;  %v1687_v27 = vadd.f32 %v1686_v10, %v1685_v38  ;;  %v2609_v49 = vpop.f32.mrb[22].mxu0  ;;  %v3449_v24 = vpop.f32.mrb[15].mxu1 }
 0x11b   : > { %v1413_v9 = vsel %vm1349_vm11, %v2608_v21, 0.0  ;;  %v1493_v2 = vsel %vm1455_vm8, %v1410_v48, 0.0  ;;  %v2501_v56 = vpack.c.bf16 %v700_v58, %v700_v58  ;;  %v1411_v42 = vsel %vm1347_vm12, %v700_v58, 0.0  ;;  %v703_v54 = vpop.f32.mrb[23].mxu0  ;;  %4131 = vst [vmem:[#allocation6_spill] sm:$0xff] %v3449_v24  ;;  %v3472_v32 = vpop.f32.mrb[16].mxu1 }
 0x11c   : > { %1154 = vst.msk [vmem:[%s3195_s9 + $0x58] sm:$0xf] %vm1131_vm5, %v2503_v31  ;;  %v2504_v12 = vpack.c.bf16 %v2609_v49, %v2609_v49  ;;  %vm1354_vm1 = vcmp.lt.s32.totalorder %v3163_v35, 44402  ;;  %vm1352_vm2 = vcmp.lt.s32.totalorder %v3168_v36, 44402  ;;  %v1689_v38 = vadd.f32 %v1688_v20, %v1687_v27 }
 0x11d   : > { %v1494_v3 = vadd.f32 %v1493_v2, %v1492_v59  ;;  %v1495_v48 = vsel %vm1455_vm8, %v1411_v42, 0.0  ;;  %v3453_v21 = vadd.s32 408, %v3041_v39  ;;  %v1690_v11 = vsel %vm1455_vm8, %v1608_v25, 0.0  ;;  %1152 = vst.msk [vmem:[%s3195_s9 + $0x50] sm:$0xf] %vm1131_vm5, %v2501_v56 }
 0x11e   : > { %v1611_v28 = vmul.f32 %v1413_v9, %v1413_v9  ;;  %v1609_v10 = vmul.f32 %v1411_v42, %v1411_v42  ;;  %1155 = vst.msk [vmem:[%s3195_s9 + $0x5c] sm:$0xf] %vm1131_vm5, %v2504_v12  ;;  %v2502_v31 = vpack.c.bf16 %v703_v54, %v703_v54  ;;  %v1691_v63 = vadd.f32 %v1690_v11, %v1689_v38  ;;  %v3480_v11 = vpop.f32.mrb[17].mxu1 }
 0x11f   : > { %v1496_v58 = vadd.f32 %v1495_v48, %v1494_v3  ;;  %v1414_v20 = vsel %vm1350_vm13, %v2609_v49, 0.0  ;;  %v1412_v59 = vsel %vm1348_vm14, %v703_v54, 0.0  ;;  %v1247_v56 = vadd.s32 392, %v3041_v39 }
 0x120   : > { %v1692_v27 = vsel %vm1455_vm8, %v1609_v10, 0.0  ;;  %1153 = vst.msk [vmem:[%s3195_s9 + $0x54] sm:$0xf] %vm1131_vm5, %v2502_v31  ;;  %v1497_v25 = vsel %vm1455_vm8, %v1412_v59, 0.0  ;;  %v1610_v2 = vmul.f32 %v1412_v59, %v1412_v59  ;;  %v2612_v24 = vpop.f32.mrb[24].mxu0  ;;  %vm1355_vm3 = vcmp.lt.s32.totalorder %v3177_v44, 44402 }
 0x121   : > { %v1693_v42 = vadd.f32 %v1692_v27, %v1691_v63  ;;  %v1498_v12 = vadd.f32 %v1497_v25, %v1496_v58  ;;  %v2514_v29 = vpack.c.bf16 %v3304_v1, %v3304_v1  ;;  %v3475_v49 = vadd.s32 %v3045_v41, %v1248_v61  ;;  %v716_v48 = vpop.f32.mrb[25].mxu0 }
 0x122   : > { %v1499_v54 = vsel %vm1455_vm8, %v1413_v9, 0.0  ;;  %v1612_v38 = vmul.f32 %v1414_v20, %v1414_v20  ;;  %v1694_v3 = vsel %vm1455_vm8, %v1610_v2, 0.0  ;;  %v2507_v63 = vpack.c.bf16 %v2612_v24, %v2612_v24  ;;  %v2613_v59 = vpop.f32.mrb[26].mxu0  ;;  %v3488_v9 = vpop.f32.mrb[18].mxu1 }
 0x123   : > { %4132 = vst [vmem:[#allocation7_spill] sm:$0xff] %v3475_v49  ;;  %vm1357_vm4 = vcmp.lt.s32.totalorder %v3174_v43, 44402  ;;  %v1696_v10 = vsel %vm1455_vm8, %v1611_v28, 0.0  ;;  %v1500_v31 = vadd.f32 %v1499_v54, %v1498_v12  ;;  %v1695_v58 = vadd.f32 %v1694_v3, %v1693_v42  ;;  %1165 = vst.msk [vmem:[%s3195_s9 + $0x84] sm:$0xf] %vm1131_vm5, %v2514_v29  ;;  %v719_v33 = vpop.f32.mrb[27].mxu0 }
 0x124   : > { %v1417_v61 = vsel %vm1353_vm15, %v2612_v24, 0.0  ;;  %vm1359_vm6 = vcmp.lt.s32.totalorder %v3202_v45, 44402  ;;  %v1501_v27 = vsel %vm1455_vm8, %v1414_v20, 0.0  ;;  %1158 = vst.msk [vmem:[%s3195_s9 + $0x68] sm:$0xf] %vm1131_vm5, %v2507_v63  ;;  %v2505_v25 = vpack.c.bf16 %v716_v48, %v716_v48  ;;  %v3497_v24 = vpop.f32.mrb[19].mxu1 }
 0x125   : > { %v1415_v28 = vsel %vm1351_vm0, %v716_v48, 0.0  ;;  %v2508_v2 = vpack.c.bf16 %v2613_v59, %v2613_v59  ;;  %vm1358_vm7 = vcmp.lt.s32.totalorder %v3180_v46, 44402  ;;  %vm1356_vm9 = vcmp.lt.s32.totalorder %v3184_v50, 44402 }
 0x126   : > { %v1697_v42 = vadd.f32 %v1696_v10, %v1695_v58  ;;  %v1502_v12 = vadd.f32 %v1501_v27, %v1500_v31  ;;  %v1503_v20 = vsel %vm1455_vm8, %v1415_v28, 0.0  ;;  %v3502_v29 = vadd.s32 %v3045_v41, %v3431_v19  ;;  %1156 = vst.msk [vmem:[%s3195_s9 + $0x60] sm:$0xf] %vm1131_vm5, %v2505_v25 }
 0x127   : > { %v1698_v34 = vsel %vm1455_vm8, %v1612_v38, 0.0  ;;  %v1615_v54 = vmul.f32 %v1417_v61, %v1417_v61  ;;  %v1613_v3 = vmul.f32 %v1415_v28, %v1415_v28  ;;  %1159 = vst.msk [vmem:[%s3195_s9 + $0x6c] sm:$0xf] %vm1131_vm5, %v2508_v2  ;;  %v2506_v63 = vpack.c.bf16 %v719_v33, %v719_v33  ;;  %v3528_v2 = vpop.f32.mrb[20].mxu1 }
 0x128   : > { %v1504_v48 = vadd.f32 %v1503_v20, %v1502_v12  ;;  %v1699_v49 = vadd.f32 %v1698_v34, %v1697_v42  ;;  %v1418_v10 = vsel %vm1354_vm1, %v2613_v59, 0.0  ;;  %v1416_v31 = vsel %vm1352_vm2, %v719_v33, 0.0  ;;  %v2616_v36 = vpop.f32.mrb[28].mxu0 }
 0x129   : > { %v1700_v19 = vsel %vm1455_vm8, %v1613_v3, 0.0  ;;  %1157 = vst.msk [vmem:[%s3195_s9 + $0x64] sm:$0xf] %vm1131_vm5, %v2506_v63  ;;  %v1505_v38 = vsel %vm1455_vm8, %v1416_v31, 0.0  ;;  %v1614_v58 = vmul.f32 %v1416_v31, %v1416_v31  ;;  %vm1361_vm10 = vcmp.lt.s32.totalorder %v3187_v51, 44402  ;;  %v732_v20 = vpop.f32.mrb[29].mxu0 }
 0x12a   : > { %vm1360_vm11 = vcmp.lt.s32.totalorder %v3208_v7, 44402  ;;  %v3521_v27 = vadd.s32 %v3045_v41, %v3453_v21  ;;  %v1701_v35 = vadd.f32 %v1700_v19, %v1699_v49  ;;  %v1506_v59 = vadd.f32 %v1505_v38, %v1504_v48  ;;  %v3532_v49 = vpop.f32.mrb[21].mxu1  ;;  %v2617_v48 = vpop.f32.mrb[30].mxu0 }
 0x12b   : > { %v2519_v25 = vpack.c.bf16 %v3327_v4, %v3327_v4  ;;  %v3526_v28 = vadd.s32 %v3045_v41, %v1247_v56  ;;  %v1507_v33 = vsel %vm1455_vm8, %v1417_v61, 0.0  ;;  %v1616_v42 = vmul.f32 %v1418_v10, %v1418_v10  ;;  %v3541_v61 = vpop.f32.mrb[22].mxu1 }
 0x12c   : > { %v1702_v12 = vsel %vm1455_vm8, %v1614_v58, 0.0  ;;  %v2511_v21 = vpack.c.bf16 %v2616_v36, %v2616_v36  ;;  %v1704_v34 = vsel %vm1455_vm8, %v1615_v54, 0.0  ;;  %v1508_v3 = vadd.f32 %v1507_v33, %v1506_v59  ;;  %v735_v58 = vpop.f32.mrb[31].mxu0 }
 0x12d   : > { %v1703_v63 = vadd.f32 %v1702_v12, %v1701_v35  ;;  %vm1362_vm12 = vcmp.lt.s32.totalorder %v3205_v52, 44402  ;;  %1170 = vst.msk [vmem:[%s3195_s9 + $0x98] sm:$0xf] %vm1131_vm5, %v2519_v25  ;;  %v3539_v56 = vadd.s32 432, %v3041_v39  ;;  %v1509_v31 = vsel %vm1455_vm8, %v1418_v10, 0.0  ;;  %v3549_v35 = vpop.f32.mrb[23].mxu1 }
 0x12e   : > { %1162 = vst.msk [vmem:[%s3195_s9 + $0x78] sm:$0xf] %vm1131_vm5, %v2511_v21  ;;  %v2509_v19 = vpack.c.bf16 %v732_v20, %v732_v20  ;;  %v1419_v54 = vsel %vm1355_vm3, %v732_v20, 0.0  ;;  %v2512_v38 = vpack.c.bf16 %v2617_v48, %v2617_v48  ;;  %vm1363_vm13 = vcmp.lt.s32.totalorder %v3223_v23, 44402  ;;  %v3572_v46 = vpop.f32.mrb[24].mxu1 }
 0x12f   : > { %v1705_v59 = vadd.f32 %v1704_v34, %v1703_v63  ;;  %v1421_v25 = vsel %vm1357_vm4, %v2616_v36, 0.0  ;;  %v1510_v33 = vadd.f32 %v1509_v31, %v1508_v3  ;;  %v1511_v10 = vsel %vm1455_vm8, %v1419_v54, 0.0 }
 0x130   : > { %v1706_v12 = vsel %vm1455_vm8, %v1616_v42, 0.0  ;;  %1160 = vst.msk [vmem:[%s3195_s9 + $0x70] sm:$0xf] %vm1131_vm5, %v2509_v19  ;;  %v1617_v44 = vmul.f32 %v1419_v54, %v1419_v54  ;;  %1163 = vst.msk [vmem:[%s3195_s9 + $0x7c] sm:$0xf] %vm1131_vm5, %v2512_v38  ;;  %v2510_v21 = vpack.c.bf16 %v735_v58, %v735_v58  ;;  %v1423_v20 = vsel %vm1359_vm6, %v3288_v17, 0.0 }
 0x131   : > { %v1512_v34 = vadd.f32 %v1511_v10, %v1510_v33  ;;  %v1707_v63 = vadd.f32 %v1706_v12, %v1705_v59  ;;  %v1422_v43 = vsel %vm1358_vm7, %v2617_v48, 0.0  ;;  %v1420_v36 = vsel %vm1356_vm9, %v735_v58, 0.0  ;;  %v3580_v33 = vpop.f32.mrb[25].mxu1 }
 0x132   : > { %v1619_v3 = vmul.f32 %v1421_v25, %v1421_v25  ;;  %v1708_v42 = vsel %vm1455_vm8, %v1617_v44, 0.0  ;;  %1161 = vst.msk [vmem:[%s3195_s9 + $0x74] sm:$0xf] %vm1131_vm5, %v2510_v21  ;;  %v1513_v31 = vsel %vm1455_vm8, %v1420_v36, 0.0  ;;  %v1618_v19 = vmul.f32 %v1420_v36, %v1420_v36  ;;  %v3589_v21 = vpop.f32.mrb[26].mxu1 }
 0x133   : > { %vm1364_vm14 = vcmp.lt.s32.totalorder %v3257_v47, 44402  ;;  %v1515_v45 = vsel %vm1455_vm8, %v1421_v25, 0.0  ;;  %v1709_v17 = vadd.f32 %v1708_v42, %v1707_v63  ;;  %v1514_v54 = vadd.f32 %v1513_v31, %v1512_v34  ;;  %v3601_v7 = vpop.f32.mrb[27].mxu1 }
 0x134   : > { %v1621_v38 = vmul.f32 %v1423_v20, %v1423_v20  ;;  %v1620_v50 = vmul.f32 %v1422_v43, %v1422_v43  ;;  %v1710_v48 = vsel %vm1455_vm8, %v1618_v19, 0.0  ;;  %vm1365_vm15 = vcmp.lt.s32.totalorder %v3213_v15, 44402 }
 0x135   : > { %v2517_v58 = vpack.c.bf16 %v3335_v37, %v3335_v37  ;;  %v2520_v59 = vpack.c.bf16 %v3340_v14, %v3340_v14  ;;  %v1516_v25 = vadd.f32 %v1515_v45, %v1514_v54  ;;  %v1711_v10 = vadd.f32 %v1710_v48, %v1709_v17 }
 0x136   : > { %v1425_v12 = vsel %vm1361_vm10, %v3277_v0, 0.0  ;;  %v1424_v44 = vsel %vm1360_vm11, %v3304_v1, 0.0  ;;  %vm1366_vm0 = vcmp.lt.s32.totalorder %v3230_v30, 44402  ;;  %v1712_v34 = vsel %vm1455_vm8, %v1619_v3, 0.0 }
 0x137   : > { %v1517_v63 = vsel %vm1455_vm8, %v1422_v43, 0.0  ;;  %v1519_v36 = vsel %vm1455_vm8, %v1423_v20, 0.0  ;;  %1168 = vst.msk [vmem:[%s3195_s9 + $0x90] sm:$0xf] %vm1131_vm5, %v2517_v58  ;;  %1171 = vst.msk [vmem:[%s3195_s9 + $0x9c] sm:$0xf] %vm1131_vm5, %v2520_v59  ;;  %v2518_v51 = vpack.c.bf16 %v3351_v8, %v3351_v8  ;;  %v1713_v0 = vadd.f32 %v1712_v34, %v1711_v10 }
 0x138   : > { %vm1367_vm1 = vcmp.lt.s32.totalorder %v3273_v16, 44402  ;;  %v1518_v1 = vadd.f32 %v1517_v63, %v1516_v25  ;;  %v1716_v3 = vsel %vm1455_vm8, %v1621_v38, 0.0  ;;  %v1250_v43 = vadd.s32 416, %v3041_v39 }
 0x139   : > { %v1714_v20 = vsel %vm1455_vm8, %v1620_v50, 0.0  ;;  %v1426_v42 = vsel %vm1362_vm12, %v3293_v18, 0.0  ;;  %v1622_v31 = vmul.f32 %v1424_v44, %v1424_v44  ;;  %1169 = vst.msk [vmem:[%s3195_s9 + $0x94] sm:$0xf] %vm1131_vm5, %v2518_v51  ;;  %v2523_v19 = vpack.c.bf16 %v3378_v5, %v3378_v5 }
 0x13a   : > { %v1623_v45 = vmul.f32 %v1425_v12, %v1425_v12  ;;  %v1520_v17 = vadd.f32 %v1519_v36, %v1518_v1  ;;  %v1715_v54 = vadd.f32 %v1714_v20, %v1713_v0  ;;  %v1427_v38 = vsel %vm1363_vm13, %v3335_v37, 0.0  ;;  %v3626_v37 = vpop.f32.mrb[28].mxu1 }
 0x13b   : > { %v1521_v50 = vsel %vm1455_vm8, %v1424_v44, 0.0  ;;  %1174 = vst.msk [vmem:[%s3195_s9 + $0xa8] sm:$0xf] %vm1131_vm5, %v2523_v19  ;;  %v2521_v52 = vpack.c.bf16 %v3385_v40, %v3385_v40  ;;  %vm1368_vm2 = vcmp.lt.s32.totalorder %v3283_v6, 44402  ;;  %v1253_v18 = vadd.s32 440, %v3041_v39  ;;  %v3637_v36 = vpop.f32.mrb[29].mxu1 }
 0x13c   : > { %v1251_v48 = vadd.s32 424, %v3041_v39  ;;  %v1717_v58 = vadd.f32 %v1716_v3, %v1715_v54  ;;  %v1624_v59 = vmul.f32 %v1426_v42, %v1426_v42  ;;  %v1522_v25 = vadd.f32 %v1521_v50, %v1520_v17  ;;  %v3645_v3 = vpop.f32.mrb[30].mxu1 }
 0x13d   : > { %v2524_v23 = vpack.c.bf16 %v3392_v26, %v3392_v26  ;;  %v1523_v10 = vsel %vm1455_vm8, %v1425_v12, 0.0  ;;  %v1718_v44 = vsel %vm1455_vm8, %v1622_v31, 0.0  ;;  %v1625_v34 = vmul.f32 %v1427_v38, %v1427_v38  ;;  %1172 = vst.msk [vmem:[%s3195_s9 + $0xa0] sm:$0xf] %vm1131_vm5, %v2521_v52  ;;  %v3655_v47 = vpop.f32.mrb[31].mxu1 }
 0x13e   : > { %vm1369_vm3 = vcmp.lt.s32.totalorder %v3268_v55, 44402  ;;  %v3635_v63 = vadd.s32 %v3045_v41, %v3539_v56  ;;  %v1720_v51 = vsel %vm1455_vm8, %v1623_v45, 0.0  ;;  %v1524_v0 = vadd.f32 %v1523_v10, %v1522_v25 }
 0x13f   : > { %v1719_v1 = vadd.f32 %v1718_v44, %v1717_v58  ;;  %v1428_v12 = vsel %vm1364_vm14, %v3351_v8, 0.0  ;;  %1175 = vst.msk [vmem:[%s3195_s9 + $0xac] sm:$0xf] %vm1131_vm5, %v2524_v23  ;;  %v1525_v20 = vsel %vm1455_vm8, %v1426_v42, 0.0  ;;  %v1527_v56 = vsel %vm1455_vm8, %v1427_v38, 0.0  ;;  %v4133_v23 = vld [vmem:[#allocation5_spill] sm:$0xff] }
 0x140   : > { %vm1370_vm4 = vcmp.lt.s32.totalorder %v3280_v53, 44402  ;;  %v2522_v31 = vpack.c.bf16 %v3401_v13, %v3401_v13  ;;  %v2527_v19 = vpack.c.bf16 %v3427_v22, %v3427_v22  ;;  %vm1371_vm6 = vcmp.lt.s32.totalorder %v3381_v62, 44402 }
 0x141   : > { %v1722_v8 = vsel %vm1455_vm8, %v1624_v59, 0.0  ;;  %v1721_v45 = vadd.f32 %v1720_v51, %v1719_v1  ;;  %v1429_v42 = vsel %vm1365_vm15, %v3327_v4, 0.0  ;;  %v1526_v17 = vadd.f32 %v1525_v20, %v1524_v0  ;;  %v4134_v1 = vld [vmem:[#allocation3_spill] sm:$0xff] }
 0x142   : > { %v1724_v54 = vsel %vm1455_vm8, %v1625_v34, 0.0  ;;  %v1430_v38 = vsel %vm1366_vm0, %v3340_v14, 0.0  ;;  %v1626_v50 = vmul.f32 %v1428_v12, %v1428_v12  ;;  %1173 = vst.msk [vmem:[%s3195_s9 + $0xa4] sm:$0xf] %vm1131_vm5, %v2522_v31  ;;  %1178 = vst.msk [vmem:[%s3195_s9 + $0xb8] sm:$0xf] %vm1131_vm5, %v2527_v19  ;;  %v2525_v52 = vpack.c.bf16 %v3435_v57, %v3435_v57 }
 0x143   : > { %v1528_v58 = vadd.f32 %v1527_v56, %v1526_v17  ;;  %v1723_v59 = vadd.f32 %v1722_v8, %v1721_v45  ;;  %v1431_v15 = vsel %vm1367_vm1, %v3385_v40, 0.0  ;;  %v3675_v4 = vadd.s32 %v3045_v41, %v1250_v43  ;;  %v4136_v31 = vld [vmem:[#allocation4_spill] sm:$0xff] }
 0x144   : > { %v1627_v30 = vmul.f32 %v1429_v42, %v1429_v42  ;;  %v1529_v14 = vsel %vm1455_vm8, %v1428_v12, 0.0  ;;  %1176 = vst.msk [vmem:[%s3195_s9 + $0xb0] sm:$0xf] %vm1131_vm5, %v2525_v52  ;;  %v2528_v25 = vpack.c.bf16 %v3440_v60, %v3440_v60  ;;  %vm1372_vm7 = vcmp.lt.s32.totalorder %v4133_v23, 44402  ;;  %v4135_v12 = vld [vmem:[#allocation6_spill] sm:$0xff] }
 0x145   : > { %v3684_v10 = vadd.s32 %v3045_v41, %v1253_v18  ;;  %v1725_v44 = vadd.f32 %v1724_v54, %v1723_v59  ;;  %v1628_v16 = vmul.f32 %v1430_v38, %v1430_v38  ;;  %v1530_v40 = vadd.f32 %v1529_v14, %v1528_v58 }
 0x146   : > { %v3687_v43 = vadd.s32 %v3045_v41, %v1251_v48  ;;  %v1531_v34 = vsel %vm1455_vm8, %v1429_v42, 0.0  ;;  %v1726_v51 = vsel %vm1455_vm8, %v1626_v50, 0.0  ;;  %v1629_v0 = vmul.f32 %v1431_v15, %v1431_v15  ;;  %1179 = vst.msk [vmem:[%s3195_s9 + $0xbc] sm:$0xf] %vm1131_vm5, %v2528_v25 }
 0x147   : > { %vm1373_vm9 = vcmp.lt.s32.totalorder %v4134_v1, 44402  ;;  %v2526_v18 = vpack.c.bf16 %v4135_v12, %v4135_v12  ;;  %v1532_v20 = vadd.f32 %v1531_v34, %v1530_v40  ;;  %v1727_v56 = vadd.f32 %v1726_v51, %v1725_v44 }
 0x148   : > { %v1432_v48 = vsel %vm1368_vm2, %v3401_v13, 0.0  ;;  %vm1374_vm10 = vcmp.lt.s32.totalorder %v4136_v31, 44402  ;;  %v2531_v19 = vpack.c.bf16 %v3472_v32, %v3472_v32  ;;  %v1728_v8 = vsel %vm1455_vm8, %v1627_v30, 0.0 }
 0x149   : > { %v1533_v45 = vsel %vm1455_vm8, %v1430_v38, 0.0  ;;  %v1535_v42 = vsel %vm1455_vm8, %v1431_v15, 0.0  ;;  %1177 = vst.msk [vmem:[%s3195_s9 + $0xb4] sm:$0xf] %vm1131_vm5, %v2526_v18  ;;  %vm1375_vm11 = vcmp.lt.s32.totalorder %v3502_v29, 44402  ;;  %v1256_v17 = vadd.s32 464, %v3041_v39 }
 0x14a   : > { %v1730_v6 = vsel %vm1455_vm8, %v1628_v16, 0.0  ;;  %v1729_v13 = vadd.f32 %v1728_v8, %v1727_v56  ;;  %v1433_v54 = vsel %vm1369_vm3, %v3378_v5, 0.0  ;;  %v1534_v50 = vadd.f32 %v1533_v45, %v1532_v20  ;;  %1182 = vst.msk [vmem:[%s3195_s9 + $0xc8] sm:$0xf] %vm1131_vm5, %v2531_v19 }
 0x14b   : > { %v1732_v38 = vsel %vm1455_vm8, %v1629_v0, 0.0  ;;  %v1630_v52 = vmul.f32 %v1432_v48, %v1432_v48  ;;  %v2529_v58 = vpack.c.bf16 %v3480_v11, %v3480_v11  ;;  %v2532_v59 = vpack.c.bf16 %v3488_v9, %v3488_v9  ;;  %v4137_v0 = vld [vmem:[#allocation7_spill] sm:$0xff] }
 0x14c   : > { %v1536_v15 = vadd.f32 %v1535_v42, %v1534_v50  ;;  %v1731_v30 = vadd.f32 %v1730_v6, %v1729_v13  ;;  %v1434_v14 = vsel %vm1370_vm4, %v3392_v26, 0.0  ;;  %v1435_v55 = vsel %vm1371_vm6, %v3435_v57, 0.0 }
 0x14d   : > { %v1631_v5 = vmul.f32 %v1433_v54, %v1433_v54  ;;  %v1537_v25 = vsel %vm1455_vm8, %v1432_v48, 0.0  ;;  %1180 = vst.msk [vmem:[%s3195_s9 + $0xc0] sm:$0xf] %vm1131_vm5, %v2529_v58  ;;  %1183 = vst.msk [vmem:[%s3195_s9 + $0xcc] sm:$0xf] %vm1131_vm5, %v2532_v59  ;;  %v2530_v44 = vpack.c.bf16 %v3497_v24, %v3497_v24  ;;  %vm1376_vm12 = vcmp.lt.s32.totalorder %v3526_v28, 44402 }
 0x14e   : > { %v1254_v53 = vadd.s32 448, %v3041_v39  ;;  %v1539_v26 = vsel %vm1455_vm8, %v1433_v54, 0.0  ;;  %v1733_v16 = vadd.f32 %v1732_v38, %v1731_v30  ;;  %v1538_v62 = vadd.f32 %v1537_v25, %v1536_v15 }
 0x14f   : > { %v1257_v57 = vadd.s32 472, %v3041_v39  ;;  %v1632_v40 = vmul.f32 %v1434_v14, %v1434_v14  ;;  %v1734_v34 = vsel %vm1455_vm8, %v1630_v52, 0.0  ;;  %v1633_v51 = vmul.f32 %v1435_v55, %v1435_v55  ;;  %1181 = vst.msk [vmem:[%s3195_s9 + $0xc4] sm:$0xf] %vm1131_vm5, %v2530_v44 }
 0x150   : > { %vm1377_vm13 = vcmp.lt.s32.totalorder %v4137_v0, 44402  ;;  %v2535_v18 = vpack.c.bf16 %v3528_v2, %v3528_v2  ;;  %v1540_v20 = vadd.f32 %v1539_v26, %v1538_v62  ;;  %v1735_v56 = vadd.f32 %v1734_v34, %v1733_v16 }
 0x151   : > { %v1436_v48 = vsel %vm1372_vm7, %v4135_v12, 0.0  ;;  %vm1378_vm14 = vcmp.lt.s32.totalorder %v3521_v27, 44402  ;;  %v3748_v19 = vadd.s32 456, %v3041_v39  ;;  %v1736_v8 = vsel %vm1455_vm8, %v1631_v5, 0.0 }
 0x152   : > { %v1541_v45 = vsel %vm1455_vm8, %v1434_v14, 0.0  ;;  %v1543_v42 = vsel %vm1455_vm8, %v1435_v55, 0.0  ;;  %1186 = vst.msk [vmem:[%s3195_s9 + $0xd8] sm:$0xf] %vm1131_vm5, %v2535_v18  ;;  %v2533_v6 = vpack.c.bf16 %v3532_v49, %v3532_v49  ;;  %vm1379_vm15 = vcmp.lt.s32.totalorder %v3675_v4, 44402 }
 0x153   : > { %v1737_v23 = vadd.f32 %v1736_v8, %v1735_v56  ;;  %v1437_v12 = vsel %vm1373_vm9, %v3427_v22, 0.0  ;;  %v1542_v13 = vadd.f32 %v1541_v45, %v1540_v20  ;;  %v2536_v54 = vpack.c.bf16 %v3541_v61, %v3541_v61 }
 0x154   : > { %v1738_v50 = vsel %vm1455_vm8, %v1632_v40, 0.0  ;;  %v1740_v38 = vsel %vm1455_vm8, %v1633_v51, 0.0  ;;  %v1438_v52 = vsel %vm1374_vm10, %v3440_v60, 0.0  ;;  %v1634_v58 = vmul.f32 %v1436_v48, %v1436_v48  ;;  %1184 = vst.msk [vmem:[%s3195_s9 + $0xd0] sm:$0xf] %vm1131_vm5, %v2533_v6 }
 0x155   : > { %v1544_v59 = vadd.f32 %v1543_v42, %v1542_v13  ;;  %v1739_v15 = vadd.f32 %v1738_v50, %v1737_v23  ;;  %v1439_v22 = vsel %vm1375_vm11, %v3480_v11, 0.0  ;;  %1187 = vst.msk [vmem:[%s3195_s9 + $0xdc] sm:$0xf] %vm1131_vm5, %v2536_v54  ;;  %v3776_v1 = vadd.s32 %v3045_v41, %v1256_v17 }
 0x156   : > { %v1635_v30 = vmul.f32 %v1437_v12, %v1437_v12  ;;  %v1545_v31 = vsel %vm1455_vm8, %v1436_v48, 0.0  ;;  %v2534_v60 = vpack.c.bf16 %v3549_v35, %v3549_v35  ;;  %vm1380_vm0 = vcmp.lt.s32.totalorder %v3687_v43, 44402 }
 0x157   : > { %v2539_v14 = vpack.c.bf16 %v3572_v46, %v3572_v46  ;;  %v1741_v29 = vadd.f32 %v1740_v38, %v1739_v15  ;;  %v1636_v11 = vmul.f32 %v1438_v52, %v1438_v52  ;;  %v1546_v55 = vadd.f32 %v1545_v31, %v1544_v59 }
 0x158   : > { %v3785_v5 = vadd.s32 %v3045_v41, %v1254_v53  ;;  %v1547_v17 = vsel %vm1455_vm8, %v1437_v12, 0.0  ;;  %v1742_v25 = vsel %vm1455_vm8, %v1634_v58, 0.0  ;;  %v1637_v44 = vmul.f32 %v1439_v22, %v1439_v22  ;;  %1185 = vst.msk [vmem:[%s3195_s9 + $0xd4] sm:$0xf] %vm1131_vm5, %v2534_v60 }
 0x159   : > { %vm1381_vm1 = vcmp.lt.s32.totalorder %v3635_v63, 44402  ;;  %1190 = vst.msk [vmem:[%s3195_s9 + $0xe8] sm:$0xf] %vm1131_vm5, %v2539_v14  ;;  %v2537_v26 = vpack.c.bf16 %v3580_v33, %v3580_v33  ;;  %v1548_v16 = vadd.f32 %v1547_v17, %v1546_v55  ;;  %v1743_v62 = vadd.f32 %v1742_v25, %v1741_v29 }
 0x15a   : > { %v1440_v53 = vsel %vm1376_vm12, %v3497_v24, 0.0  ;;  %v3800_v40 = vadd.s32 %v3045_v41, %v1257_v57  ;;  %v1744_v34 = vsel %vm1455_vm8, %v1635_v30, 0.0  ;;  %v1549_v51 = vsel %vm1455_vm8, %v1438_v52, 0.0 }
 0x15b   : > { %v1551_v18 = vsel %vm1455_vm8, %v1439_v22, 0.0  ;;  %vm1382_vm2 = vcmp.lt.s32.totalorder %v3684_v10, 44402  ;;  %1188 = vst.msk [vmem:[%s3195_s9 + $0xe0] sm:$0xf] %vm1131_vm5, %v2537_v26  ;;  %v2540_v20 = vpack.c.bf16 %v3589_v21, %v3589_v21  ;;  %v1746_v28 = vsel %vm1455_vm8, %v1636_v11, 0.0 }
 0x15c   : > { %v1745_v24 = vadd.f32 %v1744_v34, %v1743_v62  ;;  %v1441_v57 = vsel %vm1377_vm13, %v3472_v32, 0.0  ;;  %v1550_v56 = vadd.f32 %v1549_v51, %v1548_v16  ;;  %v1748_v48 = vsel %vm1455_vm8, %v1637_v44, 0.0 }
 0x15d   : > { %v1442_v8 = vsel %vm1378_vm14, %v3488_v9, 0.0  ;;  %v1638_v45 = vmul.f32 %v1440_v53, %v1440_v53  ;;  %1191 = vst.msk [vmem:[%s3195_s9 + $0xec] sm:$0xf] %vm1131_vm5, %v2540_v20  ;;  %v2538_v42 = vpack.c.bf16 %v3601_v7, %v3601_v7  ;;  %v1443_v32 = vsel %vm1379_vm15, %v3532_v49, 0.0 }
 0x15e   : > { %v1552_v6 = vadd.f32 %v1551_v18, %v1550_v56  ;;  %v1747_v23 = vadd.f32 %v1746_v28, %v1745_v24  ;;  %v2543_v0 = vpack.c.bf16 %v3626_v37, %v3626_v37  ;;  %v1639_v12 = vmul.f32 %v1441_v57, %v1441_v57 }
 0x15f   : > { %v1553_v27 = vsel %vm1455_vm8, %v1440_v53, 0.0  ;;  %vm1383_vm3 = vcmp.lt.s32.totalorder %v3785_v5, 44402  ;;  %1189 = vst.msk [vmem:[%s3195_s9 + $0xe4] sm:$0xf] %vm1131_vm5, %v2538_v42  ;;  %v1320_v9 = vadd.s32 %v3045_v41, %v3748_v19  ;;  %v1555_v13 = vsel %vm1455_vm8, %v1441_v57, 0.0 }
 0x160   : > { %v1749_v54 = vadd.f32 %v1748_v48, %v1747_v23  ;;  %v1640_v50 = vmul.f32 %v1442_v8, %v1442_v8  ;;  %v1554_v49 = vadd.f32 %v1553_v27, %v1552_v6  ;;  %1194 = vst.msk [vmem:[%s3195_s9 + $0xf8] sm:$0xf] %vm1131_vm5, %v2543_v0  ;;  %v1750_v4 = vsel %vm1455_vm8, %v1638_v45, 0.0 }
 0x161   : > { %v1641_v38 = vmul.f32 %v1443_v32, %v1443_v32  ;;  %vm1385_vm4 = vcmp.lt.s32.totalorder %v3776_v1, 44402  ;;  %v2541_v52 = vpack.c.bf16 %v3637_v36, %v3637_v36  ;;  %v2544_v19 = vpack.c.bf16 %v3645_v3, %v3645_v3 }
 0x162   : > { %v1556_v58 = vadd.f32 %v1555_v13, %v1554_v49  ;;  %v1751_v59 = vadd.f32 %v1750_v4, %v1749_v54  ;;  %v1444_v15 = vsel %vm1380_vm0, %v3549_v35, 0.0  ;;  %v1258_v22 = vadd.s32 480, %v3041_v39 }
 0x163   : > { %v1752_v30 = vsel %vm1455_vm8, %v1639_v12, 0.0  ;;  %v1557_v31 = vsel %vm1455_vm8, %v1442_v8, 0.0  ;;  %v1559_v60 = vsel %vm1455_vm8, %v1443_v32, 0.0  ;;  %1192 = vst.msk [vmem:[%s3195_s9 + $0xf0] sm:$0xf] %vm1131_vm5, %v2541_v52  ;;  %v2542_v14 = vpack.c.bf16 %v3655_v47, %v3655_v47 }
 0x164   : > { %1195 = vst.msk [vmem:[%s3195_s9 + $0xfc] sm:$0xf] %vm1131_vm5, %v2544_v19  ;;  %v1753_v29 = vadd.f32 %v1752_v30, %v1751_v59  ;;  %v1445_v35 = vsel %vm1381_vm1, %v3528_v2, 0.0  ;;  %v1558_v43 = vadd.f32 %v1557_v31, %v1556_v58  ;;  %vm1386_vm6 = vcmp.lt.s32.totalorder %v3800_v40, 44402 }
 0x165   : > { %v1754_v11 = vsel %vm1455_vm8, %v1640_v50, 0.0  ;;  %v1756_v55 = vsel %vm1455_vm8, %v1641_v38, 0.0  ;;  %v1642_v17 = vmul.f32 %v1444_v15, %v1444_v15  ;;  %1193 = vst.msk [vmem:[%s3195_s9 + $0xf4] sm:$0xf] %vm1131_vm5, %v2542_v14  ;;  %v1259_v25 = vadd.s32 488, %v3041_v39 }
 0x166   : > { %v1560_v44 = vadd.f32 %v1559_v60, %v1558_v43  ;;  %v1755_v26 = vadd.f32 %v1754_v11, %v1753_v29  ;;  %v1446_v16 = vsel %vm1382_vm2, %v3541_v61, 0.0  ;;  %v1447_v2 = vsel %vm1383_vm3, %v3580_v33, 0.0 }
 0x167   : > { %v1643_v63 = vmul.f32 %v1445_v35, %v1445_v35  ;;  %v1561_v62 = vsel %vm1455_vm8, %v1444_v15, 0.0  ;;  %vm1384_vm7 = vcmp.lt.s32.totalorder %v1320_v9, 44402  ;;  %v1323_v53 = vadd.s32 %v3045_v41, %v1258_v22 }
 0x168   : > { %v1757_v34 = vadd.f32 %v1756_v55, %v1755_v26  ;;  %v1562_v51 = vadd.f32 %v1561_v62, %v1560_v44  ;;  %v1260_v18 = vadd.s32 496, %v3041_v39  ;;  %v1261_v20 = vadd.s32 504, %v3041_v39 }
 0x169   : > { %v1563_v28 = vsel %vm1455_vm8, %v1445_v35, 0.0  ;;  %v1644_v10 = vmul.f32 %v1446_v16, %v1446_v16  ;;  %v1758_v61 = vsel %vm1455_vm8, %v1642_v17, 0.0  ;;  %v1645_v24 = vmul.f32 %v1447_v2, %v1447_v2 }
 0x16a   : > { %v1564_v5 = vadd.f32 %v1563_v28, %v1562_v51  ;;  %v1759_v33 = vadd.f32 %v1758_v61, %v1757_v34  ;;  %v1448_v57 = vsel %vm1384_vm7, %v3601_v7, 0.0  ;;  %v1324_v56 = vadd.s32 %v3045_v41, %v1259_v25 }
 0x16b   : > { %v1760_v48 = vsel %vm1455_vm8, %v1643_v63, 0.0  ;;  %v1565_v8 = vsel %vm1455_vm8, %v1446_v16, 0.0  ;;  %v1567_v45 = vsel %vm1455_vm8, %v1447_v2, 0.0  ;;  %vm1387_vm5 = vcmp.lt.s32.totalorder %v1323_v53, 44402 }
 0x16c   : > { %v1761_v39 = vadd.f32 %v1760_v48, %v1759_v33  ;;  %v1449_v42 = vsel %vm1385_vm4, %v3572_v46, 0.0  ;;  %v1566_v6 = vadd.f32 %v1565_v8, %v1564_v5  ;;  %v1325_v23 = vadd.s32 %v3045_v41, %v1260_v18 }
 0x16d   : > { %v1762_v32 = vsel %vm1455_vm8, %v1644_v10, 0.0  ;;  %v1764_v7 = vsel %vm1455_vm8, %v1645_v24, 0.0  ;;  %v1646_v0 = vmul.f32 %v1448_v57, %v1448_v57  ;;  %v1450_v9 = vsel %vm1386_vm6, %v3589_v21, 0.0 }
 0x16e   : > { %v1568_v12 = vadd.f32 %v1567_v45, %v1566_v6  ;;  %v1763_v27 = vadd.f32 %v1762_v32, %v1761_v39  ;;  %v1451_v13 = vsel %vm1387_vm5, %v3637_v36, 0.0  ;;  %v1647_v54 = vmul.f32 %v1449_v42, %v1449_v42 }
 0x16f   : > { %v1569_v1 = vsel %vm1455_vm8, %v1448_v57, 0.0  ;;  %v1326_v46 = vadd.s32 %v3045_v41, %v1261_v20  ;;  %vm1388_vm9 = vcmp.lt.s32.totalorder %v1324_v56, 44402  ;;  %vm1389_vm10 = vcmp.lt.s32.totalorder %v1325_v23, 44402 }
 0x170   : > { %v1765_v50 = vadd.f32 %v1764_v7, %v1763_v27  ;;  %v1570_v49 = vadd.f32 %v1569_v1, %v1568_v12  ;;  %v1571_v4 = vsel %vm1455_vm8, %v1449_v42, 0.0  ;;  %v1648_v38 = vmul.f32 %v1450_v9, %v1450_v9 }
 0x171   : > { %v1766_v52 = vsel %vm1455_vm8, %v1646_v0, 0.0  ;;  %v1649_v19 = vmul.f32 %v1451_v13, %v1451_v13  ;;  %v1452_v21 = vsel %vm1388_vm9, %v3655_v47, 0.0  ;;  %v1768_v36 = vsel %vm1455_vm8, %v1647_v54, 0.0 }
 0x172   : > { %v1572_v58 = vadd.f32 %v1571_v4, %v1570_v49  ;;  %v1767_v40 = vadd.f32 %v1766_v52, %v1765_v50  ;;  %v1573_v59 = vsel %vm1455_vm8, %v1450_v9, 0.0  ;;  %v1575_v41 = vsel %vm1455_vm8, %v1451_v13, 0.0 }
 0x173   : > { %vm1390_vm11 = vcmp.lt.s32.totalorder %v1326_v46, 44402  ;;  %v1453_v22 = vsel %vm1389_vm10, %v3626_v37, 0.0  ;;  %v1770_v31 = vsel %vm1455_vm8, %v1648_v38, 0.0  ;;  %v1772_v60 = vsel %vm1455_vm8, %v1649_v19, 0.0 }
 0x174   : > { %v1769_v15 = vadd.f32 %v1768_v36, %v1767_v40  ;;  %v1574_v30 = vadd.f32 %v1573_v59, %v1572_v58  ;;  %v1650_v14 = vmul.f32 %v1452_v21, %v1452_v21  ;;  %v1454_v47 = vsel %vm1390_vm11, %v3645_v3, 0.0 }
 0x175   : > { %v1651_v43 = vmul.f32 %v1453_v22, %v1453_v22  ;;  %v1577_v11 = vsel %vm1455_vm8, %v1452_v21, 0.0  ;;  %v1579_v25 = vsel %vm1455_vm8, %v1453_v22, 0.0  ;;  %v1652_v44 = vmul.f32 %v1454_v47, %v1454_v47 }
 0x176   : > { %v1576_v29 = vadd.f32 %v1575_v41, %v1574_v30  ;;  %v1771_v35 = vadd.f32 %v1770_v31, %v1769_v15  ;;  %v1774_v37 = vsel %vm1455_vm8, %v1650_v14, 0.0  ;;  %v1581_v63 = vsel %vm1455_vm8, %v1454_v47, 0.0 }
 0x177   : > { %v1776_v2 = vsel %vm1455_vm8, %v1651_v43, 0.0  ;;  %v1778_v53 = vsel %vm1455_vm8, %v1652_v44, 0.0  ;;  %vm1786_vm12 = vcmask 1040384   ;;  %vm1788_vm8 = vcmask 254976  }
 0x178   : > { %v1773_v55 = vadd.f32 %v1772_v60, %v1771_v35  ;;  %v1578_v17 = vadd.f32 %v1577_v11, %v1576_v29 }
 0x17a   : > { %v1580_v26 = vadd.f32 %v1579_v25, %v1578_v17  ;;  %v1775_v16 = vadd.f32 %v1774_v37, %v1773_v55 }
 0x17c   : > { %v1582_v62 = vadd.f32 %v1581_v63, %v1580_v26  ;;  %v1777_v3 = vadd.f32 %v1776_v2, %v1775_v16 }
 0x17e   : > { %v1583_v34 = vrot.slane %v1582_v62, 4  ;;  %v1779_v51 = vadd.f32 %v1778_v53, %v1777_v3 }
 0x180   : > { %v1584_v18 = vadd.f32 %v1583_v34, %v1582_v62  ;;  %v1780_v20 = vrot.slane %v1779_v51, 4 }
 0x182   : > { %v1585_v28 = vrot.slane %v1584_v18, 2  ;;  %v1781_v10 = vadd.f32 %v1780_v20, %v1779_v51 }
 0x184   : > { %v1586_v61 = vadd.f32 %v1585_v28, %v1584_v18  ;;  %v1782_v24 = vrot.slane %v1781_v10, 2 }
 0x186   : > { %v1587_v5 = vrot.slane %v1586_v61, 1  ;;  %v1783_v33 = vadd.f32 %v1782_v24, %v1781_v10 }
 0x187   : > { %1803 = sbr.rel (!%p2950_p3) target bundleno = 489 (0x1e9), region = 32 }
 0x188   : > { %v1784_v57 = vrot.slane %v1783_v33, 1  ;;  %v1588_v56 = vadd.f32 %v1587_v5, %v1586_v61 }
 0x18a   : > { %v1785_v48 = vadd.f32 %v1784_v57, %v1783_v33 }
 0x18c   : > { %v1787_v8 = vsel %vm1786_vm12, %v1588_v56, %v1785_v48 }
 0x18d   : > { %1789 = vst.msk [vmem:[%s241_s19] sm:$0x3] %vm1788_vm8, %v1787_v8 }
 0x18e   : > { %s4148_s21 = smov (!%p1806_p10, %s1805_s21), 64 }
 0x18f   : > { %s2466_s28 = sshll.u32 %s4148_s21, 6 }
 0x190   : > { %p2469_p11 = scmp.eq.s32.totalorder %s2466_s28, 0 }
 0x191   : > { %s3927_s29 = sshrl.u32 (!%p2469_p11), %s4148_s21, 6 }
 0x192   : > { %1815 = sbr.rel (%p2469_p11) target bundleno = 489 (0x1e9), region = 36  ;;  %p2470_p12 = scmp.le.s32.totalorder (!%p2469_p11), %s3927_s29, 0 }
 0x199   : > { %2253 = sbr.rel (%p2470_p12) target bundleno = 468 (0x1d4), region = 123  ;;  %s4138_s14 = smov (!%p2470_p12), %s3921_s26 }
 0x19a   : > { %s4139_s20 = smov (!%p2470_p12), %s3195_s9  ;;  %s3936_s27 = smov (!%p2470_p12), 0  }
 0x19b   : > { %s3938_s30 = smov (!%p2470_p12), 0  }
 0x1a0 LB: >> { %v1831_v45 = vld [vmem:[%s2871_s20] sm:$0xf]  ;;  %v1833_v39 = vld [vmem:[%s2871_s20 + $0x4] sm:$0xf]  ;;  %v1835_v42 = vld [vmem:[%s2871_s20 + $0x8] sm:$0xf]  ;;  %s2879_s30 = sphi %s3938_s30, %s1825_s30   ;;  %s2875_s27 = sphi %s3936_s27, %s4140_s27   ;;  %s2871_s20 = sphi %s4139_s20, %s1964_s20   ;;  %s2867_s14 = sphi %s4138_s14, %s1965_s14  }
 0x1a1   : >> { %1832 = vst [vmem:[%s2867_s14] sm:$0xf] %v1831_v45  ;;  %1834 = vst [vmem:[%s2867_s14 + $0x4] sm:$0xf] %v1833_v39  ;;  %v1837_v6 = vld [vmem:[%s2871_s20 + $0xc] sm:$0xf]  ;;  %s1959_s4 = sadd.s32 1, %s2875_s27 }
 0x1a2   : >> { %1836 = vst [vmem:[%s2867_s14 + $0x8] sm:$0xf] %v1835_v42  ;;  %v1839_v23 = vld [vmem:[%s2871_s20 + $0x10] sm:$0xf]  ;;  %v1841_v32 = vld [vmem:[%s2871_s20 + $0x14] sm:$0xf]  ;;  %p1960_p13 = scmp.ge.s32.totalorder %s1959_s4, %s3927_s29 }
 0x1a3   : >> { %1838 = vst [vmem:[%s2867_s14 + $0xc] sm:$0xf] %v1837_v6  ;;  %1840 = vst [vmem:[%s2867_s14 + $0x10] sm:$0xf] %v1839_v23  ;;  %v1843_v7 = vld [vmem:[%s2871_s20 + $0x18] sm:$0xf] }
 0x1a4   : >> { %1842 = vst [vmem:[%s2867_s14 + $0x14] sm:$0xf] %v1841_v32  ;;  %v1845_v0 = vld [vmem:[%s2871_s20 + $0x1c] sm:$0xf]  ;;  %v1847_v12 = vld [vmem:[%s2871_s20 + $0x20] sm:$0xf] }
 0x1a5   : >> { %1844 = vst [vmem:[%s2867_s14 + $0x18] sm:$0xf] %v1843_v7  ;;  %1846 = vst [vmem:[%s2867_s14 + $0x1c] sm:$0xf] %v1845_v0  ;;  %v1849_v27 = vld [vmem:[%s2871_s20 + $0x24] sm:$0xf] }
 0x1a6   : >> { %1848 = vst [vmem:[%s2867_s14 + $0x20] sm:$0xf] %v1847_v12  ;;  %v1851_v9 = vld [vmem:[%s2871_s20 + $0x28] sm:$0xf]  ;;  %v1853_v13 = vld [vmem:[%s2871_s20 + $0x2c] sm:$0xf] }
 0x1a7   : >> { %1850 = vst [vmem:[%s2867_s14 + $0x24] sm:$0xf] %v1849_v27  ;;  %1852 = vst [vmem:[%s2867_s14 + $0x28] sm:$0xf] %v1851_v9  ;;  %v1855_v54 = vld [vmem:[%s2871_s20 + $0x30] sm:$0xf] }
 0x1a8   : >> { %1854 = vst [vmem:[%s2867_s14 + $0x2c] sm:$0xf] %v1853_v13  ;;  %v1857_v1 = vld [vmem:[%s2871_s20 + $0x34] sm:$0xf]  ;;  %v1859_v46 = vld [vmem:[%s2871_s20 + $0x38] sm:$0xf] }
 0x1a9   : >> { %1856 = vst [vmem:[%s2867_s14 + $0x30] sm:$0xf] %v1855_v54  ;;  %1858 = vst [vmem:[%s2867_s14 + $0x34] sm:$0xf] %v1857_v1  ;;  %v1861_v50 = vld [vmem:[%s2871_s20 + $0x3c] sm:$0xf] }
 0x1aa   : >> { %1860 = vst [vmem:[%s2867_s14 + $0x38] sm:$0xf] %v1859_v46  ;;  %v1863_v49 = vld [vmem:[%s2871_s20 + $0x40] sm:$0xf]  ;;  %v1865_v4 = vld [vmem:[%s2871_s20 + $0x44] sm:$0xf] }
 0x1ab   : >> { %1862 = vst [vmem:[%s2867_s14 + $0x3c] sm:$0xf] %v1861_v50  ;;  %1864 = vst [vmem:[%s2867_s14 + $0x40] sm:$0xf] %v1863_v49  ;;  %v1867_v38 = vld [vmem:[%s2871_s20 + $0x48] sm:$0xf] }
 0x1ac   : >> { %1866 = vst [vmem:[%s2867_s14 + $0x44] sm:$0xf] %v1865_v4  ;;  %v1869_v52 = vld [vmem:[%s2871_s20 + $0x4c] sm:$0xf]  ;;  %v1871_v19 = vld [vmem:[%s2871_s20 + $0x50] sm:$0xf] }
 0x1ad   : >> { %1868 = vst [vmem:[%s2867_s14 + $0x48] sm:$0xf] %v1867_v38  ;;  %1870 = vst [vmem:[%s2867_s14 + $0x4c] sm:$0xf] %v1869_v52  ;;  %v1873_v58 = vld [vmem:[%s2871_s20 + $0x54] sm:$0xf] }
 0x1ae   : >> { %1872 = vst [vmem:[%s2867_s14 + $0x50] sm:$0xf] %v1871_v19  ;;  %v1875_v40 = vld [vmem:[%s2871_s20 + $0x58] sm:$0xf]  ;;  %v1877_v21 = vld [vmem:[%s2871_s20 + $0x5c] sm:$0xf] }
 0x1af   : >> { %1874 = vst [vmem:[%s2867_s14 + $0x54] sm:$0xf] %v1873_v58  ;;  %1876 = vst [vmem:[%s2867_s14 + $0x58] sm:$0xf] %v1875_v40  ;;  %v1879_v36 = vld [vmem:[%s2871_s20 + $0x60] sm:$0xf] }
 0x1b0   : >> { %1878 = vst [vmem:[%s2867_s14 + $0x5c] sm:$0xf] %v1877_v21  ;;  %v1881_v59 = vld [vmem:[%s2871_s20 + $0x64] sm:$0xf]  ;;  %v1883_v41 = vld [vmem:[%s2871_s20 + $0x68] sm:$0xf] }
 0x1b1   : >> { %1880 = vst [vmem:[%s2867_s14 + $0x60] sm:$0xf] %v1879_v36  ;;  %1882 = vst [vmem:[%s2867_s14 + $0x64] sm:$0xf] %v1881_v59  ;;  %v1885_v15 = vld [vmem:[%s2871_s20 + $0x6c] sm:$0xf] }
 0x1b2   : >> { %1884 = vst [vmem:[%s2867_s14 + $0x68] sm:$0xf] %v1883_v41  ;;  %v1887_v22 = vld [vmem:[%s2871_s20 + $0x70] sm:$0xf]  ;;  %v1889_v30 = vld [vmem:[%s2871_s20 + $0x74] sm:$0xf] }
 0x1b3   : >> { %1886 = vst [vmem:[%s2867_s14 + $0x6c] sm:$0xf] %v1885_v15  ;;  %1888 = vst [vmem:[%s2867_s14 + $0x70] sm:$0xf] %v1887_v22  ;;  %v1891_v31 = vld [vmem:[%s2871_s20 + $0x78] sm:$0xf] }
 0x1b4   : >> { %1890 = vst [vmem:[%s2867_s14 + $0x74] sm:$0xf] %v1889_v30  ;;  %v1893_v60 = vld [vmem:[%s2871_s20 + $0x7c] sm:$0xf]  ;;  %v1895_v14 = vld [vmem:[%s2871_s20 + $0x80] sm:$0xf] }
 0x1b5   : >> { %1892 = vst [vmem:[%s2867_s14 + $0x78] sm:$0xf] %v1891_v31  ;;  %1894 = vst [vmem:[%s2867_s14 + $0x7c] sm:$0xf] %v1893_v60  ;;  %v1897_v29 = vld [vmem:[%s2871_s20 + $0x84] sm:$0xf] }
 0x1b6   : >> { %1896 = vst [vmem:[%s2867_s14 + $0x80] sm:$0xf] %v1895_v14  ;;  %v1899_v35 = vld [vmem:[%s2871_s20 + $0x88] sm:$0xf]  ;;  %v1901_v47 = vld [vmem:[%s2871_s20 + $0x8c] sm:$0xf] }
 0x1b7   : >> { %1898 = vst [vmem:[%s2867_s14 + $0x84] sm:$0xf] %v1897_v29  ;;  %1900 = vst [vmem:[%s2867_s14 + $0x88] sm:$0xf] %v1899_v35  ;;  %v1903_v43 = vld [vmem:[%s2871_s20 + $0x90] sm:$0xf] }
 0x1b8   : >> { %1902 = vst [vmem:[%s2867_s14 + $0x8c] sm:$0xf] %v1901_v47  ;;  %v1905_v11 = vld [vmem:[%s2871_s20 + $0x94] sm:$0xf]  ;;  %v1907_v55 = vld [vmem:[%s2871_s20 + $0x98] sm:$0xf] }
 0x1b9   : >> { %1904 = vst [vmem:[%s2867_s14 + $0x90] sm:$0xf] %v1903_v43  ;;  %1906 = vst [vmem:[%s2867_s14 + $0x94] sm:$0xf] %v1905_v11  ;;  %v1909_v17 = vld [vmem:[%s2871_s20 + $0x9c] sm:$0xf] }
 0x1ba   : >> { %1908 = vst [vmem:[%s2867_s14 + $0x98] sm:$0xf] %v1907_v55  ;;  %v1911_v25 = vld [vmem:[%s2871_s20 + $0xa0] sm:$0xf]  ;;  %v1913_v44 = vld [vmem:[%s2871_s20 + $0xa4] sm:$0xf] }
 0x1bb   : >> { %1910 = vst [vmem:[%s2867_s14 + $0x9c] sm:$0xf] %v1909_v17  ;;  %1912 = vst [vmem:[%s2867_s14 + $0xa0] sm:$0xf] %v1911_v25  ;;  %v1915_v37 = vld [vmem:[%s2871_s20 + $0xa8] sm:$0xf] }
 0x1bc   : >> { %1914 = vst [vmem:[%s2867_s14 + $0xa4] sm:$0xf] %v1913_v44  ;;  %v1917_v26 = vld [vmem:[%s2871_s20 + $0xac] sm:$0xf]  ;;  %v1919_v16 = vld [vmem:[%s2871_s20 + $0xb0] sm:$0xf] }
 0x1bd   : >> { %1916 = vst [vmem:[%s2867_s14 + $0xa8] sm:$0xf] %v1915_v37  ;;  %1918 = vst [vmem:[%s2867_s14 + $0xac] sm:$0xf] %v1917_v26  ;;  %v1921_v2 = vld [vmem:[%s2871_s20 + $0xb4] sm:$0xf] }
 0x1be   : >> { %1920 = vst [vmem:[%s2867_s14 + $0xb0] sm:$0xf] %v1919_v16  ;;  %v1923_v63 = vld [vmem:[%s2871_s20 + $0xb8] sm:$0xf]  ;;  %v1925_v62 = vld [vmem:[%s2871_s20 + $0xbc] sm:$0xf] }
 0x1bf   : >> { %1922 = vst [vmem:[%s2867_s14 + $0xb4] sm:$0xf] %v1921_v2  ;;  %1924 = vst [vmem:[%s2867_s14 + $0xb8] sm:$0xf] %v1923_v63  ;;  %v1927_v3 = vld [vmem:[%s2871_s20 + $0xc0] sm:$0xf] }
 0x1c0   : >> { %1926 = vst [vmem:[%s2867_s14 + $0xbc] sm:$0xf] %v1925_v62  ;;  %v1929_v53 = vld [vmem:[%s2871_s20 + $0xc4] sm:$0xf]  ;;  %v1931_v34 = vld [vmem:[%s2871_s20 + $0xc8] sm:$0xf] }
 0x1c1   : >> { %1928 = vst [vmem:[%s2867_s14 + $0xc0] sm:$0xf] %v1927_v3  ;;  %1930 = vst [vmem:[%s2867_s14 + $0xc4] sm:$0xf] %v1929_v53  ;;  %v1933_v51 = vld [vmem:[%s2871_s20 + $0xcc] sm:$0xf] }
 0x1c2   : >> { %1932 = vst [vmem:[%s2867_s14 + $0xc8] sm:$0xf] %v1931_v34  ;;  %v1935_v18 = vld [vmem:[%s2871_s20 + $0xd0] sm:$0xf]  ;;  %v1937_v20 = vld [vmem:[%s2871_s20 + $0xd4] sm:$0xf] }
 0x1c3   : >> { %1934 = vst [vmem:[%s2867_s14 + $0xcc] sm:$0xf] %v1933_v51  ;;  %1936 = vst [vmem:[%s2867_s14 + $0xd0] sm:$0xf] %v1935_v18  ;;  %v1939_v28 = vld [vmem:[%s2871_s20 + $0xd8] sm:$0xf] }
 0x1c4   : >> { %1938 = vst [vmem:[%s2867_s14 + $0xd4] sm:$0xf] %v1937_v20  ;;  %v1941_v10 = vld [vmem:[%s2871_s20 + $0xdc] sm:$0xf]  ;;  %v1943_v61 = vld [vmem:[%s2871_s20 + $0xe0] sm:$0xf] }
 0x1c5   : >> { %1940 = vst [vmem:[%s2867_s14 + $0xd8] sm:$0xf] %v1939_v28  ;;  %1942 = vst [vmem:[%s2867_s14 + $0xdc] sm:$0xf] %v1941_v10  ;;  %v1945_v24 = vld [vmem:[%s2871_s20 + $0xe4] sm:$0xf] }
 0x1c6   : >> { %1944 = vst [vmem:[%s2867_s14 + $0xe0] sm:$0xf] %v1943_v61  ;;  %v1947_v5 = vld [vmem:[%s2871_s20 + $0xe8] sm:$0xf]  ;;  %v1949_v33 = vld [vmem:[%s2871_s20 + $0xec] sm:$0xf] }
 0x1c7   : >> { %1946 = vst [vmem:[%s2867_s14 + $0xe4] sm:$0xf] %v1945_v24  ;;  %1948 = vst [vmem:[%s2867_s14 + $0xe8] sm:$0xf] %v1947_v5  ;;  %v1951_v57 = vld [vmem:[%s2871_s20 + $0xf0] sm:$0xf] }
 0x1c8   : >> { %1950 = vst [vmem:[%s2867_s14 + $0xec] sm:$0xf] %v1949_v33  ;;  %v1953_v56 = vld [vmem:[%s2871_s20 + $0xf4] sm:$0xf]  ;;  %v1955_v48 = vld [vmem:[%s2871_s20 + $0xf8] sm:$0xf] }
 0x1c9   : >> { %1952 = vst [vmem:[%s2867_s14 + $0xf0] sm:$0xf] %v1951_v57  ;;  %1954 = vst [vmem:[%s2867_s14 + $0xf4] sm:$0xf] %v1953_v56  ;;  %v1957_v8 = vld [vmem:[%s2871_s20 + $0xfc] sm:$0xf] }
 0x1ca   : >> { %1956 = vst [vmem:[%s2867_s14 + $0xf8] sm:$0xf] %v1955_v48  ;;  %1958 = vst [vmem:[%s2867_s14 + $0xfc] sm:$0xf] %v1957_v8  ;;  %s4150_s4 = smov (%p1960_p13, %s1959_s4), 0  ;;  %s1825_s30 = sadd.s32 1, %s2879_s30  }
 0x1cb   : >> { %s2471_s5 = sshll.u32 %s4150_s4, 8  ;;  %p1824_p0 = scmp.ge.s32.totalorder %s1825_s30, %s3927_s29 }
 0x1cc   : >> { %s1964_s20 = scalar_lea.vmem %s3195_s9, %s2471_s5 [#allocation2]   ;;  %s1965_s14 = scalar_lea.vmem %s3921_s26, %s2471_s5  }
 0x1cd   : >> { %s4140_s27 = smov %s4150_s4  ;;  %1827 = sbr.rel (!%p1824_p0) target bundleno = 416 (0x1a0), region = 129 }
 0x1d4 PF: > { %s4095_s6 = sand.u32 63, %s4148_s21   ;;  %s2546_s7 = sshll.u32 %s3927_s29, 8 }
 0x1d5   : > { %s1970_s8 = scalar_lea.vmem %s3195_s9, %s2546_s7 [#allocation2]   ;;  %s1972_s10 = scalar_lea.vmem %s3921_s26, %s2546_s7  }
 0x1d6   : > { %p2476_p1 = scmp.le.s32.totalorder %s4095_s6, 0 }
 0x1d7   : > { %s2881_s11 = smov (!%p2476_p1), %s1972_s10   ;;  %s2885_s12 = smov (!%p2476_p1), %s1970_s8  }
 0x1d8   : > { %2267 = sbr.rel (%p2476_p1) target bundleno = 489 (0x1e9), region = 134  ;;  %s2889_s17 = smov (!%p2476_p1), 0  }
 0x1d9   : > { %s2893_s19 = smov (!%p2476_p1), 0  }
 0x1df LB: >> { %v1982_v45 = vld [vmem:[%s2887_s12] sm:$0xf]  ;;  %s1984_s21 = sadd.s32 1, %s2891_s17  ;;  %s1976_s19 = sadd.s32 1, %s2895_s19   ;;  %s2895_s19 = sphi %s2893_s19, %s1976_s19   ;;  %s2891_s17 = sphi %s2889_s17, %s2890_s17   ;;  %s2887_s12 = sphi %s2885_s12, %s1989_s12   ;;  %s2883_s11 = sphi %s2881_s11, %s1990_s11  }
 0x1e0   : >> { %1983 = vst [vmem:[%s2883_s11] sm:$0xf] %v1982_v45  ;;  %p1985_p2 = scmp.ge.s32.totalorder %s1984_s21, %s4095_s6  ;;  %p1975_p3 = scmp.ge.s32.totalorder %s1976_s19, %s4095_s6 }
 0x1e2   : >> { %s4152_s21 = smov (%p1985_p2, %s1984_s21), 0  ;;  %1978 = sbr.rel (!%p1975_p3) target bundleno = 479 (0x1df), region = 140 }
 0x1e3   : >> { %s2477_s9 = sshll.u32 %s4152_s21, 2  ;;  %s2890_s17 = smov %s4152_s21  }
 0x1e4   : >> { %s1989_s12 = scalar_lea.vmem %s1970_s8, %s2477_s9 [#allocation2]   ;;  %s1990_s11 = scalar_lea.vmem %s1972_s10, %s2477_s9  }
 0x1e9 PF: > { %s14_s16 = sadd.s32 1, %s2863_s16   ;;  %s4141_s12 = smov %s2851_s13 }
 0x1ea   : > { %p11_p4 = scmp.ge.s32.totalorder %s14_s16, 89   ;;  %s4142_s13 = smov %s2959_s22 }
 0x1eb   : > { %s4143_s14 = smov %s2859_s15  ;;  %s4144_s15 = smov %s4146_s18 }
 0x1ec   :  { %13 = sbr.rel (!%p11_p4) target bundleno = 3 (0x3), region = 151 }

// kernel: conv_bn_relu.3
= control target key start
LH: loop header
LB: loop body
LE: loop exit
PB: predicated region body
PF: predicated region fallthrough
CT: control target
= control target key end

     0   :  { %s2755_s12 = smov 0   ;;  %s2757_s13 = smov 0   ;;  %s3595_s0 = inlined_call_operand.vmem [shape: bf16[44402,32], index: 0, kind: input, shape index: {}]   ;;  %s3596_s1 = inlined_call_operand.vmem [shape: f32[1,32], index: 1, kind: input, shape index: {}]   ;;  %s3597_s2 = inlined_call_operand.vmem [shape: f32[1,32], index: 2, kind: input, shape index: {}]   ;;  %s3598_s3 = inlined_call_operand.vmem [shape: bf16[44402,32], index: 3, kind: output, shape index: {}]  }
   0x1   :  { %s2759_s14 = smov 0  }
   0x2 LB: > { %s2768_s15 = sadd.s32 4294967295, %s2701_s14   ;;  %s2770_s16 = sadd.s32 1, %s2701_s14   ;;  %s2701_s14 = sphi %s2759_s14, %s3605_s14   ;;  %s2697_s13 = sphi %s2757_s13, %s3604_s13   ;;  %s2693_s12 = sphi %s2755_s12, %s3603_s12  }
   0x3   : > { %s85_s17 = ssub.s32 %s2701_s14, %s2770_s16  ;;  %s88_s18 = sadd.s32 1, %s2697_s13 }
   0x4   : > { %p86_p0 = scmp.eq.s32.totalorder %s85_s17, 0  ;;  %p98_p1 = scmp.ne.s32.totalorder %s2697_s13, %s2693_s12 }
   0x5   : > { %p99_p2 = scmp.eq.s32.totalorder %s2768_s15, 43  ;;  %p1956_p3 = scmp.ge.s32.totalorder %s2701_s14, 1 }
   0x6   : > { %s2778_s19 = scalar_select %p86_p0, %s2697_s13, %s88_s18  }
   0x7   : > { %p2780_p4 = por %p99_p2, %p98_p1  ;;  %p146_p5 = scmp.lt.s32.totalorder %s2701_s14, 45 }
   0x9   : > { %p147_p6 = pnand %p1956_p3, %p146_p5 }
   0xa   : > { %s2785_s21 = sshll.u32 (!%p147_p6), %s2768_s15, 7  ;;  %v2797_v0 = vld [vmem:[%s3596_s1] ss:$0 sm:$0xff] (!%p147_p6)  ;;  %vm1358_vm0 = vcmask (!%p147_p6), 257024   ;;  %s170_s29 = sand.u32 (!%p147_p6), 1, %s2693_s12  }
   0xb   : > { %150 = sbr.rel (%p147_p6) target bundleno = 278 (0x116), region = 32  ;;  %p178_p7 = scmp.lt.s32.totalorder (!%p147_p6), %s2785_s21, 5550  ;;  %v2807_v9 = vld [vmem:[%s3597_s2] ss:$0 sm:$0xff] (!%p147_p6) }
   0xc   : > { %s2813_s5 = sshll.u32 (!%p147_p6), %s170_s29, 9 }
   0xd   : > { %s2832_s6 = scalar_lea.vmem (!%p147_p6), [#allocation2], %s2813_s5  }
  0x12   : > { %s179_s22 = scalar_select %p178_p7, %s2785_s21, 5550 }
  0x13   : > { %s1495_s11 = ssub.s32 (%p2780_p4), 5551, %s2785_s21  ;;  %s2235_s12 = sshll.u32 (%p2780_p4), %s2768_s15, 9 }
  0x14   : > { %s1959_s23 = sshll.u32 %s179_s22, 2  ;;  %p1496_p8 = scmp.lt.s32.totalorder (%p2780_p4), %s1495_s11, 128 }
  0x15   : > { %s2792_s26 = scalar_lea.vmem %s3595_s0, %s1959_s23  ;;  %s3403_s18 = scalar_lea.vmem (%p2780_p4), %s3598_s3, %s2235_s12  }
  0x16   : > { %v2239_v1 = vld [vmem:[%s2792_s26] sm:$0xff]   ;;  %v2494_v2 = vld [vmem:[%s2792_s26 + $0x8] sm:$0xff]   ;;  %v2495_v3 = vld [vmem:[%s2792_s26 + $0x10] sm:$0xff]  }
  0x17   : > { %v2240_v4 = vunpack.c.l.bf16 %v2239_v1  ;;  %v2241_v5 = vunpack.c.h.bf16 %v2239_v1  ;;  %v2244_v6 = vunpack.c.l.bf16 %v2494_v2  ;;  %v2245_v7 = vunpack.c.h.bf16 %v2494_v2  ;;  %v2496_v8 = vld [vmem:[%s2792_s26 + $0x18] sm:$0xff]   ;;  %v2497_v38 = vld [vmem:[%s2792_s26 + $0x20] sm:$0xff]   ;;  %v2498_v39 = vld [vmem:[%s2792_s26 + $0x28] sm:$0xff]  }
  0x18   : > { %v2248_v10 = vunpack.c.l.bf16 %v2495_v3  ;;  %v2249_v11 = vunpack.c.h.bf16 %v2495_v3  ;;  %v2252_v12 = vunpack.c.l.bf16 %v2496_v8  ;;  %v2253_v13 = vunpack.c.h.bf16 %v2496_v8  ;;  %v2499_v44 = vld [vmem:[%s2792_s26 + $0x30] sm:$0xff]   ;;  %v2500_v45 = vld [vmem:[%s2792_s26 + $0x38] sm:$0xff]  }
  0x19   : > { %v455_v14 = vmul.f32 %v2240_v4, %v2797_v0  ;;  %v456_v15 = vmul.f32 %v2241_v5, %v2797_v0  ;;  %v457_v16 = vmul.f32 %v2244_v6, %v2797_v0  ;;  %v458_v17 = vmul.f32 %v2245_v7, %v2797_v0 }
  0x1a   : > { %v459_v18 = vmul.f32 %v2248_v10, %v2797_v0  ;;  %v460_v19 = vmul.f32 %v2249_v11, %v2797_v0  ;;  %v461_v20 = vmul.f32 %v2252_v12, %v2797_v0  ;;  %v462_v21 = vmul.f32 %v2253_v13, %v2797_v0 }
  0x1b   : > { %v590_v22 = vadd.f32 %v2807_v9, %v455_v14  ;;  %v591_v23 = vadd.f32 %v2807_v9, %v456_v15  ;;  %v592_v24 = vadd.f32 %v2807_v9, %v457_v16  ;;  %v593_v25 = vadd.f32 %v2807_v9, %v458_v17 }
  0x1c   : > { %v594_v26 = vadd.f32 %v2807_v9, %v459_v18  ;;  %v595_v27 = vadd.f32 %v2807_v9, %v460_v19  ;;  %v596_v28 = vadd.f32 %v2807_v9, %v461_v20  ;;  %v597_v29 = vadd.f32 %v2807_v9, %v462_v21  ;;  %v2501_v20 = vld [vmem:[%s2792_s26 + $0x40] sm:$0xff]   ;;  %v2502_v21 = vld [vmem:[%s2792_s26 + $0x48] sm:$0xff]  }
  0x1d   : > { %v718_v30 = vmax.f32 %v590_v22, 0.0  ;;  %v719_v31 = vmax.f32 %v591_v23, 0.0  ;;  %v720_v32 = vmax.f32 %v592_v24, 0.0  ;;  %v721_v33 = vmax.f32 %v593_v25, 0.0 }
  0x1e   : > { %v722_v34 = vmax.f32 %v594_v26, 0.0  ;;  %v723_v35 = vmax.f32 %v595_v27, 0.0  ;;  %v724_v36 = vmax.f32 %v596_v28, 0.0  ;;  %v725_v37 = vmax.f32 %v597_v29, 0.0  ;;  %v2503_v26 = vld [vmem:[%s2792_s26 + $0x50] sm:$0xff]   ;;  %v2504_v27 = vld [vmem:[%s2792_s26 + $0x58] sm:$0xff]  }
  0x1f   : > { %v2107_v40 = vpack.c.bf16 %v718_v30, %v718_v30  ;;  %v2108_v41 = vpack.c.bf16 %v719_v31, %v719_v31  ;;  %v2109_v42 = vpack.c.bf16 %v720_v32, %v720_v32  ;;  %v2110_v43 = vpack.c.bf16 %v721_v33, %v721_v33 }
  0x20   : > { %v2111_v46 = vpack.c.bf16 %v722_v34, %v722_v34  ;;  %v2112_v47 = vpack.c.bf16 %v723_v35, %v723_v35  ;;  %v2113_v48 = vpack.c.bf16 %v724_v36, %v724_v36  ;;  %v2114_v49 = vpack.c.bf16 %v725_v37, %v725_v37 }
  0x21   : > { %1359 = vst.msk [vmem:[%s2832_s6] sm:$0xf] %vm1358_vm0, %v2107_v40  ;;  %1360 = vst.msk [vmem:[%s2832_s6 + $0x4] sm:$0xf] %vm1358_vm0, %v2108_v41  ;;  %v2256_v50 = vunpack.c.l.bf16 %v2497_v38  ;;  %v2257_v51 = vunpack.c.h.bf16 %v2497_v38  ;;  %v2260_v52 = vunpack.c.l.bf16 %v2498_v39  ;;  %v2261_v53 = vunpack.c.h.bf16 %v2498_v39 }
  0x22   : > { %1361 = vst.msk [vmem:[%s2832_s6 + $0x8] sm:$0xf] %vm1358_vm0, %v2109_v42  ;;  %1362 = vst.msk [vmem:[%s2832_s6 + $0xc] sm:$0xf] %vm1358_vm0, %v2110_v43  ;;  %v2264_v54 = vunpack.c.l.bf16 %v2499_v44  ;;  %v2265_v55 = vunpack.c.h.bf16 %v2499_v44  ;;  %v2268_v56 = vunpack.c.l.bf16 %v2500_v45  ;;  %v2269_v57 = vunpack.c.h.bf16 %v2500_v45 }
  0x23   : > { %1363 = vst.msk [vmem:[%s2832_s6 + $0x10] sm:$0xf] %vm1358_vm0, %v2111_v46  ;;  %1364 = vst.msk [vmem:[%s2832_s6 + $0x14] sm:$0xf] %vm1358_vm0, %v2112_v47  ;;  %v463_v58 = vmul.f32 %v2256_v50, %v2797_v0  ;;  %v464_v59 = vmul.f32 %v2257_v51, %v2797_v0  ;;  %v465_v60 = vmul.f32 %v2260_v52, %v2797_v0  ;;  %v2272_v32 = vunpack.c.l.bf16 %v2501_v20 }
  0x24   : > { %1365 = vst.msk [vmem:[%s2832_s6 + $0x18] sm:$0xf] %vm1358_vm0, %v2113_v48  ;;  %1366 = vst.msk [vmem:[%s2832_s6 + $0x1c] sm:$0xf] %vm1358_vm0, %v2114_v49  ;;  %v466_v61 = vmul.f32 %v2261_v53, %v2797_v0  ;;  %v467_v62 = vmul.f32 %v2264_v54, %v2797_v0  ;;  %v468_v63 = vmul.f32 %v2265_v55, %v2797_v0  ;;  %v2273_v33 = vunpack.c.h.bf16 %v2501_v20 }
  0x25   : > { %v469_v1 = vmul.f32 %v2268_v56, %v2797_v0  ;;  %v470_v2 = vmul.f32 %v2269_v57, %v2797_v0  ;;  %v598_v3 = vadd.f32 %v2807_v9, %v463_v58  ;;  %v599_v4 = vadd.f32 %v2807_v9, %v464_v59 }
  0x26   : > { %v600_v5 = vadd.f32 %v2807_v9, %v465_v60  ;;  %v601_v6 = vadd.f32 %v2807_v9, %v466_v61  ;;  %v602_v7 = vadd.f32 %v2807_v9, %v467_v62  ;;  %v603_v8 = vadd.f32 %v2807_v9, %v468_v63 }
  0x27   : > { %v604_v10 = vadd.f32 %v2807_v9, %v469_v1  ;;  %v605_v11 = vadd.f32 %v2807_v9, %v470_v2  ;;  %v726_v12 = vmax.f32 %v598_v3, 0.0  ;;  %v727_v13 = vmax.f32 %v599_v4, 0.0  ;;  %v2505_v1 = vld [vmem:[%s2792_s26 + $0x60] sm:$0xff]   ;;  %v2506_v2 = vld [vmem:[%s2792_s26 + $0x68] sm:$0xff]  }
  0x28   : > { %v728_v14 = vmax.f32 %v600_v5, 0.0  ;;  %v729_v15 = vmax.f32 %v601_v6, 0.0  ;;  %v730_v16 = vmax.f32 %v602_v7, 0.0  ;;  %v731_v17 = vmax.f32 %v603_v8, 0.0  ;;  %v2507_v7 = vld [vmem:[%s2792_s26 + $0x70] sm:$0xff]   ;;  %v2508_v8 = vld [vmem:[%s2792_s26 + $0x78] sm:$0xff]  }
  0x29   : > { %v732_v18 = vmax.f32 %v604_v10, 0.0  ;;  %v733_v19 = vmax.f32 %v605_v11, 0.0  ;;  %v2115_v22 = vpack.c.bf16 %v726_v12, %v726_v12  ;;  %v2116_v23 = vpack.c.bf16 %v727_v13, %v727_v13 }
  0x2a   : > { %v2117_v24 = vpack.c.bf16 %v728_v14, %v728_v14  ;;  %v2118_v25 = vpack.c.bf16 %v729_v15, %v729_v15  ;;  %v2119_v28 = vpack.c.bf16 %v730_v16, %v730_v16  ;;  %v2120_v29 = vpack.c.bf16 %v731_v17, %v731_v17 }
  0x2b   : > { %v2121_v30 = vpack.c.bf16 %v732_v18, %v732_v18  ;;  %v2122_v31 = vpack.c.bf16 %v733_v19, %v733_v19  ;;  %1367 = vst.msk [vmem:[%s2832_s6 + $0x20] sm:$0xf] %vm1358_vm0, %v2115_v22  ;;  %1368 = vst.msk [vmem:[%s2832_s6 + $0x24] sm:$0xf] %vm1358_vm0, %v2116_v23  ;;  %v2276_v34 = vunpack.c.l.bf16 %v2502_v21  ;;  %v2277_v35 = vunpack.c.h.bf16 %v2502_v21 }
  0x2c   : > { %1369 = vst.msk [vmem:[%s2832_s6 + $0x28] sm:$0xf] %vm1358_vm0, %v2117_v24  ;;  %1370 = vst.msk [vmem:[%s2832_s6 + $0x2c] sm:$0xf] %vm1358_vm0, %v2118_v25  ;;  %v2280_v36 = vunpack.c.l.bf16 %v2503_v26  ;;  %v2281_v37 = vunpack.c.h.bf16 %v2503_v26  ;;  %v2284_v38 = vunpack.c.l.bf16 %v2504_v27  ;;  %v2285_v39 = vunpack.c.h.bf16 %v2504_v27 }
  0x2d   : > { %1371 = vst.msk [vmem:[%s2832_s6 + $0x30] sm:$0xf] %vm1358_vm0, %v2119_v28  ;;  %1372 = vst.msk [vmem:[%s2832_s6 + $0x34] sm:$0xf] %vm1358_vm0, %v2120_v29  ;;  %v471_v40 = vmul.f32 %v2272_v32, %v2797_v0  ;;  %v472_v41 = vmul.f32 %v2273_v33, %v2797_v0  ;;  %v473_v42 = vmul.f32 %v2276_v34, %v2797_v0  ;;  %v2288_v14 = vunpack.c.l.bf16 %v2505_v1 }
  0x2e   : > { %1373 = vst.msk [vmem:[%s2832_s6 + $0x38] sm:$0xf] %vm1358_vm0, %v2121_v30  ;;  %1374 = vst.msk [vmem:[%s2832_s6 + $0x3c] sm:$0xf] %vm1358_vm0, %v2122_v31  ;;  %v474_v43 = vmul.f32 %v2277_v35, %v2797_v0  ;;  %v475_v44 = vmul.f32 %v2280_v36, %v2797_v0  ;;  %v476_v45 = vmul.f32 %v2281_v37, %v2797_v0  ;;  %v2289_v15 = vunpack.c.h.bf16 %v2505_v1 }
  0x2f   : > { %v477_v46 = vmul.f32 %v2284_v38, %v2797_v0  ;;  %v478_v47 = vmul.f32 %v2285_v39, %v2797_v0  ;;  %v606_v48 = vadd.f32 %v2807_v9, %v471_v40  ;;  %v607_v49 = vadd.f32 %v2807_v9, %v472_v41 }
  0x30   : > { %v608_v50 = vadd.f32 %v2807_v9, %v473_v42  ;;  %v609_v51 = vadd.f32 %v2807_v9, %v474_v43  ;;  %v610_v52 = vadd.f32 %v2807_v9, %v475_v44  ;;  %v611_v53 = vadd.f32 %v2807_v9, %v476_v45 }
  0x31   : > { %v612_v54 = vadd.f32 %v2807_v9, %v477_v46  ;;  %v613_v55 = vadd.f32 %v2807_v9, %v478_v47  ;;  %v734_v56 = vmax.f32 %v606_v48, 0.0  ;;  %v735_v57 = vmax.f32 %v607_v49, 0.0  ;;  %v2509_v46 = vld [vmem:[%s2792_s26 + $0x80] sm:$0xff]   ;;  %v2510_v47 = vld [vmem:[%s2792_s26 + $0x88] sm:$0xff]  }
  0x32   : > { %v736_v58 = vmax.f32 %v608_v50, 0.0  ;;  %v737_v59 = vmax.f32 %v609_v51, 0.0  ;;  %v738_v60 = vmax.f32 %v610_v52, 0.0  ;;  %v739_v61 = vmax.f32 %v611_v53, 0.0  ;;  %v2511_v52 = vld [vmem:[%s2792_s26 + $0x90] sm:$0xff]   ;;  %v2512_v53 = vld [vmem:[%s2792_s26 + $0x98] sm:$0xff]  }
  0x33   : > { %v740_v62 = vmax.f32 %v612_v54, 0.0  ;;  %v741_v63 = vmax.f32 %v613_v55, 0.0  ;;  %v2123_v3 = vpack.c.bf16 %v734_v56, %v734_v56  ;;  %v2124_v4 = vpack.c.bf16 %v735_v57, %v735_v57 }
  0x34   : > { %v2125_v5 = vpack.c.bf16 %v736_v58, %v736_v58  ;;  %v2126_v6 = vpack.c.bf16 %v737_v59, %v737_v59  ;;  %v2127_v10 = vpack.c.bf16 %v738_v60, %v738_v60  ;;  %v2128_v11 = vpack.c.bf16 %v739_v61, %v739_v61 }
  0x35   : > { %v2129_v12 = vpack.c.bf16 %v740_v62, %v740_v62  ;;  %v2130_v13 = vpack.c.bf16 %v741_v63, %v741_v63  ;;  %1375 = vst.msk [vmem:[%s2832_s6 + $0x40] sm:$0xf] %vm1358_vm0, %v2123_v3  ;;  %1376 = vst.msk [vmem:[%s2832_s6 + $0x44] sm:$0xf] %vm1358_vm0, %v2124_v4  ;;  %v2292_v16 = vunpack.c.l.bf16 %v2506_v2  ;;  %v2293_v17 = vunpack.c.h.bf16 %v2506_v2 }
  0x36   : > { %1377 = vst.msk [vmem:[%s2832_s6 + $0x48] sm:$0xf] %vm1358_vm0, %v2125_v5  ;;  %1378 = vst.msk [vmem:[%s2832_s6 + $0x4c] sm:$0xf] %vm1358_vm0, %v2126_v6  ;;  %v2296_v18 = vunpack.c.l.bf16 %v2507_v7  ;;  %v2297_v19 = vunpack.c.h.bf16 %v2507_v7  ;;  %v2300_v20 = vunpack.c.l.bf16 %v2508_v8  ;;  %v2301_v21 = vunpack.c.h.bf16 %v2508_v8 }
  0x37   : > { %1379 = vst.msk [vmem:[%s2832_s6 + $0x50] sm:$0xf] %vm1358_vm0, %v2127_v10  ;;  %1380 = vst.msk [vmem:[%s2832_s6 + $0x54] sm:$0xf] %vm1358_vm0, %v2128_v11  ;;  %v479_v22 = vmul.f32 %v2288_v14, %v2797_v0  ;;  %v480_v23 = vmul.f32 %v2289_v15, %v2797_v0  ;;  %v481_v24 = vmul.f32 %v2292_v16, %v2797_v0  ;;  %v2304_v58 = vunpack.c.l.bf16 %v2509_v46 }
  0x38   : > { %1381 = vst.msk [vmem:[%s2832_s6 + $0x58] sm:$0xf] %vm1358_vm0, %v2129_v12  ;;  %1382 = vst.msk [vmem:[%s2832_s6 + $0x5c] sm:$0xf] %vm1358_vm0, %v2130_v13  ;;  %v482_v25 = vmul.f32 %v2293_v17, %v2797_v0  ;;  %v483_v26 = vmul.f32 %v2296_v18, %v2797_v0  ;;  %v484_v27 = vmul.f32 %v2297_v19, %v2797_v0  ;;  %v2305_v59 = vunpack.c.h.bf16 %v2509_v46 }
  0x39   : > { %v485_v28 = vmul.f32 %v2300_v20, %v2797_v0  ;;  %v486_v29 = vmul.f32 %v2301_v21, %v2797_v0  ;;  %v614_v30 = vadd.f32 %v2807_v9, %v479_v22  ;;  %v615_v31 = vadd.f32 %v2807_v9, %v480_v23 }
  0x3a   : > { %v616_v32 = vadd.f32 %v2807_v9, %v481_v24  ;;  %v617_v33 = vadd.f32 %v2807_v9, %v482_v25  ;;  %v618_v34 = vadd.f32 %v2807_v9, %v483_v26  ;;  %v619_v35 = vadd.f32 %v2807_v9, %v484_v27 }
  0x3b   : > { %v620_v36 = vadd.f32 %v2807_v9, %v485_v28  ;;  %v621_v37 = vadd.f32 %v2807_v9, %v486_v29  ;;  %v742_v38 = vmax.f32 %v614_v30, 0.0  ;;  %v743_v39 = vmax.f32 %v615_v31, 0.0  ;;  %v2513_v28 = vld [vmem:[%s2792_s26 + $0xa0] sm:$0xff]   ;;  %v2514_v29 = vld [vmem:[%s2792_s26 + $0xa8] sm:$0xff]  }
  0x3c   : > { %v744_v40 = vmax.f32 %v616_v32, 0.0  ;;  %v745_v41 = vmax.f32 %v617_v33, 0.0  ;;  %v746_v42 = vmax.f32 %v618_v34, 0.0  ;;  %v747_v43 = vmax.f32 %v619_v35, 0.0  ;;  %v2515_v34 = vld [vmem:[%s2792_s26 + $0xb0] sm:$0xff]   ;;  %v2516_v35 = vld [vmem:[%s2792_s26 + $0xb8] sm:$0xff]  }
  0x3d   : > { %v748_v44 = vmax.f32 %v620_v36, 0.0  ;;  %v749_v45 = vmax.f32 %v621_v37, 0.0  ;;  %v2131_v48 = vpack.c.bf16 %v742_v38, %v742_v38  ;;  %v2132_v49 = vpack.c.bf16 %v743_v39, %v743_v39 }
  0x3e   : > { %v2133_v50 = vpack.c.bf16 %v744_v40, %v744_v40  ;;  %v2134_v51 = vpack.c.bf16 %v745_v41, %v745_v41  ;;  %v2135_v54 = vpack.c.bf16 %v746_v42, %v746_v42  ;;  %v2136_v55 = vpack.c.bf16 %v747_v43, %v747_v43 }
  0x3f   : > { %v2137_v56 = vpack.c.bf16 %v748_v44, %v748_v44  ;;  %v2138_v57 = vpack.c.bf16 %v749_v45, %v749_v45  ;;  %1383 = vst.msk [vmem:[%s2832_s6 + $0x60] sm:$0xf] %vm1358_vm0, %v2131_v48  ;;  %1384 = vst.msk [vmem:[%s2832_s6 + $0x64] sm:$0xf] %vm1358_vm0, %v2132_v49  ;;  %v2308_v60 = vunpack.c.l.bf16 %v2510_v47  ;;  %v2309_v61 = vunpack.c.h.bf16 %v2510_v47 }
  0x40   : > { %1385 = vst.msk [vmem:[%s2832_s6 + $0x68] sm:$0xf] %vm1358_vm0, %v2133_v50  ;;  %1386 = vst.msk [vmem:[%s2832_s6 + $0x6c] sm:$0xf] %vm1358_vm0, %v2134_v51  ;;  %v2312_v62 = vunpack.c.l.bf16 %v2511_v52  ;;  %v2313_v63 = vunpack.c.h.bf16 %v2511_v52  ;;  %v2316_v1 = vunpack.c.l.bf16 %v2512_v53  ;;  %v2317_v2 = vunpack.c.h.bf16 %v2512_v53 }
  0x41   : > { %1387 = vst.msk [vmem:[%s2832_s6 + $0x70] sm:$0xf] %vm1358_vm0, %v2135_v54  ;;  %1388 = vst.msk [vmem:[%s2832_s6 + $0x74] sm:$0xf] %vm1358_vm0, %v2136_v55  ;;  %v487_v3 = vmul.f32 %v2304_v58, %v2797_v0  ;;  %v488_v4 = vmul.f32 %v2305_v59, %v2797_v0  ;;  %v489_v5 = vmul.f32 %v2308_v60, %v2797_v0  ;;  %v2320_v40 = vunpack.c.l.bf16 %v2513_v28 }
  0x42   : > { %1389 = vst.msk [vmem:[%s2832_s6 + $0x78] sm:$0xf] %vm1358_vm0, %v2137_v56  ;;  %1390 = vst.msk [vmem:[%s2832_s6 + $0x7c] sm:$0xf] %vm1358_vm0, %v2138_v57  ;;  %v490_v6 = vmul.f32 %v2309_v61, %v2797_v0  ;;  %v491_v7 = vmul.f32 %v2312_v62, %v2797_v0  ;;  %v492_v8 = vmul.f32 %v2313_v63, %v2797_v0  ;;  %v2321_v41 = vunpack.c.h.bf16 %v2513_v28 }
  0x43   : > { %v493_v10 = vmul.f32 %v2316_v1, %v2797_v0  ;;  %v494_v11 = vmul.f32 %v2317_v2, %v2797_v0  ;;  %v622_v12 = vadd.f32 %v2807_v9, %v487_v3  ;;  %v623_v13 = vadd.f32 %v2807_v9, %v488_v4 }
  0x44   : > { %v624_v14 = vadd.f32 %v2807_v9, %v489_v5  ;;  %v625_v15 = vadd.f32 %v2807_v9, %v490_v6  ;;  %v626_v16 = vadd.f32 %v2807_v9, %v491_v7  ;;  %v627_v17 = vadd.f32 %v2807_v9, %v492_v8 }
  0x45   : > { %v628_v18 = vadd.f32 %v2807_v9, %v493_v10  ;;  %v629_v19 = vadd.f32 %v2807_v9, %v494_v11  ;;  %v750_v20 = vmax.f32 %v622_v12, 0.0  ;;  %v751_v21 = vmax.f32 %v623_v13, 0.0  ;;  %v2517_v10 = vld [vmem:[%s2792_s26 + $0xc0] sm:$0xff]   ;;  %v2518_v11 = vld [vmem:[%s2792_s26 + $0xc8] sm:$0xff]  }
  0x46   : > { %v752_v22 = vmax.f32 %v624_v14, 0.0  ;;  %v753_v23 = vmax.f32 %v625_v15, 0.0  ;;  %v754_v24 = vmax.f32 %v626_v16, 0.0  ;;  %v755_v25 = vmax.f32 %v627_v17, 0.0  ;;  %v2519_v16 = vld [vmem:[%s2792_s26 + $0xd0] sm:$0xff]   ;;  %v2520_v17 = vld [vmem:[%s2792_s26 + $0xd8] sm:$0xff]  }
  0x47   : > { %v756_v26 = vmax.f32 %v628_v18, 0.0  ;;  %v757_v27 = vmax.f32 %v629_v19, 0.0  ;;  %v2139_v30 = vpack.c.bf16 %v750_v20, %v750_v20  ;;  %v2140_v31 = vpack.c.bf16 %v751_v21, %v751_v21 }
  0x48   : > { %v2141_v32 = vpack.c.bf16 %v752_v22, %v752_v22  ;;  %v2142_v33 = vpack.c.bf16 %v753_v23, %v753_v23  ;;  %v2143_v36 = vpack.c.bf16 %v754_v24, %v754_v24  ;;  %v2144_v37 = vpack.c.bf16 %v755_v25, %v755_v25 }
  0x49   : > { %v2145_v38 = vpack.c.bf16 %v756_v26, %v756_v26  ;;  %v2146_v39 = vpack.c.bf16 %v757_v27, %v757_v27  ;;  %1391 = vst.msk [vmem:[%s2832_s6 + $0x80] sm:$0xf] %vm1358_vm0, %v2139_v30  ;;  %1392 = vst.msk [vmem:[%s2832_s6 + $0x84] sm:$0xf] %vm1358_vm0, %v2140_v31  ;;  %v2324_v42 = vunpack.c.l.bf16 %v2514_v29  ;;  %v2325_v43 = vunpack.c.h.bf16 %v2514_v29 }
  0x4a   : > { %1393 = vst.msk [vmem:[%s2832_s6 + $0x88] sm:$0xf] %vm1358_vm0, %v2141_v32  ;;  %1394 = vst.msk [vmem:[%s2832_s6 + $0x8c] sm:$0xf] %vm1358_vm0, %v2142_v33  ;;  %v2328_v44 = vunpack.c.l.bf16 %v2515_v34  ;;  %v2329_v45 = vunpack.c.h.bf16 %v2515_v34  ;;  %v2332_v46 = vunpack.c.l.bf16 %v2516_v35  ;;  %v2333_v47 = vunpack.c.h.bf16 %v2516_v35 }
  0x4b   : > { %1395 = vst.msk [vmem:[%s2832_s6 + $0x90] sm:$0xf] %vm1358_vm0, %v2143_v36  ;;  %1396 = vst.msk [vmem:[%s2832_s6 + $0x94] sm:$0xf] %vm1358_vm0, %v2144_v37  ;;  %v495_v48 = vmul.f32 %v2320_v40, %v2797_v0  ;;  %v496_v49 = vmul.f32 %v2321_v41, %v2797_v0  ;;  %v497_v50 = vmul.f32 %v2324_v42, %v2797_v0  ;;  %v2336_v22 = vunpack.c.l.bf16 %v2517_v10 }
  0x4c   : > { %1397 = vst.msk [vmem:[%s2832_s6 + $0x98] sm:$0xf] %vm1358_vm0, %v2145_v38  ;;  %1398 = vst.msk [vmem:[%s2832_s6 + $0x9c] sm:$0xf] %vm1358_vm0, %v2146_v39  ;;  %v498_v51 = vmul.f32 %v2325_v43, %v2797_v0  ;;  %v499_v52 = vmul.f32 %v2328_v44, %v2797_v0  ;;  %v500_v53 = vmul.f32 %v2329_v45, %v2797_v0  ;;  %v2337_v23 = vunpack.c.h.bf16 %v2517_v10 }
  0x4d   : > { %v501_v54 = vmul.f32 %v2332_v46, %v2797_v0  ;;  %v502_v55 = vmul.f32 %v2333_v47, %v2797_v0  ;;  %v630_v56 = vadd.f32 %v2807_v9, %v495_v48  ;;  %v631_v57 = vadd.f32 %v2807_v9, %v496_v49 }
  0x4e   : > { %v632_v58 = vadd.f32 %v2807_v9, %v497_v50  ;;  %v633_v59 = vadd.f32 %v2807_v9, %v498_v51  ;;  %v634_v60 = vadd.f32 %v2807_v9, %v499_v52  ;;  %v635_v61 = vadd.f32 %v2807_v9, %v500_v53 }
  0x4f   : > { %v636_v62 = vadd.f32 %v2807_v9, %v501_v54  ;;  %v637_v63 = vadd.f32 %v2807_v9, %v502_v55  ;;  %v758_v1 = vmax.f32 %v630_v56, 0.0  ;;  %v759_v2 = vmax.f32 %v631_v57, 0.0  ;;  %v2521_v54 = vld [vmem:[%s2792_s26 + $0xe0] sm:$0xff]   ;;  %v2522_v55 = vld [vmem:[%s2792_s26 + $0xe8] sm:$0xff]  }
  0x50   : > { %v760_v3 = vmax.f32 %v632_v58, 0.0  ;;  %v761_v4 = vmax.f32 %v633_v59, 0.0  ;;  %v762_v5 = vmax.f32 %v634_v60, 0.0  ;;  %v763_v6 = vmax.f32 %v635_v61, 0.0  ;;  %v2523_v60 = vld [vmem:[%s2792_s26 + $0xf0] sm:$0xff]   ;;  %v2524_v61 = vld [vmem:[%s2792_s26 + $0xf8] sm:$0xff]  }
  0x51   : > { %v764_v7 = vmax.f32 %v636_v62, 0.0  ;;  %v765_v8 = vmax.f32 %v637_v63, 0.0  ;;  %v2147_v12 = vpack.c.bf16 %v758_v1, %v758_v1  ;;  %v2148_v13 = vpack.c.bf16 %v759_v2, %v759_v2 }
  0x52   : > { %v2149_v14 = vpack.c.bf16 %v760_v3, %v760_v3  ;;  %v2150_v15 = vpack.c.bf16 %v761_v4, %v761_v4  ;;  %v2151_v18 = vpack.c.bf16 %v762_v5, %v762_v5  ;;  %v2152_v19 = vpack.c.bf16 %v763_v6, %v763_v6 }
  0x53   : > { %v2153_v20 = vpack.c.bf16 %v764_v7, %v764_v7  ;;  %v2154_v21 = vpack.c.bf16 %v765_v8, %v765_v8  ;;  %1399 = vst.msk [vmem:[%s2832_s6 + $0xa0] sm:$0xf] %vm1358_vm0, %v2147_v12  ;;  %1400 = vst.msk [vmem:[%s2832_s6 + $0xa4] sm:$0xf] %vm1358_vm0, %v2148_v13  ;;  %v2340_v24 = vunpack.c.l.bf16 %v2518_v11  ;;  %v2341_v25 = vunpack.c.h.bf16 %v2518_v11 }
  0x54   : > { %1401 = vst.msk [vmem:[%s2832_s6 + $0xa8] sm:$0xf] %vm1358_vm0, %v2149_v14  ;;  %1402 = vst.msk [vmem:[%s2832_s6 + $0xac] sm:$0xf] %vm1358_vm0, %v2150_v15  ;;  %v2344_v26 = vunpack.c.l.bf16 %v2519_v16  ;;  %v2345_v27 = vunpack.c.h.bf16 %v2519_v16  ;;  %v2348_v28 = vunpack.c.l.bf16 %v2520_v17  ;;  %v2349_v29 = vunpack.c.h.bf16 %v2520_v17 }
  0x55   : > { %1403 = vst.msk [vmem:[%s2832_s6 + $0xb0] sm:$0xf] %vm1358_vm0, %v2151_v18  ;;  %1404 = vst.msk [vmem:[%s2832_s6 + $0xb4] sm:$0xf] %vm1358_vm0, %v2152_v19  ;;  %v503_v30 = vmul.f32 %v2336_v22, %v2797_v0  ;;  %v504_v31 = vmul.f32 %v2337_v23, %v2797_v0  ;;  %v505_v32 = vmul.f32 %v2340_v24, %v2797_v0  ;;  %v2352_v3 = vunpack.c.l.bf16 %v2521_v54 }
  0x56   : > { %1405 = vst.msk [vmem:[%s2832_s6 + $0xb8] sm:$0xf] %vm1358_vm0, %v2153_v20  ;;  %1406 = vst.msk [vmem:[%s2832_s6 + $0xbc] sm:$0xf] %vm1358_vm0, %v2154_v21  ;;  %v506_v33 = vmul.f32 %v2341_v25, %v2797_v0  ;;  %v507_v34 = vmul.f32 %v2344_v26, %v2797_v0  ;;  %v508_v35 = vmul.f32 %v2345_v27, %v2797_v0  ;;  %v2353_v4 = vunpack.c.h.bf16 %v2521_v54 }
  0x57   : > { %v509_v36 = vmul.f32 %v2348_v28, %v2797_v0  ;;  %v510_v37 = vmul.f32 %v2349_v29, %v2797_v0  ;;  %v638_v38 = vadd.f32 %v2807_v9, %v503_v30  ;;  %v639_v39 = vadd.f32 %v2807_v9, %v504_v31 }
  0x58   : > { %v640_v40 = vadd.f32 %v2807_v9, %v505_v32  ;;  %v641_v41 = vadd.f32 %v2807_v9, %v506_v33  ;;  %v642_v42 = vadd.f32 %v2807_v9, %v507_v34  ;;  %v643_v43 = vadd.f32 %v2807_v9, %v508_v35 }
  0x59   : > { %v644_v44 = vadd.f32 %v2807_v9, %v509_v36  ;;  %v645_v45 = vadd.f32 %v2807_v9, %v510_v37  ;;  %v766_v46 = vmax.f32 %v638_v38, 0.0  ;;  %v767_v47 = vmax.f32 %v639_v39, 0.0  ;;  %v2525_v36 = vld [vmem:[%s2792_s26 + $0x100] sm:$0xff]   ;;  %v2526_v37 = vld [vmem:[%s2792_s26 + $0x108] sm:$0xff]  }
  0x5a   : > { %v768_v48 = vmax.f32 %v640_v40, 0.0  ;;  %v769_v49 = vmax.f32 %v641_v41, 0.0  ;;  %v770_v50 = vmax.f32 %v642_v42, 0.0  ;;  %v771_v51 = vmax.f32 %v643_v43, 0.0  ;;  %v2527_v42 = vld [vmem:[%s2792_s26 + $0x110] sm:$0xff]   ;;  %v2528_v43 = vld [vmem:[%s2792_s26 + $0x118] sm:$0xff]  }
  0x5b   : > { %v772_v52 = vmax.f32 %v644_v44, 0.0  ;;  %v773_v53 = vmax.f32 %v645_v45, 0.0  ;;  %v2155_v56 = vpack.c.bf16 %v766_v46, %v766_v46  ;;  %v2156_v57 = vpack.c.bf16 %v767_v47, %v767_v47 }
  0x5c   : > { %v2157_v58 = vpack.c.bf16 %v768_v48, %v768_v48  ;;  %v2158_v59 = vpack.c.bf16 %v769_v49, %v769_v49  ;;  %v2159_v62 = vpack.c.bf16 %v770_v50, %v770_v50  ;;  %v2160_v63 = vpack.c.bf16 %v771_v51, %v771_v51 }
  0x5d   : > { %v2161_v1 = vpack.c.bf16 %v772_v52, %v772_v52  ;;  %v2162_v2 = vpack.c.bf16 %v773_v53, %v773_v53  ;;  %1407 = vst.msk [vmem:[%s2832_s6 + $0xc0] sm:$0xf] %vm1358_vm0, %v2155_v56  ;;  %1408 = vst.msk [vmem:[%s2832_s6 + $0xc4] sm:$0xf] %vm1358_vm0, %v2156_v57  ;;  %v2356_v5 = vunpack.c.l.bf16 %v2522_v55  ;;  %v2357_v6 = vunpack.c.h.bf16 %v2522_v55 }
  0x5e   : > { %1409 = vst.msk [vmem:[%s2832_s6 + $0xc8] sm:$0xf] %vm1358_vm0, %v2157_v58  ;;  %1410 = vst.msk [vmem:[%s2832_s6 + $0xcc] sm:$0xf] %vm1358_vm0, %v2158_v59  ;;  %v2360_v7 = vunpack.c.l.bf16 %v2523_v60  ;;  %v2361_v8 = vunpack.c.h.bf16 %v2523_v60  ;;  %v2364_v10 = vunpack.c.l.bf16 %v2524_v61  ;;  %v2365_v11 = vunpack.c.h.bf16 %v2524_v61 }
  0x5f   : > { %1411 = vst.msk [vmem:[%s2832_s6 + $0xd0] sm:$0xf] %vm1358_vm0, %v2159_v62  ;;  %1412 = vst.msk [vmem:[%s2832_s6 + $0xd4] sm:$0xf] %vm1358_vm0, %v2160_v63  ;;  %v511_v12 = vmul.f32 %v2352_v3, %v2797_v0  ;;  %v512_v13 = vmul.f32 %v2353_v4, %v2797_v0  ;;  %v513_v14 = vmul.f32 %v2356_v5, %v2797_v0  ;;  %v2368_v48 = vunpack.c.l.bf16 %v2525_v36 }
  0x60   : > { %1413 = vst.msk [vmem:[%s2832_s6 + $0xd8] sm:$0xf] %vm1358_vm0, %v2161_v1  ;;  %1414 = vst.msk [vmem:[%s2832_s6 + $0xdc] sm:$0xf] %vm1358_vm0, %v2162_v2  ;;  %v514_v15 = vmul.f32 %v2357_v6, %v2797_v0  ;;  %v515_v16 = vmul.f32 %v2360_v7, %v2797_v0  ;;  %v516_v17 = vmul.f32 %v2361_v8, %v2797_v0  ;;  %v2369_v49 = vunpack.c.h.bf16 %v2525_v36 }
  0x61   : > { %v517_v18 = vmul.f32 %v2364_v10, %v2797_v0  ;;  %v518_v19 = vmul.f32 %v2365_v11, %v2797_v0  ;;  %v646_v20 = vadd.f32 %v2807_v9, %v511_v12  ;;  %v647_v21 = vadd.f32 %v2807_v9, %v512_v13 }
  0x62   : > { %v648_v22 = vadd.f32 %v2807_v9, %v513_v14  ;;  %v649_v23 = vadd.f32 %v2807_v9, %v514_v15  ;;  %v650_v24 = vadd.f32 %v2807_v9, %v515_v16  ;;  %v651_v25 = vadd.f32 %v2807_v9, %v516_v17 }
  0x63   : > { %v652_v26 = vadd.f32 %v2807_v9, %v517_v18  ;;  %v653_v27 = vadd.f32 %v2807_v9, %v518_v19  ;;  %v774_v28 = vmax.f32 %v646_v20, 0.0  ;;  %v775_v29 = vmax.f32 %v647_v21, 0.0  ;;  %v2529_v18 = vld [vmem:[%s2792_s26 + $0x120] sm:$0xff]   ;;  %v2530_v19 = vld [vmem:[%s2792_s26 + $0x128] sm:$0xff]  }
  0x64   : > { %v776_v30 = vmax.f32 %v648_v22, 0.0  ;;  %v777_v31 = vmax.f32 %v649_v23, 0.0  ;;  %v778_v32 = vmax.f32 %v650_v24, 0.0  ;;  %v779_v33 = vmax.f32 %v651_v25, 0.0  ;;  %v2531_v24 = vld [vmem:[%s2792_s26 + $0x130] sm:$0xff]   ;;  %v2532_v25 = vld [vmem:[%s2792_s26 + $0x138] sm:$0xff]  }
  0x65   : > { %v780_v34 = vmax.f32 %v652_v26, 0.0  ;;  %v781_v35 = vmax.f32 %v653_v27, 0.0  ;;  %v2163_v38 = vpack.c.bf16 %v774_v28, %v774_v28  ;;  %v2164_v39 = vpack.c.bf16 %v775_v29, %v775_v29 }
  0x66   : > { %v2165_v40 = vpack.c.bf16 %v776_v30, %v776_v30  ;;  %v2166_v41 = vpack.c.bf16 %v777_v31, %v777_v31  ;;  %v2167_v44 = vpack.c.bf16 %v778_v32, %v778_v32  ;;  %v2168_v45 = vpack.c.bf16 %v779_v33, %v779_v33 }
  0x67   : > { %v2169_v46 = vpack.c.bf16 %v780_v34, %v780_v34  ;;  %v2170_v47 = vpack.c.bf16 %v781_v35, %v781_v35  ;;  %1415 = vst.msk [vmem:[%s2832_s6 + $0xe0] sm:$0xf] %vm1358_vm0, %v2163_v38  ;;  %1416 = vst.msk [vmem:[%s2832_s6 + $0xe4] sm:$0xf] %vm1358_vm0, %v2164_v39  ;;  %v2372_v50 = vunpack.c.l.bf16 %v2526_v37  ;;  %v2373_v51 = vunpack.c.h.bf16 %v2526_v37 }
  0x68   : > { %1417 = vst.msk [vmem:[%s2832_s6 + $0xe8] sm:$0xf] %vm1358_vm0, %v2165_v40  ;;  %1418 = vst.msk [vmem:[%s2832_s6 + $0xec] sm:$0xf] %vm1358_vm0, %v2166_v41  ;;  %v2376_v52 = vunpack.c.l.bf16 %v2527_v42  ;;  %v2377_v53 = vunpack.c.h.bf16 %v2527_v42  ;;  %v2380_v54 = vunpack.c.l.bf16 %v2528_v43  ;;  %v2381_v55 = vunpack.c.h.bf16 %v2528_v43 }
  0x69   : > { %1419 = vst.msk [vmem:[%s2832_s6 + $0xf0] sm:$0xf] %vm1358_vm0, %v2167_v44  ;;  %1420 = vst.msk [vmem:[%s2832_s6 + $0xf4] sm:$0xf] %vm1358_vm0, %v2168_v45  ;;  %v519_v56 = vmul.f32 %v2368_v48, %v2797_v0  ;;  %v520_v57 = vmul.f32 %v2369_v49, %v2797_v0  ;;  %v521_v58 = vmul.f32 %v2372_v50, %v2797_v0  ;;  %v2384_v30 = vunpack.c.l.bf16 %v2529_v18 }
  0x6a   : > { %1421 = vst.msk [vmem:[%s2832_s6 + $0xf8] sm:$0xf] %vm1358_vm0, %v2169_v46  ;;  %1422 = vst.msk [vmem:[%s2832_s6 + $0xfc] sm:$0xf] %vm1358_vm0, %v2170_v47  ;;  %v522_v59 = vmul.f32 %v2373_v51, %v2797_v0  ;;  %v523_v60 = vmul.f32 %v2376_v52, %v2797_v0  ;;  %v524_v61 = vmul.f32 %v2377_v53, %v2797_v0  ;;  %v2385_v31 = vunpack.c.h.bf16 %v2529_v18  ;;  %v3177_v18 = vld [vmem:[%s3596_s1] ss:$0 sm:$0xff] }
  0x6b   : > { %v525_v62 = vmul.f32 %v2380_v54, %v2797_v0  ;;  %v526_v63 = vmul.f32 %v2381_v55, %v2797_v0  ;;  %v654_v1 = vadd.f32 %v2807_v9, %v519_v56  ;;  %v655_v2 = vadd.f32 %v2807_v9, %v520_v57 }
  0x6c   : > { %v656_v3 = vadd.f32 %v2807_v9, %v521_v58  ;;  %v657_v4 = vadd.f32 %v2807_v9, %v522_v59  ;;  %v658_v5 = vadd.f32 %v2807_v9, %v523_v60  ;;  %v659_v6 = vadd.f32 %v2807_v9, %v524_v61  ;;  %v2533_v61 = vld [vmem:[%s2792_s26 + $0x140] sm:$0xff]  }
  0x6d   : > { %v660_v7 = vadd.f32 %v2807_v9, %v525_v62  ;;  %v661_v8 = vadd.f32 %v2807_v9, %v526_v63  ;;  %v782_v10 = vmax.f32 %v654_v1, 0.0  ;;  %v783_v11 = vmax.f32 %v655_v2, 0.0  ;;  %v2534_v62 = vld [vmem:[%s2792_s26 + $0x148] sm:$0xff]  }
  0x6e   : > { %v784_v12 = vmax.f32 %v656_v3, 0.0  ;;  %v785_v13 = vmax.f32 %v657_v4, 0.0  ;;  %v786_v14 = vmax.f32 %v658_v5, 0.0  ;;  %v787_v15 = vmax.f32 %v659_v6, 0.0  ;;  %v2535_v3 = vld [vmem:[%s2792_s26 + $0x150] sm:$0xff]   ;;  %v2536_v4 = vld [vmem:[%s2792_s26 + $0x158] sm:$0xff]  }
  0x6f   : > { %v788_v16 = vmax.f32 %v660_v7, 0.0  ;;  %v789_v17 = vmax.f32 %v661_v8, 0.0  ;;  %v2171_v20 = vpack.c.bf16 %v782_v10, %v782_v10  ;;  %v2172_v21 = vpack.c.bf16 %v783_v11, %v783_v11 }
  0x70   : > { %v2173_v22 = vpack.c.bf16 %v784_v12, %v784_v12  ;;  %v2174_v23 = vpack.c.bf16 %v785_v13, %v785_v13  ;;  %v2175_v26 = vpack.c.bf16 %v786_v14, %v786_v14  ;;  %v2176_v27 = vpack.c.bf16 %v787_v15, %v787_v15 }
  0x71   : > { %v2177_v28 = vpack.c.bf16 %v788_v16, %v788_v16  ;;  %v2178_v29 = vpack.c.bf16 %v789_v17, %v789_v17  ;;  %1423 = vst.msk [vmem:[%s2832_s6 + $0x100] sm:$0xf] %vm1358_vm0, %v2171_v20  ;;  %1424 = vst.msk [vmem:[%s2832_s6 + $0x104] sm:$0xf] %vm1358_vm0, %v2172_v21  ;;  %v2388_v32 = vunpack.c.l.bf16 %v2530_v19  ;;  %v2389_v33 = vunpack.c.h.bf16 %v2530_v19 }
  0x72   : > { %1425 = vst.msk [vmem:[%s2832_s6 + $0x108] sm:$0xf] %vm1358_vm0, %v2173_v22  ;;  %1426 = vst.msk [vmem:[%s2832_s6 + $0x10c] sm:$0xf] %vm1358_vm0, %v2174_v23  ;;  %v2392_v34 = vunpack.c.l.bf16 %v2531_v24  ;;  %v2393_v35 = vunpack.c.h.bf16 %v2531_v24  ;;  %v2396_v36 = vunpack.c.l.bf16 %v2532_v25  ;;  %v2397_v37 = vunpack.c.h.bf16 %v2532_v25 }
  0x73   : > { %1427 = vst.msk [vmem:[%s2832_s6 + $0x110] sm:$0xf] %vm1358_vm0, %v2175_v26  ;;  %1428 = vst.msk [vmem:[%s2832_s6 + $0x114] sm:$0xf] %vm1358_vm0, %v2176_v27  ;;  %v527_v38 = vmul.f32 %v2384_v30, %v2797_v0  ;;  %v528_v39 = vmul.f32 %v2385_v31, %v2797_v0  ;;  %v529_v40 = vmul.f32 %v2388_v32, %v2797_v0  ;;  %v2400_v10 = vunpack.c.l.bf16 %v2533_v61  ;;  %v3190_v27 = vld [vmem:[%s3597_s2] ss:$0 sm:$0xff] }
  0x74   : > { %1429 = vst.msk [vmem:[%s2832_s6 + $0x118] sm:$0xf] %vm1358_vm0, %v2177_v28  ;;  %1430 = vst.msk [vmem:[%s2832_s6 + $0x11c] sm:$0xf] %vm1358_vm0, %v2178_v29  ;;  %v530_v41 = vmul.f32 %v2389_v33, %v2797_v0  ;;  %v531_v42 = vmul.f32 %v2392_v34, %v2797_v0  ;;  %v532_v43 = vmul.f32 %v2393_v35, %v2797_v0  ;;  %v2401_v11 = vunpack.c.h.bf16 %v2533_v61 }
  0x75   : > { %v533_v44 = vmul.f32 %v2396_v36, %v2797_v0  ;;  %v534_v45 = vmul.f32 %v2397_v37, %v2797_v0  ;;  %v662_v46 = vadd.f32 %v2807_v9, %v527_v38  ;;  %v663_v47 = vadd.f32 %v2807_v9, %v528_v39 }
  0x76   : > { %v664_v48 = vadd.f32 %v2807_v9, %v529_v40  ;;  %v665_v49 = vadd.f32 %v2807_v9, %v530_v41  ;;  %v666_v50 = vadd.f32 %v2807_v9, %v531_v42  ;;  %v667_v51 = vadd.f32 %v2807_v9, %v532_v43 }
  0x77   : > { %v668_v52 = vadd.f32 %v2807_v9, %v533_v44  ;;  %v669_v53 = vadd.f32 %v2807_v9, %v534_v45  ;;  %v790_v0 = vmax.f32 %v662_v46, 0.0  ;;  %v791_v54 = vmax.f32 %v663_v47, 0.0  ;;  %v2537_v44 = vld [vmem:[%s2792_s26 + $0x160] sm:$0xff]   ;;  %v2538_v45 = vld [vmem:[%s2792_s26 + $0x168] sm:$0xff]  }
  0x78   : > { %v792_v55 = vmax.f32 %v664_v48, 0.0  ;;  %v793_v56 = vmax.f32 %v665_v49, 0.0  ;;  %v794_v57 = vmax.f32 %v666_v50, 0.0  ;;  %v795_v58 = vmax.f32 %v667_v51, 0.0  ;;  %v2539_v50 = vld [vmem:[%s2792_s26 + $0x170] sm:$0xff]   ;;  %v2540_v51 = vld [vmem:[%s2792_s26 + $0x178] sm:$0xff]  }
  0x79   : > { %v796_v59 = vmax.f32 %v668_v52, 0.0  ;;  %v797_v60 = vmax.f32 %v669_v53, 0.0  ;;  %v2179_v63 = vpack.c.bf16 %v790_v0, %v790_v0  ;;  %v2180_v1 = vpack.c.bf16 %v791_v54, %v791_v54 }
  0x7a   : > { %v2181_v2 = vpack.c.bf16 %v792_v55, %v792_v55  ;;  %v2182_v9 = vpack.c.bf16 %v793_v56, %v793_v56  ;;  %v2183_v5 = vpack.c.bf16 %v794_v57, %v794_v57  ;;  %v2184_v6 = vpack.c.bf16 %v795_v58, %v795_v58 }
  0x7b   : > { %v2185_v7 = vpack.c.bf16 %v796_v59, %v796_v59  ;;  %v2186_v8 = vpack.c.bf16 %v797_v60, %v797_v60  ;;  %1431 = vst.msk [vmem:[%s2832_s6 + $0x120] sm:$0xf] %vm1358_vm0, %v2179_v63  ;;  %1432 = vst.msk [vmem:[%s2832_s6 + $0x124] sm:$0xf] %vm1358_vm0, %v2180_v1  ;;  %v2404_v12 = vunpack.c.l.bf16 %v2534_v62  ;;  %v2405_v13 = vunpack.c.h.bf16 %v2534_v62 }
  0x7c   : > { %1433 = vst.msk [vmem:[%s2832_s6 + $0x128] sm:$0xf] %vm1358_vm0, %v2181_v2  ;;  %1434 = vst.msk [vmem:[%s2832_s6 + $0x12c] sm:$0xf] %vm1358_vm0, %v2182_v9  ;;  %v2408_v14 = vunpack.c.l.bf16 %v2535_v3  ;;  %v2409_v15 = vunpack.c.h.bf16 %v2535_v3  ;;  %v2412_v16 = vunpack.c.l.bf16 %v2536_v4  ;;  %v2413_v17 = vunpack.c.h.bf16 %v2536_v4 }
  0x7d   : > { %1435 = vst.msk [vmem:[%s2832_s6 + $0x130] sm:$0xf] %vm1358_vm0, %v2183_v5  ;;  %1436 = vst.msk [vmem:[%s2832_s6 + $0x134] sm:$0xf] %vm1358_vm0, %v2184_v6  ;;  %v535_v19 = vmul.f32 %v3177_v18, %v2400_v10  ;;  %v536_v20 = vmul.f32 %v3177_v18, %v2401_v11  ;;  %v537_v21 = vmul.f32 %v3177_v18, %v2404_v12  ;;  %v2416_v55 = vunpack.c.l.bf16 %v2537_v44 }
  0x7e   : > { %1437 = vst.msk [vmem:[%s2832_s6 + $0x138] sm:$0xf] %vm1358_vm0, %v2185_v7  ;;  %1438 = vst.msk [vmem:[%s2832_s6 + $0x13c] sm:$0xf] %vm1358_vm0, %v2186_v8  ;;  %v538_v22 = vmul.f32 %v3177_v18, %v2405_v13  ;;  %v539_v23 = vmul.f32 %v3177_v18, %v2408_v14  ;;  %v540_v24 = vmul.f32 %v3177_v18, %v2409_v15  ;;  %v2417_v56 = vunpack.c.h.bf16 %v2537_v44 }
  0x7f   : > { %v541_v25 = vmul.f32 %v3177_v18, %v2412_v16  ;;  %v542_v26 = vmul.f32 %v3177_v18, %v2413_v17  ;;  %v670_v28 = vadd.f32 %v3190_v27, %v535_v19  ;;  %v671_v29 = vadd.f32 %v3190_v27, %v536_v20 }
  0x80   : > { %v672_v30 = vadd.f32 %v3190_v27, %v537_v21  ;;  %v673_v31 = vadd.f32 %v3190_v27, %v538_v22  ;;  %v674_v32 = vadd.f32 %v3190_v27, %v539_v23  ;;  %v675_v33 = vadd.f32 %v3190_v27, %v540_v24 }
  0x81   : > { %v676_v34 = vadd.f32 %v3190_v27, %v541_v25  ;;  %v677_v35 = vadd.f32 %v3190_v27, %v542_v26  ;;  %v798_v36 = vmax.f32 %v670_v28, 0.0  ;;  %v799_v37 = vmax.f32 %v671_v29, 0.0  ;;  %v2541_v25 = vld [vmem:[%s2792_s26 + $0x180] sm:$0xff]   ;;  %v2542_v26 = vld [vmem:[%s2792_s26 + $0x188] sm:$0xff]  }
  0x82   : > { %v800_v38 = vmax.f32 %v672_v30, 0.0  ;;  %v801_v39 = vmax.f32 %v673_v31, 0.0  ;;  %v802_v40 = vmax.f32 %v674_v32, 0.0  ;;  %v803_v41 = vmax.f32 %v675_v33, 0.0  ;;  %v2543_v32 = vld [vmem:[%s2792_s26 + $0x190] sm:$0xff]   ;;  %v2544_v33 = vld [vmem:[%s2792_s26 + $0x198] sm:$0xff]  }
  0x83   : > { %v804_v42 = vmax.f32 %v676_v34, 0.0  ;;  %v805_v43 = vmax.f32 %v677_v35, 0.0  ;;  %v2187_v46 = vpack.c.bf16 %v798_v36, %v798_v36  ;;  %v2188_v47 = vpack.c.bf16 %v799_v37, %v799_v37 }
  0x84   : > { %v2189_v48 = vpack.c.bf16 %v800_v38, %v800_v38  ;;  %v2190_v49 = vpack.c.bf16 %v801_v39, %v801_v39  ;;  %v2191_v52 = vpack.c.bf16 %v802_v40, %v802_v40  ;;  %v2192_v53 = vpack.c.bf16 %v803_v41, %v803_v41 }
  0x85   : > { %v2193_v0 = vpack.c.bf16 %v804_v42, %v804_v42  ;;  %v2194_v54 = vpack.c.bf16 %v805_v43, %v805_v43  ;;  %1439 = vst.msk [vmem:[%s2832_s6 + $0x140] sm:$0xf] %vm1358_vm0, %v2187_v46  ;;  %1440 = vst.msk [vmem:[%s2832_s6 + $0x144] sm:$0xf] %vm1358_vm0, %v2188_v47  ;;  %v2420_v57 = vunpack.c.l.bf16 %v2538_v45  ;;  %v2421_v58 = vunpack.c.h.bf16 %v2538_v45 }
  0x86   : > { %1441 = vst.msk [vmem:[%s2832_s6 + $0x148] sm:$0xf] %vm1358_vm0, %v2189_v48  ;;  %1442 = vst.msk [vmem:[%s2832_s6 + $0x14c] sm:$0xf] %vm1358_vm0, %v2190_v49  ;;  %v2424_v59 = vunpack.c.l.bf16 %v2539_v50  ;;  %v2425_v60 = vunpack.c.h.bf16 %v2539_v50  ;;  %v2428_v61 = vunpack.c.l.bf16 %v2540_v51  ;;  %v2429_v62 = vunpack.c.h.bf16 %v2540_v51 }
  0x87   : > { %1443 = vst.msk [vmem:[%s2832_s6 + $0x150] sm:$0xf] %vm1358_vm0, %v2191_v52  ;;  %1444 = vst.msk [vmem:[%s2832_s6 + $0x154] sm:$0xf] %vm1358_vm0, %v2192_v53  ;;  %v543_v63 = vmul.f32 %v3177_v18, %v2416_v55  ;;  %v544_v1 = vmul.f32 %v3177_v18, %v2417_v56  ;;  %v545_v2 = vmul.f32 %v3177_v18, %v2420_v57  ;;  %v2432_v38 = vunpack.c.l.bf16 %v2541_v25 }
  0x88   : > { %1445 = vst.msk [vmem:[%s2832_s6 + $0x158] sm:$0xf] %vm1358_vm0, %v2193_v0  ;;  %1446 = vst.msk [vmem:[%s2832_s6 + $0x15c] sm:$0xf] %vm1358_vm0, %v2194_v54  ;;  %v546_v9 = vmul.f32 %v3177_v18, %v2421_v58  ;;  %v547_v3 = vmul.f32 %v3177_v18, %v2424_v59  ;;  %v548_v4 = vmul.f32 %v3177_v18, %v2425_v60  ;;  %v2433_v39 = vunpack.c.h.bf16 %v2541_v25 }
  0x89   : > { %v549_v5 = vmul.f32 %v3177_v18, %v2428_v61  ;;  %v550_v6 = vmul.f32 %v3177_v18, %v2429_v62  ;;  %v678_v7 = vadd.f32 %v3190_v27, %v543_v63  ;;  %v679_v8 = vadd.f32 %v3190_v27, %v544_v1 }
  0x8a   : > { %v680_v10 = vadd.f32 %v3190_v27, %v545_v2  ;;  %v681_v11 = vadd.f32 %v3190_v27, %v546_v9  ;;  %v682_v12 = vadd.f32 %v3190_v27, %v547_v3  ;;  %v683_v13 = vadd.f32 %v3190_v27, %v548_v4 }
  0x8b   : > { %v684_v14 = vadd.f32 %v3190_v27, %v549_v5  ;;  %v685_v15 = vadd.f32 %v3190_v27, %v550_v6  ;;  %v806_v16 = vmax.f32 %v678_v7, 0.0  ;;  %v807_v17 = vmax.f32 %v679_v8, 0.0  ;;  %v2545_v5 = vld [vmem:[%s2792_s26 + $0x1a0] sm:$0xff]   ;;  %v2546_v6 = vld [vmem:[%s2792_s26 + $0x1a8] sm:$0xff]  }
  0x8c   : > { %v808_v19 = vmax.f32 %v680_v10, 0.0  ;;  %v809_v20 = vmax.f32 %v681_v11, 0.0  ;;  %v810_v21 = vmax.f32 %v682_v12, 0.0  ;;  %v811_v22 = vmax.f32 %v683_v13, 0.0  ;;  %v2547_v12 = vld [vmem:[%s2792_s26 + $0x1b0] sm:$0xff]   ;;  %v2548_v13 = vld [vmem:[%s2792_s26 + $0x1b8] sm:$0xff]  }
  0x8d   : > { %v812_v23 = vmax.f32 %v684_v14, 0.0  ;;  %v813_v24 = vmax.f32 %v685_v15, 0.0  ;;  %v2195_v28 = vpack.c.bf16 %v806_v16, %v806_v16  ;;  %v2196_v29 = vpack.c.bf16 %v807_v17, %v807_v17 }
  0x8e   : > { %v2197_v30 = vpack.c.bf16 %v808_v19, %v808_v19  ;;  %v2198_v31 = vpack.c.bf16 %v809_v20, %v809_v20  ;;  %v2199_v34 = vpack.c.bf16 %v810_v21, %v810_v21  ;;  %v2200_v35 = vpack.c.bf16 %v811_v22, %v811_v22 }
  0x8f   : > { %v2201_v36 = vpack.c.bf16 %v812_v23, %v812_v23  ;;  %v2202_v37 = vpack.c.bf16 %v813_v24, %v813_v24  ;;  %1447 = vst.msk [vmem:[%s2832_s6 + $0x160] sm:$0xf] %vm1358_vm0, %v2195_v28  ;;  %1448 = vst.msk [vmem:[%s2832_s6 + $0x164] sm:$0xf] %vm1358_vm0, %v2196_v29  ;;  %v2436_v40 = vunpack.c.l.bf16 %v2542_v26  ;;  %v2437_v41 = vunpack.c.h.bf16 %v2542_v26 }
  0x90   : > { %1449 = vst.msk [vmem:[%s2832_s6 + $0x168] sm:$0xf] %vm1358_vm0, %v2197_v30  ;;  %1450 = vst.msk [vmem:[%s2832_s6 + $0x16c] sm:$0xf] %vm1358_vm0, %v2198_v31  ;;  %v2440_v42 = vunpack.c.l.bf16 %v2543_v32  ;;  %v2441_v43 = vunpack.c.h.bf16 %v2543_v32  ;;  %v2444_v44 = vunpack.c.l.bf16 %v2544_v33  ;;  %v2445_v45 = vunpack.c.h.bf16 %v2544_v33 }
  0x91   : > { %1451 = vst.msk [vmem:[%s2832_s6 + $0x170] sm:$0xf] %vm1358_vm0, %v2199_v34  ;;  %1452 = vst.msk [vmem:[%s2832_s6 + $0x174] sm:$0xf] %vm1358_vm0, %v2200_v35  ;;  %v551_v46 = vmul.f32 %v3177_v18, %v2432_v38  ;;  %v552_v47 = vmul.f32 %v3177_v18, %v2433_v39  ;;  %v553_v48 = vmul.f32 %v3177_v18, %v2436_v40  ;;  %v2448_v19 = vunpack.c.l.bf16 %v2545_v5 }
  0x92   : > { %1453 = vst.msk [vmem:[%s2832_s6 + $0x178] sm:$0xf] %vm1358_vm0, %v2201_v36  ;;  %1454 = vst.msk [vmem:[%s2832_s6 + $0x17c] sm:$0xf] %vm1358_vm0, %v2202_v37  ;;  %v554_v49 = vmul.f32 %v3177_v18, %v2437_v41  ;;  %v555_v50 = vmul.f32 %v3177_v18, %v2440_v42  ;;  %v556_v51 = vmul.f32 %v3177_v18, %v2441_v43  ;;  %v2449_v20 = vunpack.c.h.bf16 %v2545_v5 }
  0x93   : > { %v557_v52 = vmul.f32 %v3177_v18, %v2444_v44  ;;  %v558_v53 = vmul.f32 %v3177_v18, %v2445_v45  ;;  %v686_v0 = vadd.f32 %v3190_v27, %v551_v46  ;;  %v687_v54 = vadd.f32 %v3190_v27, %v552_v47 }
  0x94   : > { %v688_v55 = vadd.f32 %v3190_v27, %v553_v48  ;;  %v689_v56 = vadd.f32 %v3190_v27, %v554_v49  ;;  %v690_v57 = vadd.f32 %v3190_v27, %v555_v50  ;;  %v691_v58 = vadd.f32 %v3190_v27, %v556_v51 }
  0x95   : > { %v692_v59 = vadd.f32 %v3190_v27, %v557_v52  ;;  %v693_v60 = vadd.f32 %v3190_v27, %v558_v53  ;;  %v814_v61 = vmax.f32 %v686_v0, 0.0  ;;  %v815_v62 = vmax.f32 %v687_v54, 0.0  ;;  %v2549_v52 = vld [vmem:[%s2792_s26 + $0x1c0] sm:$0xff]   ;;  %v2550_v53 = vld [vmem:[%s2792_s26 + $0x1c8] sm:$0xff]  }
  0x96   : > { %v816_v63 = vmax.f32 %v688_v55, 0.0  ;;  %v817_v1 = vmax.f32 %v689_v56, 0.0  ;;  %v818_v2 = vmax.f32 %v690_v57, 0.0  ;;  %v819_v9 = vmax.f32 %v691_v58, 0.0  ;;  %v2551_v57 = vld [vmem:[%s2792_s26 + $0x1d0] sm:$0xff]   ;;  %v2552_v58 = vld [vmem:[%s2792_s26 + $0x1d8] sm:$0xff]  }
  0x97   : > { %v820_v3 = vmax.f32 %v692_v59, 0.0  ;;  %v821_v4 = vmax.f32 %v693_v60, 0.0  ;;  %v2203_v7 = vpack.c.bf16 %v814_v61, %v814_v61  ;;  %v2204_v8 = vpack.c.bf16 %v815_v62, %v815_v62 }
  0x98   : > { %v2205_v10 = vpack.c.bf16 %v816_v63, %v816_v63  ;;  %v2206_v11 = vpack.c.bf16 %v817_v1, %v817_v1  ;;  %v2207_v14 = vpack.c.bf16 %v818_v2, %v818_v2  ;;  %v2208_v15 = vpack.c.bf16 %v819_v9, %v819_v9 }
  0x99   : > { %v2209_v16 = vpack.c.bf16 %v820_v3, %v820_v3  ;;  %v2210_v17 = vpack.c.bf16 %v821_v4, %v821_v4  ;;  %1455 = vst.msk [vmem:[%s2832_s6 + $0x180] sm:$0xf] %vm1358_vm0, %v2203_v7  ;;  %1456 = vst.msk [vmem:[%s2832_s6 + $0x184] sm:$0xf] %vm1358_vm0, %v2204_v8  ;;  %v2452_v21 = vunpack.c.l.bf16 %v2546_v6  ;;  %v2453_v22 = vunpack.c.h.bf16 %v2546_v6 }
  0x9a   : > { %1457 = vst.msk [vmem:[%s2832_s6 + $0x188] sm:$0xf] %vm1358_vm0, %v2205_v10  ;;  %1458 = vst.msk [vmem:[%s2832_s6 + $0x18c] sm:$0xf] %vm1358_vm0, %v2206_v11  ;;  %v2456_v23 = vunpack.c.l.bf16 %v2547_v12  ;;  %v2457_v24 = vunpack.c.h.bf16 %v2547_v12  ;;  %v2460_v25 = vunpack.c.l.bf16 %v2548_v13  ;;  %v2461_v26 = vunpack.c.h.bf16 %v2548_v13 }
  0x9b   : > { %1459 = vst.msk [vmem:[%s2832_s6 + $0x190] sm:$0xf] %vm1358_vm0, %v2207_v14  ;;  %1460 = vst.msk [vmem:[%s2832_s6 + $0x194] sm:$0xf] %vm1358_vm0, %v2208_v15  ;;  %v559_v28 = vmul.f32 %v3177_v18, %v2448_v19  ;;  %v560_v29 = vmul.f32 %v3177_v18, %v2449_v20  ;;  %v561_v30 = vmul.f32 %v3177_v18, %v2452_v21  ;;  %v2464_v63 = vunpack.c.l.bf16 %v2549_v52 }
  0x9c   : > { %1461 = vst.msk [vmem:[%s2832_s6 + $0x198] sm:$0xf] %vm1358_vm0, %v2209_v16  ;;  %1462 = vst.msk [vmem:[%s2832_s6 + $0x19c] sm:$0xf] %vm1358_vm0, %v2210_v17  ;;  %v562_v31 = vmul.f32 %v3177_v18, %v2453_v22  ;;  %v563_v32 = vmul.f32 %v3177_v18, %v2456_v23  ;;  %v564_v33 = vmul.f32 %v3177_v18, %v2457_v24  ;;  %v2465_v1 = vunpack.c.h.bf16 %v2549_v52 }
  0x9d   : > { %v565_v34 = vmul.f32 %v3177_v18, %v2460_v25  ;;  %v566_v35 = vmul.f32 %v3177_v18, %v2461_v26  ;;  %v694_v36 = vadd.f32 %v3190_v27, %v559_v28  ;;  %v695_v37 = vadd.f32 %v3190_v27, %v560_v29 }
  0x9e   : > { %v696_v38 = vadd.f32 %v3190_v27, %v561_v30  ;;  %v697_v39 = vadd.f32 %v3190_v27, %v562_v31  ;;  %v698_v40 = vadd.f32 %v3190_v27, %v563_v32  ;;  %v699_v41 = vadd.f32 %v3190_v27, %v564_v33 }
  0x9f   : > { %v700_v42 = vadd.f32 %v3190_v27, %v565_v34  ;;  %v701_v43 = vadd.f32 %v3190_v27, %v566_v35  ;;  %v822_v44 = vmax.f32 %v694_v36, 0.0  ;;  %v823_v45 = vmax.f32 %v695_v37, 0.0  ;;  %v2553_v34 = vld [vmem:[%s2792_s26 + $0x1e0] sm:$0xff]   ;;  %v2554_v35 = vld [vmem:[%s2792_s26 + $0x1e8] sm:$0xff]  }
  0xa0   : > { %v824_v46 = vmax.f32 %v696_v38, 0.0  ;;  %v825_v47 = vmax.f32 %v697_v39, 0.0  ;;  %v826_v48 = vmax.f32 %v698_v40, 0.0  ;;  %v827_v49 = vmax.f32 %v699_v41, 0.0  ;;  %v2555_v40 = vld [vmem:[%s2792_s26 + $0x1f0] sm:$0xff]   ;;  %v2556_v41 = vld [vmem:[%s2792_s26 + $0x1f8] sm:$0xff]  }
  0xa1   : > { %v828_v50 = vmax.f32 %v700_v42, 0.0  ;;  %v829_v51 = vmax.f32 %v701_v43, 0.0  ;;  %v2211_v0 = vpack.c.bf16 %v822_v44, %v822_v44  ;;  %v2212_v54 = vpack.c.bf16 %v823_v45, %v823_v45 }
  0xa2   : > { %v2213_v55 = vpack.c.bf16 %v824_v46, %v824_v46  ;;  %v2214_v56 = vpack.c.bf16 %v825_v47, %v825_v47  ;;  %v2215_v59 = vpack.c.bf16 %v826_v48, %v826_v48  ;;  %v2216_v60 = vpack.c.bf16 %v827_v49, %v827_v49 }
  0xa3   : > { %v2217_v61 = vpack.c.bf16 %v828_v50, %v828_v50  ;;  %v2218_v62 = vpack.c.bf16 %v829_v51, %v829_v51  ;;  %1463 = vst.msk [vmem:[%s2832_s6 + $0x1a0] sm:$0xf] %vm1358_vm0, %v2211_v0  ;;  %1464 = vst.msk [vmem:[%s2832_s6 + $0x1a4] sm:$0xf] %vm1358_vm0, %v2212_v54  ;;  %v2468_v2 = vunpack.c.l.bf16 %v2550_v53  ;;  %v2469_v9 = vunpack.c.h.bf16 %v2550_v53 }
  0xa4   : > { %1465 = vst.msk [vmem:[%s2832_s6 + $0x1a8] sm:$0xf] %vm1358_vm0, %v2213_v55  ;;  %1466 = vst.msk [vmem:[%s2832_s6 + $0x1ac] sm:$0xf] %vm1358_vm0, %v2214_v56  ;;  %v2472_v3 = vunpack.c.l.bf16 %v2551_v57  ;;  %v2473_v4 = vunpack.c.h.bf16 %v2551_v57  ;;  %v2476_v5 = vunpack.c.l.bf16 %v2552_v58  ;;  %v2477_v6 = vunpack.c.h.bf16 %v2552_v58 }
  0xa5   : > { %1467 = vst.msk [vmem:[%s2832_s6 + $0x1b0] sm:$0xf] %vm1358_vm0, %v2215_v59  ;;  %1468 = vst.msk [vmem:[%s2832_s6 + $0x1b4] sm:$0xf] %vm1358_vm0, %v2216_v60  ;;  %v567_v7 = vmul.f32 %v3177_v18, %v2464_v63  ;;  %v568_v8 = vmul.f32 %v3177_v18, %v2465_v1  ;;  %v569_v10 = vmul.f32 %v3177_v18, %v2468_v2  ;;  %v2480_v46 = vunpack.c.l.bf16 %v2553_v34 }
  0xa6   : > { %1469 = vst.msk [vmem:[%s2832_s6 + $0x1b8] sm:$0xf] %vm1358_vm0, %v2217_v61  ;;  %1470 = vst.msk [vmem:[%s2832_s6 + $0x1bc] sm:$0xf] %vm1358_vm0, %v2218_v62  ;;  %v570_v11 = vmul.f32 %v3177_v18, %v2469_v9  ;;  %v571_v12 = vmul.f32 %v3177_v18, %v2472_v3  ;;  %v572_v13 = vmul.f32 %v3177_v18, %v2473_v4  ;;  %v2481_v47 = vunpack.c.h.bf16 %v2553_v34 }
  0xa7   : > { %v573_v14 = vmul.f32 %v3177_v18, %v2476_v5  ;;  %v574_v15 = vmul.f32 %v3177_v18, %v2477_v6  ;;  %v702_v16 = vadd.f32 %v3190_v27, %v567_v7  ;;  %v703_v17 = vadd.f32 %v3190_v27, %v568_v8 }
  0xa8   : > { %v704_v19 = vadd.f32 %v3190_v27, %v569_v10  ;;  %v705_v20 = vadd.f32 %v3190_v27, %v570_v11  ;;  %v706_v21 = vadd.f32 %v3190_v27, %v571_v12  ;;  %v707_v22 = vadd.f32 %v3190_v27, %v572_v13 }
  0xa9   : > { %v708_v23 = vadd.f32 %v3190_v27, %v573_v14  ;;  %v709_v24 = vadd.f32 %v3190_v27, %v574_v15  ;;  %v830_v25 = vmax.f32 %v702_v16, 0.0  ;;  %v831_v26 = vmax.f32 %v703_v17, 0.0 }
  0xaa   : > { %v832_v28 = vmax.f32 %v704_v19, 0.0  ;;  %v833_v29 = vmax.f32 %v705_v20, 0.0  ;;  %v834_v30 = vmax.f32 %v706_v21, 0.0  ;;  %v835_v31 = vmax.f32 %v707_v22, 0.0 }
  0xab   : > { %v836_v32 = vmax.f32 %v708_v23, 0.0  ;;  %v837_v33 = vmax.f32 %v709_v24, 0.0  ;;  %v2219_v36 = vpack.c.bf16 %v830_v25, %v830_v25  ;;  %v2220_v37 = vpack.c.bf16 %v831_v26, %v831_v26 }
  0xac   : > { %v2221_v38 = vpack.c.bf16 %v832_v28, %v832_v28  ;;  %v2222_v39 = vpack.c.bf16 %v833_v29, %v833_v29  ;;  %v2223_v42 = vpack.c.bf16 %v834_v30, %v834_v30  ;;  %v2224_v43 = vpack.c.bf16 %v835_v31, %v835_v31 }
  0xad   : > { %v2225_v44 = vpack.c.bf16 %v836_v32, %v836_v32  ;;  %v2226_v45 = vpack.c.bf16 %v837_v33, %v837_v33  ;;  %1471 = vst.msk [vmem:[%s2832_s6 + $0x1c0] sm:$0xf] %vm1358_vm0, %v2219_v36  ;;  %1472 = vst.msk [vmem:[%s2832_s6 + $0x1c4] sm:$0xf] %vm1358_vm0, %v2220_v37  ;;  %v2484_v48 = vunpack.c.l.bf16 %v2554_v35  ;;  %v2485_v49 = vunpack.c.h.bf16 %v2554_v35 }
  0xae   : > { %1473 = vst.msk [vmem:[%s2832_s6 + $0x1c8] sm:$0xf] %vm1358_vm0, %v2221_v38  ;;  %1474 = vst.msk [vmem:[%s2832_s6 + $0x1cc] sm:$0xf] %vm1358_vm0, %v2222_v39  ;;  %v2488_v50 = vunpack.c.l.bf16 %v2555_v40  ;;  %v2489_v51 = vunpack.c.h.bf16 %v2555_v40  ;;  %v2492_v52 = vunpack.c.l.bf16 %v2556_v41  ;;  %v2493_v53 = vunpack.c.h.bf16 %v2556_v41 }
  0xaf   : > { %1475 = vst.msk [vmem:[%s2832_s6 + $0x1d0] sm:$0xf] %vm1358_vm0, %v2223_v42  ;;  %1476 = vst.msk [vmem:[%s2832_s6 + $0x1d4] sm:$0xf] %vm1358_vm0, %v2224_v43  ;;  %v575_v0 = vmul.f32 %v3177_v18, %v2480_v46  ;;  %v576_v54 = vmul.f32 %v3177_v18, %v2481_v47  ;;  %v577_v55 = vmul.f32 %v3177_v18, %v2484_v48 }
  0xb0   : > { %1477 = vst.msk [vmem:[%s2832_s6 + $0x1d8] sm:$0xf] %vm1358_vm0, %v2225_v44  ;;  %1478 = vst.msk [vmem:[%s2832_s6 + $0x1dc] sm:$0xf] %vm1358_vm0, %v2226_v45  ;;  %v578_v56 = vmul.f32 %v3177_v18, %v2485_v49  ;;  %v579_v57 = vmul.f32 %v3177_v18, %v2488_v50  ;;  %v580_v58 = vmul.f32 %v3177_v18, %v2489_v51 }
  0xb1   : > { %v581_v59 = vmul.f32 %v3177_v18, %v2492_v52  ;;  %v582_v60 = vmul.f32 %v3177_v18, %v2493_v53  ;;  %v710_v61 = vadd.f32 %v3190_v27, %v575_v0  ;;  %v711_v62 = vadd.f32 %v3190_v27, %v576_v54 }
  0xb2   : > { %v712_v63 = vadd.f32 %v3190_v27, %v577_v55  ;;  %v713_v1 = vadd.f32 %v3190_v27, %v578_v56  ;;  %v714_v2 = vadd.f32 %v3190_v27, %v579_v57  ;;  %v715_v9 = vadd.f32 %v3190_v27, %v580_v58 }
  0xb3   : > { %v716_v3 = vadd.f32 %v3190_v27, %v581_v59  ;;  %v717_v4 = vadd.f32 %v3190_v27, %v582_v60  ;;  %v838_v5 = vmax.f32 %v710_v61, 0.0  ;;  %v839_v6 = vmax.f32 %v711_v62, 0.0 }
  0xb4   : > { %v840_v18 = vmax.f32 %v712_v63, 0.0  ;;  %v841_v7 = vmax.f32 %v713_v1, 0.0  ;;  %v842_v8 = vmax.f32 %v714_v2, 0.0  ;;  %v843_v10 = vmax.f32 %v715_v9, 0.0  ;;  %1493 = sbr.rel (!%p2780_p4) target bundleno = 278 (0x116), region = 36 }
  0xb5   : > { %v844_v11 = vmax.f32 %v716_v3, 0.0  ;;  %v845_v12 = vmax.f32 %v717_v4, 0.0  ;;  %v2227_v13 = vpack.c.bf16 %v838_v5, %v838_v5  ;;  %v2228_v14 = vpack.c.bf16 %v839_v6, %v839_v6 }
  0xb6   : > { %v2229_v15 = vpack.c.bf16 %v840_v18, %v840_v18  ;;  %v2230_v27 = vpack.c.bf16 %v841_v7, %v841_v7  ;;  %v2231_v16 = vpack.c.bf16 %v842_v8, %v842_v8  ;;  %v2232_v17 = vpack.c.bf16 %v843_v10, %v843_v10 }
  0xb7   : > { %v2233_v19 = vpack.c.bf16 %v844_v11, %v844_v11  ;;  %v2234_v20 = vpack.c.bf16 %v845_v12, %v845_v12  ;;  %1479 = vst.msk [vmem:[%s2832_s6 + $0x1e0] sm:$0xf] %vm1358_vm0, %v2227_v13  ;;  %1480 = vst.msk [vmem:[%s2832_s6 + $0x1e4] sm:$0xf] %vm1358_vm0, %v2228_v14 }
  0xb8   : > { %1481 = vst.msk [vmem:[%s2832_s6 + $0x1e8] sm:$0xf] %vm1358_vm0, %v2229_v15  ;;  %1482 = vst.msk [vmem:[%s2832_s6 + $0x1ec] sm:$0xf] %vm1358_vm0, %v2230_v27 }
  0xb9   : > { %1483 = vst.msk [vmem:[%s2832_s6 + $0x1f0] sm:$0xf] %vm1358_vm0, %v2231_v16  ;;  %1484 = vst.msk [vmem:[%s2832_s6 + $0x1f4] sm:$0xf] %vm1358_vm0, %v2232_v17 }
  0xba   : > { %1485 = vst.msk [vmem:[%s2832_s6 + $0x1f8] sm:$0xf] %vm1358_vm0, %v2233_v19  ;;  %1486 = vst.msk [vmem:[%s2832_s6 + $0x1fc] sm:$0xf] %vm1358_vm0, %v2234_v20 }
  0xbb   : > { %s3607_s11 = smov (!%p1496_p8, %s1495_s11), 128 }
  0xbc   : > { %s2092_s22 = sshll.u32 %s3607_s11, 6 }
  0xbd   : > { %p2095_p9 = scmp.eq.s32.totalorder %s2092_s22, 0 }
  0xbe   : > { %s3409_s23 = sshrl.u32 (!%p2095_p9), %s3607_s11, 6 }
  0xbf   : > { %1504 = sbr.rel (%p2095_p9) target bundleno = 278 (0x116), region = 40  ;;  %p2096_p10 = scmp.le.s32.totalorder (!%p2095_p9), %s3409_s23, 0 }
  0xc6   : > { %1909 = sbr.rel (%p2096_p10) target bundleno = 257 (0x101), region = 112  ;;  %s3600_s15 = smov (!%p2096_p10), %s3403_s18 }
  0xc7   : > { %s3601_s20 = smov (!%p2096_p10), %s2832_s6  ;;  %s3418_s21 = smov (!%p2096_p10), 0  }
  0xc8   : > { %s3420_s24 = smov (!%p2096_p10), 0  }
  0xcd LB: >> { %v1520_v21 = vld [vmem:[%s2709_s20] sm:$0xf]  ;;  %v1522_v22 = vld [vmem:[%s2709_s20 + $0x4] sm:$0xf]  ;;  %v1524_v23 = vld [vmem:[%s2709_s20 + $0x8] sm:$0xf]  ;;  %s2717_s24 = sphi %s3420_s24, %s1514_s24   ;;  %s2713_s21 = sphi %s3418_s21, %s3602_s21   ;;  %s2709_s20 = sphi %s3601_s20, %s1653_s20   ;;  %s2705_s15 = sphi %s3600_s15, %s1654_s15  }
  0xce   : >> { %1521 = vst [vmem:[%s2705_s15] sm:$0xf] %v1520_v21  ;;  %1523 = vst [vmem:[%s2705_s15 + $0x4] sm:$0xf] %v1522_v22  ;;  %v1526_v24 = vld [vmem:[%s2709_s20 + $0xc] sm:$0xf]  ;;  %s1648_s25 = sadd.s32 1, %s2713_s21 }
  0xcf   : >> { %1525 = vst [vmem:[%s2705_s15 + $0x8] sm:$0xf] %v1524_v23  ;;  %v1528_v25 = vld [vmem:[%s2709_s20 + $0x10] sm:$0xf]  ;;  %v1530_v26 = vld [vmem:[%s2709_s20 + $0x14] sm:$0xf]  ;;  %p1649_p11 = scmp.ge.s32.totalorder %s1648_s25, %s3409_s23 }
  0xd0   : >> { %1527 = vst [vmem:[%s2705_s15 + $0xc] sm:$0xf] %v1526_v24  ;;  %1529 = vst [vmem:[%s2705_s15 + $0x10] sm:$0xf] %v1528_v25  ;;  %v1532_v28 = vld [vmem:[%s2709_s20 + $0x18] sm:$0xf] }
  0xd1   : >> { %1531 = vst [vmem:[%s2705_s15 + $0x14] sm:$0xf] %v1530_v26  ;;  %v1534_v29 = vld [vmem:[%s2709_s20 + $0x1c] sm:$0xf]  ;;  %v1536_v30 = vld [vmem:[%s2709_s20 + $0x20] sm:$0xf] }
  0xd2   : >> { %1533 = vst [vmem:[%s2705_s15 + $0x18] sm:$0xf] %v1532_v28  ;;  %1535 = vst [vmem:[%s2705_s15 + $0x1c] sm:$0xf] %v1534_v29  ;;  %v1538_v31 = vld [vmem:[%s2709_s20 + $0x24] sm:$0xf] }
  0xd3   : >> { %1537 = vst [vmem:[%s2705_s15 + $0x20] sm:$0xf] %v1536_v30  ;;  %v1540_v32 = vld [vmem:[%s2709_s20 + $0x28] sm:$0xf]  ;;  %v1542_v33 = vld [vmem:[%s2709_s20 + $0x2c] sm:$0xf] }
  0xd4   : >> { %1539 = vst [vmem:[%s2705_s15 + $0x24] sm:$0xf] %v1538_v31  ;;  %1541 = vst [vmem:[%s2705_s15 + $0x28] sm:$0xf] %v1540_v32  ;;  %v1544_v34 = vld [vmem:[%s2709_s20 + $0x30] sm:$0xf] }
  0xd5   : >> { %1543 = vst [vmem:[%s2705_s15 + $0x2c] sm:$0xf] %v1542_v33  ;;  %v1546_v35 = vld [vmem:[%s2709_s20 + $0x34] sm:$0xf]  ;;  %v1548_v36 = vld [vmem:[%s2709_s20 + $0x38] sm:$0xf] }
  0xd6   : >> { %1545 = vst [vmem:[%s2705_s15 + $0x30] sm:$0xf] %v1544_v34  ;;  %1547 = vst [vmem:[%s2705_s15 + $0x34] sm:$0xf] %v1546_v35  ;;  %v1550_v37 = vld [vmem:[%s2709_s20 + $0x3c] sm:$0xf] }
  0xd7   : >> { %1549 = vst [vmem:[%s2705_s15 + $0x38] sm:$0xf] %v1548_v36  ;;  %v1552_v38 = vld [vmem:[%s2709_s20 + $0x40] sm:$0xf]  ;;  %v1554_v39 = vld [vmem:[%s2709_s20 + $0x44] sm:$0xf] }
  0xd8   : >> { %1551 = vst [vmem:[%s2705_s15 + $0x3c] sm:$0xf] %v1550_v37  ;;  %1553 = vst [vmem:[%s2705_s15 + $0x40] sm:$0xf] %v1552_v38  ;;  %v1556_v40 = vld [vmem:[%s2709_s20 + $0x48] sm:$0xf] }
  0xd9   : >> { %1555 = vst [vmem:[%s2705_s15 + $0x44] sm:$0xf] %v1554_v39  ;;  %v1558_v41 = vld [vmem:[%s2709_s20 + $0x4c] sm:$0xf]  ;;  %v1560_v42 = vld [vmem:[%s2709_s20 + $0x50] sm:$0xf] }
  0xda   : >> { %1557 = vst [vmem:[%s2705_s15 + $0x48] sm:$0xf] %v1556_v40  ;;  %1559 = vst [vmem:[%s2705_s15 + $0x4c] sm:$0xf] %v1558_v41  ;;  %v1562_v43 = vld [vmem:[%s2709_s20 + $0x54] sm:$0xf] }
  0xdb   : >> { %1561 = vst [vmem:[%s2705_s15 + $0x50] sm:$0xf] %v1560_v42  ;;  %v1564_v44 = vld [vmem:[%s2709_s20 + $0x58] sm:$0xf]  ;;  %v1566_v45 = vld [vmem:[%s2709_s20 + $0x5c] sm:$0xf] }
  0xdc   : >> { %1563 = vst [vmem:[%s2705_s15 + $0x54] sm:$0xf] %v1562_v43  ;;  %1565 = vst [vmem:[%s2705_s15 + $0x58] sm:$0xf] %v1564_v44  ;;  %v1568_v46 = vld [vmem:[%s2709_s20 + $0x60] sm:$0xf] }
  0xdd   : >> { %1567 = vst [vmem:[%s2705_s15 + $0x5c] sm:$0xf] %v1566_v45  ;;  %v1570_v47 = vld [vmem:[%s2709_s20 + $0x64] sm:$0xf]  ;;  %v1572_v48 = vld [vmem:[%s2709_s20 + $0x68] sm:$0xf] }
  0xde   : >> { %1569 = vst [vmem:[%s2705_s15 + $0x60] sm:$0xf] %v1568_v46  ;;  %1571 = vst [vmem:[%s2705_s15 + $0x64] sm:$0xf] %v1570_v47  ;;  %v1574_v49 = vld [vmem:[%s2709_s20 + $0x6c] sm:$0xf] }
  0xdf   : >> { %1573 = vst [vmem:[%s2705_s15 + $0x68] sm:$0xf] %v1572_v48  ;;  %v1576_v50 = vld [vmem:[%s2709_s20 + $0x70] sm:$0xf]  ;;  %v1578_v51 = vld [vmem:[%s2709_s20 + $0x74] sm:$0xf] }
  0xe0   : >> { %1575 = vst [vmem:[%s2705_s15 + $0x6c] sm:$0xf] %v1574_v49  ;;  %1577 = vst [vmem:[%s2705_s15 + $0x70] sm:$0xf] %v1576_v50  ;;  %v1580_v52 = vld [vmem:[%s2709_s20 + $0x78] sm:$0xf] }
  0xe1   : >> { %1579 = vst [vmem:[%s2705_s15 + $0x74] sm:$0xf] %v1578_v51  ;;  %v1582_v53 = vld [vmem:[%s2709_s20 + $0x7c] sm:$0xf]  ;;  %v1584_v0 = vld [vmem:[%s2709_s20 + $0x80] sm:$0xf] }
  0xe2   : >> { %1581 = vst [vmem:[%s2705_s15 + $0x78] sm:$0xf] %v1580_v52  ;;  %1583 = vst [vmem:[%s2705_s15 + $0x7c] sm:$0xf] %v1582_v53  ;;  %v1586_v54 = vld [vmem:[%s2709_s20 + $0x84] sm:$0xf] }
  0xe3   : >> { %1585 = vst [vmem:[%s2705_s15 + $0x80] sm:$0xf] %v1584_v0  ;;  %v1588_v55 = vld [vmem:[%s2709_s20 + $0x88] sm:$0xf]  ;;  %v1590_v56 = vld [vmem:[%s2709_s20 + $0x8c] sm:$0xf] }
  0xe4   : >> { %1587 = vst [vmem:[%s2705_s15 + $0x84] sm:$0xf] %v1586_v54  ;;  %1589 = vst [vmem:[%s2705_s15 + $0x88] sm:$0xf] %v1588_v55  ;;  %v1592_v57 = vld [vmem:[%s2709_s20 + $0x90] sm:$0xf] }
  0xe5   : >> { %1591 = vst [vmem:[%s2705_s15 + $0x8c] sm:$0xf] %v1590_v56  ;;  %v1594_v58 = vld [vmem:[%s2709_s20 + $0x94] sm:$0xf]  ;;  %v1596_v59 = vld [vmem:[%s2709_s20 + $0x98] sm:$0xf] }
  0xe6   : >> { %1593 = vst [vmem:[%s2705_s15 + $0x90] sm:$0xf] %v1592_v57  ;;  %1595 = vst [vmem:[%s2705_s15 + $0x94] sm:$0xf] %v1594_v58  ;;  %v1598_v60 = vld [vmem:[%s2709_s20 + $0x9c] sm:$0xf] }
  0xe7   : >> { %1597 = vst [vmem:[%s2705_s15 + $0x98] sm:$0xf] %v1596_v59  ;;  %v1600_v61 = vld [vmem:[%s2709_s20 + $0xa0] sm:$0xf]  ;;  %v1602_v62 = vld [vmem:[%s2709_s20 + $0xa4] sm:$0xf] }
  0xe8   : >> { %1599 = vst [vmem:[%s2705_s15 + $0x9c] sm:$0xf] %v1598_v60  ;;  %1601 = vst [vmem:[%s2705_s15 + $0xa0] sm:$0xf] %v1600_v61  ;;  %v1604_v63 = vld [vmem:[%s2709_s20 + $0xa8] sm:$0xf] }
  0xe9   : >> { %1603 = vst [vmem:[%s2705_s15 + $0xa4] sm:$0xf] %v1602_v62  ;;  %v1606_v1 = vld [vmem:[%s2709_s20 + $0xac] sm:$0xf]  ;;  %v1608_v2 = vld [vmem:[%s2709_s20 + $0xb0] sm:$0xf] }
  0xea   : >> { %1605 = vst [vmem:[%s2705_s15 + $0xa8] sm:$0xf] %v1604_v63  ;;  %1607 = vst [vmem:[%s2705_s15 + $0xac] sm:$0xf] %v1606_v1  ;;  %v1610_v9 = vld [vmem:[%s2709_s20 + $0xb4] sm:$0xf] }
  0xeb   : >> { %1609 = vst [vmem:[%s2705_s15 + $0xb0] sm:$0xf] %v1608_v2  ;;  %v1612_v3 = vld [vmem:[%s2709_s20 + $0xb8] sm:$0xf]  ;;  %v1614_v4 = vld [vmem:[%s2709_s20 + $0xbc] sm:$0xf] }
  0xec   : >> { %1611 = vst [vmem:[%s2705_s15 + $0xb4] sm:$0xf] %v1610_v9  ;;  %1613 = vst [vmem:[%s2705_s15 + $0xb8] sm:$0xf] %v1612_v3  ;;  %v1616_v5 = vld [vmem:[%s2709_s20 + $0xc0] sm:$0xf] }
  0xed   : >> { %1615 = vst [vmem:[%s2705_s15 + $0xbc] sm:$0xf] %v1614_v4  ;;  %v1618_v6 = vld [vmem:[%s2709_s20 + $0xc4] sm:$0xf]  ;;  %v1620_v18 = vld [vmem:[%s2709_s20 + $0xc8] sm:$0xf] }
  0xee   : >> { %1617 = vst [vmem:[%s2705_s15 + $0xc0] sm:$0xf] %v1616_v5  ;;  %1619 = vst [vmem:[%s2705_s15 + $0xc4] sm:$0xf] %v1618_v6  ;;  %v1622_v7 = vld [vmem:[%s2709_s20 + $0xcc] sm:$0xf] }
  0xef   : >> { %1621 = vst [vmem:[%s2705_s15 + $0xc8] sm:$0xf] %v1620_v18  ;;  %v1624_v8 = vld [vmem:[%s2709_s20 + $0xd0] sm:$0xf]  ;;  %v1626_v10 = vld [vmem:[%s2709_s20 + $0xd4] sm:$0xf] }
  0xf0   : >> { %1623 = vst [vmem:[%s2705_s15 + $0xcc] sm:$0xf] %v1622_v7  ;;  %1625 = vst [vmem:[%s2705_s15 + $0xd0] sm:$0xf] %v1624_v8  ;;  %v1628_v11 = vld [vmem:[%s2709_s20 + $0xd8] sm:$0xf] }
  0xf1   : >> { %1627 = vst [vmem:[%s2705_s15 + $0xd4] sm:$0xf] %v1626_v10  ;;  %v1630_v12 = vld [vmem:[%s2709_s20 + $0xdc] sm:$0xf]  ;;  %v1632_v13 = vld [vmem:[%s2709_s20 + $0xe0] sm:$0xf] }
  0xf2   : >> { %1629 = vst [vmem:[%s2705_s15 + $0xd8] sm:$0xf] %v1628_v11  ;;  %1631 = vst [vmem:[%s2705_s15 + $0xdc] sm:$0xf] %v1630_v12  ;;  %v1634_v14 = vld [vmem:[%s2709_s20 + $0xe4] sm:$0xf] }
  0xf3   : >> { %1633 = vst [vmem:[%s2705_s15 + $0xe0] sm:$0xf] %v1632_v13  ;;  %v1636_v15 = vld [vmem:[%s2709_s20 + $0xe8] sm:$0xf]  ;;  %v1638_v27 = vld [vmem:[%s2709_s20 + $0xec] sm:$0xf] }
  0xf4   : >> { %1635 = vst [vmem:[%s2705_s15 + $0xe4] sm:$0xf] %v1634_v14  ;;  %1637 = vst [vmem:[%s2705_s15 + $0xe8] sm:$0xf] %v1636_v15  ;;  %v1640_v16 = vld [vmem:[%s2709_s20 + $0xf0] sm:$0xf] }
  0xf5   : >> { %1639 = vst [vmem:[%s2705_s15 + $0xec] sm:$0xf] %v1638_v27  ;;  %v1642_v17 = vld [vmem:[%s2709_s20 + $0xf4] sm:$0xf]  ;;  %v1644_v19 = vld [vmem:[%s2709_s20 + $0xf8] sm:$0xf] }
  0xf6   : >> { %1641 = vst [vmem:[%s2705_s15 + $0xf0] sm:$0xf] %v1640_v16  ;;  %1643 = vst [vmem:[%s2705_s15 + $0xf4] sm:$0xf] %v1642_v17  ;;  %v1646_v20 = vld [vmem:[%s2709_s20 + $0xfc] sm:$0xf] }
  0xf7   : >> { %1645 = vst [vmem:[%s2705_s15 + $0xf8] sm:$0xf] %v1644_v19  ;;  %1647 = vst [vmem:[%s2705_s15 + $0xfc] sm:$0xf] %v1646_v20  ;;  %s3609_s25 = smov (%p1649_p11, %s1648_s25), 0  ;;  %s1514_s24 = sadd.s32 1, %s2717_s24  }
  0xf8   : >> { %s2097_s26 = sshll.u32 %s3609_s25, 8  ;;  %p1513_p12 = scmp.ge.s32.totalorder %s1514_s24, %s3409_s23 }
  0xf9   : >> { %s1653_s20 = scalar_lea.vmem %s2832_s6, %s2097_s26 [#allocation2]   ;;  %s1654_s15 = scalar_lea.vmem %s3403_s18, %s2097_s26  }
  0xfa   : >> { %s3602_s21 = smov %s3609_s25  ;;  %1516 = sbr.rel (!%p1513_p12) target bundleno = 205 (0xcd), region = 118 }
 0x101 PF: > { %s3577_s27 = sand.u32 63, %s3607_s11   ;;  %s2236_s28 = sshll.u32 %s3409_s23, 8 }
 0x102   : > { %s1659_s29 = scalar_lea.vmem %s2832_s6, %s2236_s28 [#allocation2]   ;;  %s1661_s30 = scalar_lea.vmem %s3403_s18, %s2236_s28  }
 0x103   : > { %p2102_p13 = scmp.le.s32.totalorder %s3577_s27, 0 }
 0x104   : > { %s2719_s4 = smov (!%p2102_p13), %s1661_s30   ;;  %s2723_s5 = smov (!%p2102_p13), %s1659_s29  }
 0x105   : > { %1923 = sbr.rel (%p2102_p13) target bundleno = 278 (0x116), region = 123  ;;  %s2727_s7 = smov (!%p2102_p13), 0  }
 0x106   : > { %s2731_s8 = smov (!%p2102_p13), 0  }
 0x10c LB: >> { %v1671_v21 = vld [vmem:[%s2725_s5] sm:$0xf]  ;;  %s1673_s9 = sadd.s32 1, %s2729_s7  ;;  %s1665_s8 = sadd.s32 1, %s2733_s8   ;;  %s2733_s8 = sphi %s2731_s8, %s1665_s8   ;;  %s2729_s7 = sphi %s2727_s7, %s2728_s7   ;;  %s2725_s5 = sphi %s2723_s5, %s1678_s5   ;;  %s2721_s4 = sphi %s2719_s4, %s1679_s4  }
 0x10d   : >> { %1672 = vst [vmem:[%s2721_s4] sm:$0xf] %v1671_v21  ;;  %p1674_p0 = scmp.ge.s32.totalorder %s1673_s9, %s3577_s27  ;;  %p1664_p1 = scmp.ge.s32.totalorder %s1665_s8, %s3577_s27 }
 0x10f   : >> { %s3611_s9 = smov (%p1674_p0, %s1673_s9), 0  ;;  %1667 = sbr.rel (!%p1664_p1) target bundleno = 268 (0x10c), region = 129 }
 0x110   : >> { %s2103_s6 = sshll.u32 %s3611_s9, 2  ;;  %s2728_s7 = smov %s3611_s9  }
 0x111   : >> { %s1678_s5 = scalar_lea.vmem %s1659_s29, %s2103_s6 [#allocation2]   ;;  %s1679_s4 = scalar_lea.vmem %s1661_s30, %s2103_s6  }
 0x116 PF: > { %p10_p2 = scmp.ge.s32.totalorder %s2770_s16, 46   ;;  %s3603_s12 = smov %s2697_s13 }
 0x117   : > { %s3604_s13 = smov %s2778_s19  ;;  %s3605_s14 = smov %s2770_s16 }
 0x118   :  { %12 = sbr.rel (!%p10_p2) target bundleno = 2 (0x2), region = 140 }

</bundles_post_ra>
